<compile_context>
chip_gen: v6e
topology: v6e:2x2x1
jax: 0.10.0
libtpu: 0.0.40
codegen_flags: <defaults>
</compile_context>

<pallas_src>
import math
import functools

import jax
import jax.numpy as jnp
from jax.experimental import pallas as pl
from jax.experimental.pallas import tpu as pltpu


def _encoder_layer_kernel(nhead, seq_len, batch_tile,
                          x_ref, pos_ref,
                          wqk_ref, bqk_ref,
                          wv_ref, bv_ref,
                          wo_ref, bo_ref,
                          g1_ref, be1_ref,
                          w1_ref, b1_ref, w2_ref, b2_ref,
                          g2_ref, be2_ref,
                          out_ref):
    x = x_ref[...]                         # (rows, D) f32
    rows, d = x.shape
    dh = d // nhead
    mdt = wqk_ref.dtype                    # MXU operand dtype (bf16 in production)

    qk_in = x + pos_ref[...]               # q = k = with_pos_embed(src, pos)

    # Fused Q|K projection (1/sqrt(dh) already folded into the Q half) + V proj.
    qk = jnp.dot(qk_in.astype(mdt), wqk_ref[...],
                 preferred_element_type=jnp.float32) + bqk_ref[...]
    v = jnp.dot(x.astype(mdt), wv_ref[...],
                preferred_element_type=jnp.float32) + bv_ref[...]
    q = qk[:, :d].astype(mdt)
    k = qk[:, d:].astype(mdt)
    v = v.astype(mdt)

    # Head split: (rows, D) -> (batch_tile*nhead, S, dh), head-major batch axis.
    # Static lane slices + leading-axis concat (reliable Mosaic lowering).
    def split_heads(t):
        return jnp.concatenate(
            [t[:, h * dh:(h + 1) * dh].reshape(batch_tile, seq_len, dh)
             for h in range(nhead)], axis=0)

    qh = split_heads(q)
    kh = split_heads(k)
    vh = split_heads(v)

    # One batched attention over all (head, batch) pairs.
    s = jnp.einsum('bqd,bkd->bqk', qh, kh,
                   preferred_element_type=jnp.float32)      # (H*bt, S, S) f32
    s = s - jnp.max(s, axis=-1, keepdims=True)
    e = jnp.exp(s)
    p = e / jnp.sum(e, axis=-1, keepdims=True)               # exact reciprocal
    # TODO(synk): for production S, tile over the KV axis with an online softmax
    # (flash-style running max/sum in VMEM scratch) instead of materializing the
    # full (H*bt, S, S) score tensor.
    oh = jnp.einsum('bqk,bkd->bqd', p.astype(mdt), vh,
                    preferred_element_type=jnp.float32)      # (H*bt, S, dh) f32

    # Head merge back to the concat layout, then ONE full-K W_o matmul.
    o = jnp.concatenate(
        [oh[h * batch_tile:(h + 1) * batch_tile].reshape(rows, dh)
         for h in range(nhead)], axis=-1)                     # (rows, D) f32
    attn = jnp.dot(o.astype(mdt), wo_ref[...],
                   preferred_element_type=jnp.float32) + bo_ref[...]

    # Residual + LayerNorm1 (dropout1 = identity in eval).
    y = x + attn
    mu = jnp.mean(y, axis=-1, keepdims=True)
    var = jnp.mean(jnp.square(y - mu), axis=-1, keepdims=True)
    y = (y - mu) * jax.lax.rsqrt(var + 1e-5) * g1_ref[...] + be1_ref[...]

    # FFN: linear2(relu(linear1(y)))  (dropout = identity).
    # TODO(synk): for production FF, add an FF-tiled grid axis with an f32 VMEM
    # accumulator (init/finalize via pl.when); optionally fp8 w1/w2 on v7x.
    h1 = jnp.dot(y.astype(mdt), w1_ref[...],
                 preferred_element_type=jnp.float32) + b1_ref[...]
    h1 = jnp.maximum(h1, 0.0)
    ff = jnp.dot(h1.astype(mdt), w2_ref[...],
                 preferred_element_type=jnp.float32) + b2_ref[...]

    # Residual + LayerNorm2.
    z = y + ff
    mu2 = jnp.mean(z, axis=-1, keepdims=True)
    var2 = jnp.mean(jnp.square(z - mu2), axis=-1, keepdims=True)
    out_ref[...] = ((z - mu2) * jax.lax.rsqrt(var2 + 1e-5) * g2_ref[...]
                    + be2_ref[...]).astype(out_ref.dtype)


def prepare_encoder_params(params, nhead, mxu_dtype=jnp.bfloat16):
    """One-time prep: fuse Q|K (scale folded into Q) and cast weights to the
    MXU operand dtype.  Done outside the per-call path."""
    D = params['wq'].shape[0]
    dh = D // nhead
    scale = 1.0 / math.sqrt(dh)
    f32 = jnp.float32
    return {
        'wqk': jnp.concatenate([params['wq'] * scale, params['wk']],
                               axis=1).astype(mxu_dtype),          # (D, 2D)
        'bqk': jnp.concatenate([params['bq'] * scale, params['bk']],
                               axis=1).astype(f32),                # (1, 2D)
        'wv': params['wv'].astype(mxu_dtype), 'bv': params['bv'].astype(f32),
        'wo': params['wo'].astype(mxu_dtype), 'bo': params['bo'].astype(f32),
        'g1': params['g1'].astype(f32), 'be1': params['be1'].astype(f32),
        'w1': params['w1'].astype(mxu_dtype), 'b1': params['b1'].astype(f32),
        'w2': params['w2'].astype(mxu_dtype), 'b2': params['b2'].astype(f32),
        'g2': params['g2'].astype(f32), 'be2': params['be2'].astype(f32),
    }


def transformer_encoder_layer(src, pos, prep, nhead, *, batch_tile=None,
                              single_buffer_weights=True):
    """forward_post of TransformerEncoderLayer (batch_first, dropout = identity)."""
    B, S, D = src.shape
    assert D % nhead == 0
    FF = prep['w1'].shape[1]
    if batch_tile is None:
        # >= 2 grid steps: shards across v7x's two TensorCores and lets the
        # activation tiles software-pipeline against compute.
        # TODO(synk): for production B, pick batch_tile so the row slab is a few MiB.
        batch_tile = 1 if B > 1 else B
    assert B % batch_tile == 0
    rows_per_step = batch_tile * S
    grid = (B // batch_tile,)

    src2 = src.reshape(B * S, D).astype(jnp.float32)
    pos2 = pos.reshape(B * S, D).astype(jnp.float32)

    # TODO(synk): D=32 here (toy shape) means lane-sparse (32/128) VPU/MXU tiles
    # and masked stores; for real model dims (>=128, ideally multiples of 128)
    # this is free, otherwise pad / repack the channel dim.
    act_spec = pl.BlockSpec((rows_per_step, D), lambda i: (i, 0))
    out_spec = pl.BlockSpec((rows_per_step, D), lambda i: (i, 0))

    weight_args = (prep['wqk'], prep['bqk'], prep['wv'], prep['bv'],
                   prep['wo'], prep['bo'], prep['g1'], prep['be1'],
                   prep['w1'], prep['b1'], prep['w2'], prep['b2'],
                   prep['g2'], prep['be2'])
    weight_bytes = sum(int(w.size) * w.dtype.itemsize for w in weight_args)

    # Conservative VMEM plan: (possibly double-buffered) weights + double-buffered
    # activation tiles + in-kernel f32 intermediates, with 2x headroom.
    rows = rows_per_step
    act_bytes = 3 * rows * D * 4 * 2
    inter_bytes = 4 * (rows * 3 * D                     # qk + v
                       + 2 * batch_tile * nhead * S * S  # scores + probs
                       + rows * FF                       # ffn hidden
                       + 4 * rows * D)                   # q/k/v/attn copies
    est = 2 * weight_bytes + act_bytes + inter_bytes
    vmem_limit = int(min(128 * 1024 * 1024, max(16 * 1024 * 1024, 2 * est)))

    # Whole-call cost hint for the XLA scheduler.
    R = B * S
    dh = D // nhead
    flops = (2 * R * D * (3 * D)             # fused QK + V projections
             + 4 * B * nhead * S * S * dh    # scores + PV
             + 2 * R * D * D                 # output projection
             + 4 * R * D * FF)               # FFN
    cost = pl.CostEstimate(flops=int(flops),
                           transcendentals=int(B * nhead * S * S + 4 * R),
                           bytes_accessed=int(3 * R * D * 4 + weight_bytes))

    def build(single_buffer):
        if single_buffer:
            def const2d(shape):   # block-invariant weights: one resident buffer
                return pl.BlockSpec(shape, lambda i: (0, 0),
                                    pipeline_mode=pl.Buffered(1))
        else:
            def const2d(shape):
                return pl.BlockSpec(shape, lambda i: (0, 0))
        in_specs = [
            act_spec, act_spec,                         # src rows, pos rows
            const2d((D, 2 * D)), const2d((1, 2 * D)),   # wqk, bqk
            const2d((D, D)), const2d((1, D)),           # wv, bv
            const2d((D, D)), const2d((1, D)),           # wo, bo
            const2d((1, D)), const2d((1, D)),           # ln1 gamma, beta
            const2d((D, FF)), const2d((1, FF)),         # w1, b1
            const2d((FF, D)), const2d((1, D)),          # w2, b2
            const2d((1, D)), const2d((1, D)),           # ln2 gamma, beta
        ]
        return pl.pallas_call(
            functools.partial(_encoder_layer_kernel, nhead, S, batch_tile),
            out_shape=jax.ShapeDtypeStruct((B * S, D), jnp.float32),
            grid_spec=pltpu.PrefetchScalarGridSpec(
                num_scalar_prefetch=0, grid=grid,
                in_specs=in_specs, out_specs=out_spec),
            compiler_params=pltpu.CompilerParams(
                dimension_semantics=("parallel",),
                vmem_limit_bytes=vmem_limit),
            cost_estimate=cost,
        )

    args = (src2, pos2) + weight_args
    if single_buffer_weights:
        try:
            out2 = build(True)(*args)
        except Exception:
            # TODO(synk): drop this fallback once pl.Buffered(1) on block-invariant
            # pallas_call input specs is confirmed on the target jax/Mosaic version.
            out2 = build(False)(*args)
    else:
        out2 = build(False)(*args)
    return out2.reshape(B, S, D)


# ----------------------------- plain-JAX reference -----------------------------

def _layernorm(x, g, b, eps=1e-5):
    mu = jnp.mean(x, axis=-1, keepdims=True)
    var = jnp.mean(jnp.square(x - mu), axis=-1, keepdims=True)
    return (x - mu) * jax.lax.rsqrt(var + eps) * g + b


def ref_forward(src, pos, p, nhead):
    """forward_post reference (dropout = identity, no masks)."""
    x = src
    B, S, D = x.shape
    dh = D // nhead
    qk = x + pos
    q = jnp.einsum('bsd,de->bse', qk, p['wq']) + p['bq'][0]
    k = jnp.einsum('bsd,de->bse', qk, p['wk']) + p['bk'][0]
    v = jnp.einsum('bsd,de->bse', x, p['wv']) + p['bv'][0]
    qh = q.reshape(B, S, nhead, dh).transpose(0, 2, 1, 3)
    kh = k.reshape(B, S, nhead, dh).transpose(0, 2, 1, 3)
    vh = v.reshape(B, S, nhead, dh).transpose(0, 2, 1, 3)
    s = jnp.einsum('bhqd,bhkd->bhqk', qh, kh) / math.sqrt(dh)
    a = jax.nn.softmax(s, axis=-1)
    o = jnp.einsum('bhqk,bhkd->bhqd', a, vh).transpose(0, 2, 1, 3).reshape(B, S, D)
    o = jnp.einsum('bsd,de->bse', o, p['wo']) + p['bo'][0]
    y = _layernorm(x + o, p['g1'][0], p['be1'][0])
    h1 = jnp.maximum(jnp.einsum('bsd,df->bsf', y, p['w1']) + p['b1'][0], 0.0)
    ff = jnp.einsum('bsf,fd->bsd', h1, p['w2']) + p['b2'][0]
    return _layernorm(y + ff, p['g2'][0], p['be2'][0])


if __name__ == "__main__":
    # Make the f32 check meaningful on both real TPUs and the interpreter:
    # the plain-JAX reference and the kernel's dots both use full-f32 matmuls.
    jax.config.update("jax_default_matmul_precision", "highest")

    # Small shapes consistent with the module: seq=8, d_model=32, nhead=4, ff=64.
    B, S, D, NHEAD, FF = 2, 8, 32, 4, 64

    keys = jax.random.split(jax.random.PRNGKey(0), 14)

    def rnd(k, shape, scale):
        return jax.random.normal(k, shape, jnp.float32) * scale

    params = {
        'wq': rnd(keys[0], (D, D), 1.0 / math.sqrt(D)),
        'wk': rnd(keys[1], (D, D), 1.0 / math.sqrt(D)),
        'wv': rnd(keys[2], (D, D), 1.0 / math.sqrt(D)),
        'bq': rnd(keys[3], (1, D), 0.02),
        'bk': rnd(keys[4], (1, D), 0.02),
        'bv': rnd(keys[5], (1, D), 0.02),
        'wo': rnd(keys[6], (D, D), 1.0 / math.sqrt(D)),
        'bo': rnd(keys[7], (1, D), 0.02),
        'g1': jnp.ones((1, D), jnp.float32),
        'be1': jnp.zeros((1, D), jnp.float32),
        'w1': rnd(keys[8], (D, FF), 1.0 / math.sqrt(D)),
        'b1': rnd(keys[9], (1, FF), 0.02),
        'w2': rnd(keys[10], (FF, D), 1.0 / math.sqrt(FF)),
        'b2': rnd(keys[11], (1, D), 0.02),
        'g2': jnp.ones((1, D), jnp.float32),
        'be2': jnp.zeros((1, D), jnp.float32),
    }
    src = jax.random.normal(keys[12], (B, S, D), jnp.float32)
    pos = jax.random.normal(keys[13], (B, S, D), jnp.float32)

    ref = ref_forward(src, pos, params, NHEAD)

    # 1) Exact-precision path (f32 MXU operands): tight check.
    prep32 = prepare_encoder_params(params, NHEAD, mxu_dtype=jnp.float32)
    out32 = jax.block_until_ready(
        transformer_encoder_layer(src, pos, prep32, NHEAD))
    assert out32.shape == (B, S, D)
    assert jnp.allclose(out32, ref, atol=1e-3, rtol=1e-3), (
        f"f32 path max abs err {float(jnp.max(jnp.abs(out32 - ref)))}")

    # 2) Production path (bf16 MXU operands, f32 accumulation): bf16 rounding
    #    (~2^-8 relative per operand) propagated through attention + FFN.
    prep16 = prepare_encoder_params(params, NHEAD, mxu_dtype=jnp.bfloat16)
    out16 = jax.block_until_ready(
        transformer_encoder_layer(src, pos, prep16, NHEAD))
    assert out16.shape == (B, S, D)
    assert jnp.allclose(out16, ref, atol=8e-2, rtol=8e-2), (
        f"bf16 path max abs err {float(jnp.max(jnp.abs(out16 - ref)))}")

    print("KERNEL_OK")
</pallas_src>

<mosaic_0001>
module attributes {stable_mosaic.version = 11 : i64} {
  func.func @_encoder_layer_kernel(%arg0: i32, %arg1: memref<8x32xf32, #tpu.memory_space<vmem>>, %arg2: memref<8x32xf32, #tpu.memory_space<vmem>>, %arg3: memref<32x64xf32, #tpu.memory_space<vmem>>, %arg4: memref<1x64xf32, #tpu.memory_space<vmem>>, %arg5: memref<32x32xf32, #tpu.memory_space<vmem>>, %arg6: memref<1x32xf32, #tpu.memory_space<vmem>>, %arg7: memref<32x32xf32, #tpu.memory_space<vmem>>, %arg8: memref<1x32xf32, #tpu.memory_space<vmem>>, %arg9: memref<1x32xf32, #tpu.memory_space<vmem>>, %arg10: memref<1x32xf32, #tpu.memory_space<vmem>>, %arg11: memref<32x64xf32, #tpu.memory_space<vmem>>, %arg12: memref<1x64xf32, #tpu.memory_space<vmem>>, %arg13: memref<64x32xf32, #tpu.memory_space<vmem>>, %arg14: memref<1x32xf32, #tpu.memory_space<vmem>>, %arg15: memref<1x32xf32, #tpu.memory_space<vmem>>, %arg16: memref<1x32xf32, #tpu.memory_space<vmem>>, %arg17: memref<8x32xf32, #tpu.memory_space<vmem>>) attributes {dimension_semantics = [#tpu.dimension_semantics<parallel>], iteration_bounds = array<i64: 2>, scalar_prefetch = 0 : i64, scratch_operands = 0 : i64, tpu.core_type = #tpu.core_type<tc>, window_params = [{transform_indices = @transform_0, window_bounds = array<i64: 8, 32>}, {transform_indices = @transform_1, window_bounds = array<i64: 8, 32>}, {pipeline_mode = #tpu.pipeline_mode<synchronous>, transform_indices = @transform_2, window_bounds = array<i64: 32, 64>}, {pipeline_mode = #tpu.pipeline_mode<synchronous>, transform_indices = @transform_3, window_bounds = array<i64: 1, 64>}, {pipeline_mode = #tpu.pipeline_mode<synchronous>, transform_indices = @transform_4, window_bounds = array<i64: 32, 32>}, {pipeline_mode = #tpu.pipeline_mode<synchronous>, transform_indices = @transform_5, window_bounds = array<i64: 1, 32>}, {pipeline_mode = #tpu.pipeline_mode<synchronous>, transform_indices = @transform_6, window_bounds = array<i64: 32, 32>}, {pipeline_mode = #tpu.pipeline_mode<synchronous>, transform_indices = @transform_7, window_bounds = array<i64: 1, 32>}, {pipeline_mode = #tpu.pipeline_mode<synchronous>, transform_indices = @transform_8, window_bounds = array<i64: 1, 32>}, {pipeline_mode = #tpu.pipeline_mode<synchronous>, transform_indices = @transform_9, window_bounds = array<i64: 1, 32>}, {pipeline_mode = #tpu.pipeline_mode<synchronous>, transform_indices = @transform_10, window_bounds = array<i64: 32, 64>}, {pipeline_mode = #tpu.pipeline_mode<synchronous>, transform_indices = @transform_11, window_bounds = array<i64: 1, 64>}, {pipeline_mode = #tpu.pipeline_mode<synchronous>, transform_indices = @transform_12, window_bounds = array<i64: 64, 32>}, {pipeline_mode = #tpu.pipeline_mode<synchronous>, transform_indices = @transform_13, window_bounds = array<i64: 1, 32>}, {pipeline_mode = #tpu.pipeline_mode<synchronous>, transform_indices = @transform_14, window_bounds = array<i64: 1, 32>}, {pipeline_mode = #tpu.pipeline_mode<synchronous>, transform_indices = @transform_15, window_bounds = array<i64: 1, 32>}, {transform_indices = @transform_16, window_bounds = array<i64: 8, 32>}]} {
    %c0 = arith.constant 0 : index
    %c0_0 = arith.constant 0 : index
    %0 = vector.load %arg1[%c0, %c0_0] : memref<8x32xf32, #tpu.memory_space<vmem>>, vector<8x32xf32>
    %c0_1 = arith.constant 0 : index
    %c0_2 = arith.constant 0 : index
    %1 = vector.load %arg2[%c0_1, %c0_2] : memref<8x32xf32, #tpu.memory_space<vmem>>, vector<8x32xf32>
    %2 = arith.addf %0, %1 : vector<8x32xf32>
    %c0_3 = arith.constant 0 : index
    %c0_4 = arith.constant 0 : index
    %3 = vector.load %arg3[%c0_3, %c0_4] : memref<32x64xf32, #tpu.memory_space<vmem>>, vector<32x64xf32>
    %cst = arith.constant dense<0.000000e+00> : vector<8x64xf32>
    %4 = tpu.matmul %2, %3, %cst {dimension_numbers = #tpu.dot_dimension_numbers<[1], [0], [0], [1], [0, 0, 1, 1], [], []>, precision = #tpu.contract_precision<fp32>} : vector<8x32xf32>, vector<32x64xf32>, vector<8x64xf32> -> vector<8x64xf32>
    %c0_5 = arith.constant 0 : index
    %c0_6 = arith.constant 0 : index
    %5 = vector.load %arg4[%c0_5, %c0_6] : memref<1x64xf32, #tpu.memory_space<vmem>>, vector<1x64xf32>
    %6 = vector.broadcast %5 : vector<1x64xf32> to vector<8x64xf32>
    %7 = arith.addf %4, %6 : vector<8x64xf32>
    %c0_7 = arith.constant 0 : index
    %c0_8 = arith.constant 0 : index
    %8 = vector.load %arg5[%c0_7, %c0_8] : memref<32x32xf32, #tpu.memory_space<vmem>>, vector<32x32xf32>
    %cst_9 = arith.constant dense<0.000000e+00> : vector<8x32xf32>
    %9 = tpu.matmul %0, %8, %cst_9 {dimension_numbers = #tpu.dot_dimension_numbers<[1], [0], [0], [1], [0, 0, 1, 1], [], []>, precision = #tpu.contract_precision<fp32>} : vector<8x32xf32>, vector<32x32xf32>, vector<8x32xf32> -> vector<8x32xf32>
    %c0_10 = arith.constant 0 : index
    %c0_11 = arith.constant 0 : index
    %10 = vector.load %arg6[%c0_10, %c0_11] : memref<1x32xf32, #tpu.memory_space<vmem>>, vector<1x32xf32>
    %11 = vector.broadcast %10 : vector<1x32xf32> to vector<8x32xf32>
    %12 = arith.addf %9, %11 : vector<8x32xf32>
    %13 = vector.extract_strided_slice %7 {offsets = [0, 0], sizes = [8, 32], strides = [1, 1]} : vector<8x64xf32> to vector<8x32xf32>
    %14 = vector.extract_strided_slice %7 {offsets = [0, 32], sizes = [8, 32], strides = [1, 1]} : vector<8x64xf32> to vector<8x32xf32>
    %15 = vector.extract_strided_slice %13 {offsets = [0, 0], sizes = [8, 8], strides = [1, 1]} : vector<8x32xf32> to vector<8x8xf32>
    %16 = vector.shape_cast %15 : vector<8x8xf32> to vector<1x8x8xf32>
    %17 = vector.extract_strided_slice %13 {offsets = [0, 8], sizes = [8, 8], strides = [1, 1]} : vector<8x32xf32> to vector<8x8xf32>
    %18 = vector.shape_cast %17 : vector<8x8xf32> to vector<1x8x8xf32>
    %19 = vector.extract_strided_slice %13 {offsets = [0, 16], sizes = [8, 8], strides = [1, 1]} : vector<8x32xf32> to vector<8x8xf32>
    %20 = vector.shape_cast %19 : vector<8x8xf32> to vector<1x8x8xf32>
    %21 = vector.extract_strided_slice %13 {offsets = [0, 24], sizes = [8, 8], strides = [1, 1]} : vector<8x32xf32> to vector<8x8xf32>
    %22 = vector.shape_cast %21 : vector<8x8xf32> to vector<1x8x8xf32>
    %23 = tpu.concatenate %16, %18, %20, %22 in 0 : vector<1x8x8xf32>, vector<1x8x8xf32>, vector<1x8x8xf32>, vector<1x8x8xf32> -> vector<4x8x8xf32>
    %24 = vector.extract_strided_slice %14 {offsets = [0, 0], sizes = [8, 8], strides = [1, 1]} : vector<8x32xf32> to vector<8x8xf32>
    %25 = vector.shape_cast %24 : vector<8x8xf32> to vector<1x8x8xf32>
    %26 = vector.extract_strided_slice %14 {offsets = [0, 8], sizes = [8, 8], strides = [1, 1]} : vector<8x32xf32> to vector<8x8xf32>
    %27 = vector.shape_cast %26 : vector<8x8xf32> to vector<1x8x8xf32>
    %28 = vector.extract_strided_slice %14 {offsets = [0, 16], sizes = [8, 8], strides = [1, 1]} : vector<8x32xf32> to vector<8x8xf32>
    %29 = vector.shape_cast %28 : vector<8x8xf32> to vector<1x8x8xf32>
    %30 = vector.extract_strided_slice %14 {offsets = [0, 24], sizes = [8, 8], strides = [1, 1]} : vector<8x32xf32> to vector<8x8xf32>
    %31 = vector.shape_cast %30 : vector<8x8xf32> to vector<1x8x8xf32>
    %32 = tpu.concatenate %25, %27, %29, %31 in 0 : vector<1x8x8xf32>, vector<1x8x8xf32>, vector<1x8x8xf32>, vector<1x8x8xf32> -> vector<4x8x8xf32>
    %33 = vector.extract_strided_slice %12 {offsets = [0, 0], sizes = [8, 8], strides = [1, 1]} : vector<8x32xf32> to vector<8x8xf32>
    %34 = vector.shape_cast %33 : vector<8x8xf32> to vector<1x8x8xf32>
    %35 = vector.extract_strided_slice %12 {offsets = [0, 8], sizes = [8, 8], strides = [1, 1]} : vector<8x32xf32> to vector<8x8xf32>
    %36 = vector.shape_cast %35 : vector<8x8xf32> to vector<1x8x8xf32>
    %37 = vector.extract_strided_slice %12 {offsets = [0, 16], sizes = [8, 8], strides = [1, 1]} : vector<8x32xf32> to vector<8x8xf32>
    %38 = vector.shape_cast %37 : vector<8x8xf32> to vector<1x8x8xf32>
    %39 = vector.extract_strided_slice %12 {offsets = [0, 24], sizes = [8, 8], strides = [1, 1]} : vector<8x32xf32> to vector<8x8xf32>
    %40 = vector.shape_cast %39 : vector<8x8xf32> to vector<1x8x8xf32>
    %41 = tpu.concatenate %34, %36, %38, %40 in 0 : vector<1x8x8xf32>, vector<1x8x8xf32>, vector<1x8x8xf32>, vector<1x8x8xf32> -> vector<4x8x8xf32>
    "tpu.trace_start"() <{level = 10 : i32, message = "bqd,bkd->bqk"}> : () -> ()
    %cst_12 = arith.constant dense<0.000000e+00> : vector<4x8x8xf32>
    %42 = tpu.matmul %23, %32, %cst_12 {dimension_numbers = #tpu.dot_dimension_numbers<[2], [2], [1], [1], [0, 0, 0, 1, 1, 1], [0], [0]>, precision = #tpu.contract_precision<fp32>} : vector<4x8x8xf32>, vector<4x8x8xf32>, vector<4x8x8xf32> -> vector<4x8x8xf32>
    "tpu.trace_stop"() : () -> ()
    %cst_13 = arith.constant dense<0xFF800000> : vector<4x8xf32>
    %43 = vector.multi_reduction <maximumf>, %42, %cst_13 [2] : vector<4x8x8xf32> to vector<4x8xf32>
    %44 = vector.shape_cast %43 : vector<4x8xf32> to vector<4x8x1xf32>
    %45 = vector.broadcast %44 : vector<4x8x1xf32> to vector<4x8x8xf32>
    %46 = arith.subf %42, %45 : vector<4x8x8xf32>
    %47 = math.exp %46 : vector<4x8x8xf32>
    %cst_14 = arith.constant dense<0.000000e+00> : vector<4x8xf32>
    %48 = vector.multi_reduction <add>, %47, %cst_14 [2] : vector<4x8x8xf32> to vector<4x8xf32>
    %49 = vector.shape_cast %48 : vector<4x8xf32> to vector<4x8x1xf32>
    %50 = vector.broadcast %49 : vector<4x8x1xf32> to vector<4x8x8xf32>
    %51 = arith.divf %47, %50 : vector<4x8x8xf32>
    "tpu.trace_start"() <{level = 10 : i32, message = "bqk,bkd->bqd"}> : () -> ()
    %cst_15 = arith.constant dense<0.000000e+00> : vector<4x8x8xf32>
    %52 = tpu.matmul %51, %41, %cst_15 {dimension_numbers = #tpu.dot_dimension_numbers<[2], [1], [1], [2], [0, 0, 0, 1, 1, 2], [0], [0]>, precision = #tpu.contract_precision<fp32>} : vector<4x8x8xf32>, vector<4x8x8xf32>, vector<4x8x8xf32> -> vector<4x8x8xf32>
    "tpu.trace_stop"() : () -> ()
    %53 = vector.extract_strided_slice %52 {offsets = [0, 0, 0], sizes = [1, 8, 8], strides = [1, 1, 1]} : vector<4x8x8xf32> to vector<1x8x8xf32>
    %54 = vector.shape_cast %53 : vector<1x8x8xf32> to vector<8x8xf32>
    %55 = vector.extract_strided_slice %52 {offsets = [1, 0, 0], sizes = [1, 8, 8], strides = [1, 1, 1]} : vector<4x8x8xf32> to vector<1x8x8xf32>
    %56 = vector.shape_cast %55 : vector<1x8x8xf32> to vector<8x8xf32>
    %57 = vector.extract_strided_slice %52 {offsets = [2, 0, 0], sizes = [1, 8, 8], strides = [1, 1, 1]} : vector<4x8x8xf32> to vector<1x8x8xf32>
    %58 = vector.shape_cast %57 : vector<1x8x8xf32> to vector<8x8xf32>
    %59 = vector.extract_strided_slice %52 {offsets = [3, 0, 0], sizes = [1, 8, 8], strides = [1, 1, 1]} : vector<4x8x8xf32> to vector<1x8x8xf32>
    %60 = vector.shape_cast %59 : vector<1x8x8xf32> to vector<8x8xf32>
    %61 = tpu.concatenate %54, %56, %58, %60 in 1 : vector<8x8xf32>, vector<8x8xf32>, vector<8x8xf32>, vector<8x8xf32> -> vector<8x32xf32>
    %c0_16 = arith.constant 0 : index
    %c0_17 = arith.constant 0 : index
    %62 = vector.load %arg7[%c0_16, %c0_17] : memref<32x32xf32, #tpu.memory_space<vmem>>, vector<32x32xf32>
    %cst_18 = arith.constant dense<0.000000e+00> : vector<8x32xf32>
    %63 = tpu.matmul %61, %62, %cst_18 {dimension_numbers = #tpu.dot_dimension_numbers<[1], [0], [0], [1], [0, 0, 1, 1], [], []>, precision = #tpu.contract_precision<fp32>} : vector<8x32xf32>, vector<32x32xf32>, vector<8x32xf32> -> vector<8x32xf32>
    %c0_19 = arith.constant 0 : index
    %c0_20 = arith.constant 0 : index
    %64 = vector.load %arg8[%c0_19, %c0_20] : memref<1x32xf32, #tpu.memory_space<vmem>>, vector<1x32xf32>
    %65 = vector.broadcast %64 : vector<1x32xf32> to vector<8x32xf32>
    %66 = arith.addf %63, %65 : vector<8x32xf32>
    %67 = arith.addf %0, %66 : vector<8x32xf32>
    %cst_21 = arith.constant dense<0.000000e+00> : vector<8xf32>
    %68 = vector.multi_reduction <add>, %67, %cst_21 [1] : vector<8x32xf32> to vector<8xf32>
    %69 = vector.shape_cast %68 : vector<8xf32> to vector<8x1xf32>
    %cst_22 = arith.constant 3.200000e+01 : f32
    %70 = vector.broadcast %cst_22 : f32 to vector<8x1xf32>
    %71 = arith.divf %69, %70 : vector<8x1xf32>
    %72 = vector.broadcast %71 : vector<8x1xf32> to vector<8x32xf32>
    %73 = arith.subf %67, %72 : vector<8x32xf32>
    %74 = arith.mulf %73, %73 : vector<8x32xf32>
    %cst_23 = arith.constant dense<0.000000e+00> : vector<8xf32>
    %75 = vector.multi_reduction <add>, %74, %cst_23 [1] : vector<8x32xf32> to vector<8xf32>
    %76 = vector.shape_cast %75 : vector<8xf32> to vector<8x1xf32>
    %cst_24 = arith.constant 3.200000e+01 : f32
    %77 = vector.broadcast %cst_24 : f32 to vector<8x1xf32>
    %78 = arith.divf %76, %77 : vector<8x1xf32>
    %79 = vector.broadcast %71 : vector<8x1xf32> to vector<8x32xf32>
    %80 = arith.subf %67, %79 : vector<8x32xf32>
    %cst_25 = arith.constant 9.99999974E-6 : f32
    %81 = vector.broadcast %cst_25 : f32 to vector<8x1xf32>
    %82 = arith.addf %78, %81 : vector<8x1xf32>
    %83 = math.rsqrt %82 : vector<8x1xf32>
    %84 = vector.broadcast %83 : vector<8x1xf32> to vector<8x32xf32>
    %85 = arith.mulf %80, %84 : vector<8x32xf32>
    %c0_26 = arith.constant 0 : index
    %c0_27 = arith.constant 0 : index
    %86 = vector.load %arg9[%c0_26, %c0_27] : memref<1x32xf32, #tpu.memory_space<vmem>>, vector<1x32xf32>
    %87 = vector.broadcast %86 : vector<1x32xf32> to vector<8x32xf32>
    %88 = arith.mulf %85, %87 : vector<8x32xf32>
    %c0_28 = arith.constant 0 : index
    %c0_29 = arith.constant 0 : index
    %89 = vector.load %arg10[%c0_28, %c0_29] : memref<1x32xf32, #tpu.memory_space<vmem>>, vector<1x32xf32>
    %90 = vector.broadcast %89 : vector<1x32xf32> to vector<8x32xf32>
    %91 = arith.addf %88, %90 : vector<8x32xf32>
    %c0_30 = arith.constant 0 : index
    %c0_31 = arith.constant 0 : index
    %92 = vector.load %arg11[%c0_30, %c0_31] : memref<32x64xf32, #tpu.memory_space<vmem>>, vector<32x64xf32>
    %cst_32 = arith.constant dense<0.000000e+00> : vector<8x64xf32>
    %93 = tpu.matmul %91, %92, %cst_32 {dimension_numbers = #tpu.dot_dimension_numbers<[1], [0], [0], [1], [0, 0, 1, 1], [], []>, precision = #tpu.contract_precision<fp32>} : vector<8x32xf32>, vector<32x64xf32>, vector<8x64xf32> -> vector<8x64xf32>
    %c0_33 = arith.constant 0 : index
    %c0_34 = arith.constant 0 : index
    %94 = vector.load %arg12[%c0_33, %c0_34] : memref<1x64xf32, #tpu.memory_space<vmem>>, vector<1x64xf32>
    %95 = vector.broadcast %94 : vector<1x64xf32> to vector<8x64xf32>
    %96 = arith.addf %93, %95 : vector<8x64xf32>
    %cst_35 = arith.constant 0.000000e+00 : f32
    %97 = vector.broadcast %cst_35 : f32 to vector<8x64xf32>
    %98 = arith.maximumf %96, %97 : vector<8x64xf32>
    %c0_36 = arith.constant 0 : index
    %c0_37 = arith.constant 0 : index
    %99 = vector.load %arg13[%c0_36, %c0_37] : memref<64x32xf32, #tpu.memory_space<vmem>>, vector<64x32xf32>
    %cst_38 = arith.constant dense<0.000000e+00> : vector<8x32xf32>
    %100 = tpu.matmul %98, %99, %cst_38 {dimension_numbers = #tpu.dot_dimension_numbers<[1], [0], [0], [1], [0, 0, 1, 1], [], []>, precision = #tpu.contract_precision<fp32>} : vector<8x64xf32>, vector<64x32xf32>, vector<8x32xf32> -> vector<8x32xf32>
    %c0_39 = arith.constant 0 : index
    %c0_40 = arith.constant 0 : index
    %101 = vector.load %arg14[%c0_39, %c0_40] : memref<1x32xf32, #tpu.memory_space<vmem>>, vector<1x32xf32>
    %102 = vector.broadcast %101 : vector<1x32xf32> to vector<8x32xf32>
    %103 = arith.addf %100, %102 : vector<8x32xf32>
    %104 = arith.addf %91, %103 : vector<8x32xf32>
    %cst_41 = arith.constant dense<0.000000e+00> : vector<8xf32>
    %105 = vector.multi_reduction <add>, %104, %cst_41 [1] : vector<8x32xf32> to vector<8xf32>
    %106 = vector.shape_cast %105 : vector<8xf32> to vector<8x1xf32>
    %cst_42 = arith.constant 3.200000e+01 : f32
    %107 = vector.broadcast %cst_42 : f32 to vector<8x1xf32>
    %108 = arith.divf %106, %107 : vector<8x1xf32>
    %109 = vector.broadcast %108 : vector<8x1xf32> to vector<8x32xf32>
    %110 = arith.subf %104, %109 : vector<8x32xf32>
    %111 = arith.mulf %110, %110 : vector<8x32xf32>
    %cst_43 = arith.constant dense<0.000000e+00> : vector<8xf32>
    %112 = vector.multi_reduction <add>, %111, %cst_43 [1] : vector<8x32xf32> to vector<8xf32>
    %113 = vector.shape_cast %112 : vector<8xf32> to vector<8x1xf32>
    %cst_44 = arith.constant 3.200000e+01 : f32
    %114 = vector.broadcast %cst_44 : f32 to vector<8x1xf32>
    %115 = arith.divf %113, %114 : vector<8x1xf32>
    %116 = vector.broadcast %108 : vector<8x1xf32> to vector<8x32xf32>
    %117 = arith.subf %104, %116 : vector<8x32xf32>
    %cst_45 = arith.constant 9.99999974E-6 : f32
    %118 = vector.broadcast %cst_45 : f32 to vector<8x1xf32>
    %119 = arith.addf %115, %118 : vector<8x1xf32>
    %120 = math.rsqrt %119 : vector<8x1xf32>
    %121 = vector.broadcast %120 : vector<8x1xf32> to vector<8x32xf32>
    %122 = arith.mulf %117, %121 : vector<8x32xf32>
    %c0_46 = arith.constant 0 : index
    %c0_47 = arith.constant 0 : index
    %123 = vector.load %arg15[%c0_46, %c0_47] : memref<1x32xf32, #tpu.memory_space<vmem>>, vector<1x32xf32>
    %124 = vector.broadcast %123 : vector<1x32xf32> to vector<8x32xf32>
    %125 = arith.mulf %122, %124 : vector<8x32xf32>
    %c0_48 = arith.constant 0 : index
    %c0_49 = arith.constant 0 : index
    %126 = vector.load %arg16[%c0_48, %c0_49] : memref<1x32xf32, #tpu.memory_space<vmem>>, vector<1x32xf32>
    %127 = vector.broadcast %126 : vector<1x32xf32> to vector<8x32xf32>
    %128 = arith.addf %125, %127 : vector<8x32xf32>
    %c0_50 = arith.constant 0 : index
    %c0_51 = arith.constant 0 : index
    %129 = vector.load %arg17[%c0_50, %c0_51] : memref<8x32xf32, #tpu.memory_space<vmem>>, vector<8x32xf32>
    tpu.vector_store %arg17[%c0_50, %c0_51], %128 {strides = array<i32>} : memref<8x32xf32, #tpu.memory_space<vmem>>, vector<8x32xf32>,
    return
  }
  func.func @transform_0(%arg0: i32) -> (i32, i32) {
    %c0_i32 = arith.constant 0 : i32
    %c0_i32_0 = arith.constant 0 : i32
    return %arg0, %c0_i32 : i32, i32
  }
  func.func @transform_1(%arg0: i32) -> (i32, i32) {
    %c0_i32 = arith.constant 0 : i32
    %c0_i32_0 = arith.constant 0 : i32
    return %arg0, %c0_i32 : i32, i32
  }
  func.func @transform_2(%arg0: i32) -> (i32, i32) {
    %c0_i32 = arith.constant 0 : i32
    %c0_i32_0 = arith.constant 0 : i32
    %c0_i32_1 = arith.constant 0 : i32
    return %c0_i32, %c0_i32_0 : i32, i32
  }
  func.func @transform_3(%arg0: i32) -> (i32, i32) {
    %c0_i32 = arith.constant 0 : i32
    %c0_i32_0 = arith.constant 0 : i32
    %c0_i32_1 = arith.constant 0 : i32
    return %c0_i32, %c0_i32_0 : i32, i32
  }
  func.func @transform_4(%arg0: i32) -> (i32, i32) {
    %c0_i32 = arith.constant 0 : i32
    %c0_i32_0 = arith.constant 0 : i32
    %c0_i32_1 = arith.constant 0 : i32
    return %c0_i32, %c0_i32_0 : i32, i32
  }
  func.func @transform_5(%arg0: i32) -> (i32, i32) {
    %c0_i32 = arith.constant 0 : i32
    %c0_i32_0 = arith.constant 0 : i32
    %c0_i32_1 = arith.constant 0 : i32
    return %c0_i32, %c0_i32_0 : i32, i32
  }
  func.func @transform_6(%arg0: i32) -> (i32, i32) {
    %c0_i32 = arith.constant 0 : i32
    %c0_i32_0 = arith.constant 0 : i32
    %c0_i32_1 = arith.constant 0 : i32
    return %c0_i32, %c0_i32_0 : i32, i32
  }
  func.func @transform_7(%arg0: i32) -> (i32, i32) {
    %c0_i32 = arith.constant 0 : i32
    %c0_i32_0 = arith.constant 0 : i32
    %c0_i32_1 = arith.constant 0 : i32
    return %c0_i32, %c0_i32_0 : i32, i32
  }
  func.func @transform_8(%arg0: i32) -> (i32, i32) {
    %c0_i32 = arith.constant 0 : i32
    %c0_i32_0 = arith.constant 0 : i32
    %c0_i32_1 = arith.constant 0 : i32
    return %c0_i32, %c0_i32_0 : i32, i32
  }
  func.func @transform_9(%arg0: i32) -> (i32, i32) {
    %c0_i32 = arith.constant 0 : i32
    %c0_i32_0 = arith.constant 0 : i32
    %c0_i32_1 = arith.constant 0 : i32
    return %c0_i32, %c0_i32_0 : i32, i32
  }
  func.func @transform_10(%arg0: i32) -> (i32, i32) {
    %c0_i32 = arith.constant 0 : i32
    %c0_i32_0 = arith.constant 0 : i32
    %c0_i32_1 = arith.constant 0 : i32
    return %c0_i32, %c0_i32_0 : i32, i32
  }
  func.func @transform_11(%arg0: i32) -> (i32, i32) {
    %c0_i32 = arith.constant 0 : i32
    %c0_i32_0 = arith.constant 0 : i32
    %c0_i32_1 = arith.constant 0 : i32
    return %c0_i32, %c0_i32_0 : i32, i32
  }
  func.func @transform_12(%arg0: i32) -> (i32, i32) {
    %c0_i32 = arith.constant 0 : i32
    %c0_i32_0 = arith.constant 0 : i32
    %c0_i32_1 = arith.constant 0 : i32
    return %c0_i32, %c0_i32_0 : i32, i32
  }
  func.func @transform_13(%arg0: i32) -> (i32, i32) {
    %c0_i32 = arith.constant 0 : i32
    %c0_i32_0 = arith.constant 0 : i32
    %c0_i32_1 = arith.constant 0 : i32
    return %c0_i32, %c0_i32_0 : i32, i32
  }
  func.func @transform_14(%arg0: i32) -> (i32, i32) {
    %c0_i32 = arith.constant 0 : i32
    %c0_i32_0 = arith.constant 0 : i32
    %c0_i32_1 = arith.constant 0 : i32
    return %c0_i32, %c0_i32_0 : i32, i32
  }
  func.func @transform_15(%arg0: i32) -> (i32, i32) {
    %c0_i32 = arith.constant 0 : i32
    %c0_i32_0 = arith.constant 0 : i32
    %c0_i32_1 = arith.constant 0 : i32
    return %c0_i32, %c0_i32_0 : i32, i32
  }
  func.func @transform_16(%arg0: i32) -> (i32, i32) {
    %c0_i32 = arith.constant 0 : i32
    %c0_i32_0 = arith.constant 0 : i32
    return %arg0, %c0_i32 : i32, i32
  }
}

module attributes {stable_mosaic.version = 11 : i64} {
  func.func @_encoder_layer_kernel(%arg0: i32, %arg1: memref<8x32xf32, #tpu.memory_space<vmem>>, %arg2: memref<8x32xf32, #tpu.memory_space<vmem>>, %arg3: memref<32x64xf32, #tpu.memory_space<vmem>>, %arg4: memref<1x64xf32, #tpu.memory_space<vmem>>, %arg5: memref<32x32xf32, #tpu.memory_space<vmem>>, %arg6: memref<1x32xf32, #tpu.memory_space<vmem>>, %arg7: memref<32x32xf32, #tpu.memory_space<vmem>>, %arg8: memref<1x32xf32, #tpu.memory_space<vmem>>, %arg9: memref<1x32xf32, #tpu.memory_space<vmem>>, %arg10: memref<1x32xf32, #tpu.memory_space<vmem>>, %arg11: memref<32x64xf32, #tpu.memory_space<vmem>>, %arg12: memref<1x64xf32, #tpu.memory_space<vmem>>, %arg13: memref<64x32xf32, #tpu.memory_space<vmem>>, %arg14: memref<1x32xf32, #tpu.memory_space<vmem>>, %arg15: memref<1x32xf32, #tpu.memory_space<vmem>>, %arg16: memref<1x32xf32, #tpu.memory_space<vmem>>, %arg17: memref<8x32xf32, #tpu.memory_space<vmem>>) attributes {dimension_semantics = [#tpu.dimension_semantics<parallel>], iteration_bounds = array<i64: 2>, scalar_prefetch = 0 : i64, scratch_operands = 0 : i64, tpu.core_type = #tpu.core_type<tc>, window_params = [{transform_indices = @transform_0, window_bounds = array<i64: 8, 32>}, {transform_indices = @transform_1, window_bounds = array<i64: 8, 32>}, {pipeline_mode = #tpu.pipeline_mode<synchronous>, transform_indices = @transform_2, window_bounds = array<i64: 32, 64>}, {pipeline_mode = #tpu.pipeline_mode<synchronous>, transform_indices = @transform_3, window_bounds = array<i64: 1, 64>}, {pipeline_mode = #tpu.pipeline_mode<synchronous>, transform_indices = @transform_4, window_bounds = array<i64: 32, 32>}, {pipeline_mode = #tpu.pipeline_mode<synchronous>, transform_indices = @transform_5, window_bounds = array<i64: 1, 32>}, {pipeline_mode = #tpu.pipeline_mode<synchronous>, transform_indices = @transform_6, window_bounds = array<i64: 32, 32>}, {pipeline_mode = #tpu.pipeline_mode<synchronous>, transform_indices = @transform_7, window_bounds = array<i64: 1, 32>}, {pipeline_mode = #tpu.pipeline_mode<synchronous>, transform_indices = @transform_8, window_bounds = array<i64: 1, 32>}, {pipeline_mode = #tpu.pipeline_mode<synchronous>, transform_indices = @transform_9, window_bounds = array<i64: 1, 32>}, {pipeline_mode = #tpu.pipeline_mode<synchronous>, transform_indices = @transform_10, window_bounds = array<i64: 32, 64>}, {pipeline_mode = #tpu.pipeline_mode<synchronous>, transform_indices = @transform_11, window_bounds = array<i64: 1, 64>}, {pipeline_mode = #tpu.pipeline_mode<synchronous>, transform_indices = @transform_12, window_bounds = array<i64: 64, 32>}, {pipeline_mode = #tpu.pipeline_mode<synchronous>, transform_indices = @transform_13, window_bounds = array<i64: 1, 32>}, {pipeline_mode = #tpu.pipeline_mode<synchronous>, transform_indices = @transform_14, window_bounds = array<i64: 1, 32>}, {pipeline_mode = #tpu.pipeline_mode<synchronous>, transform_indices = @transform_15, window_bounds = array<i64: 1, 32>}, {transform_indices = @transform_16, window_bounds = array<i64: 8, 32>}]} {
    %c0 = arith.constant 0 : index
    %c0_0 = arith.constant 0 : index
    %0 = vector.load %arg1[%c0, %c0_0] : memref<8x32xf32, #tpu.memory_space<vmem>>, vector<8x32xf32>
    %c0_1 = arith.constant 0 : index
    %c0_2 = arith.constant 0 : index
    %1 = vector.load %arg2[%c0_1, %c0_2] : memref<8x32xf32, #tpu.memory_space<vmem>>, vector<8x32xf32>
    %2 = arith.addf %0, %1 : vector<8x32xf32>
    %c0_3 = arith.constant 0 : index
    %c0_4 = arith.constant 0 : index
    %3 = vector.load %arg3[%c0_3, %c0_4] : memref<32x64xf32, #tpu.memory_space<vmem>>, vector<32x64xf32>
    %cst = arith.constant dense<0.000000e+00> : vector<8x64xf32>
    %4 = tpu.matmul %2, %3, %cst {dimension_numbers = #tpu.dot_dimension_numbers<[1], [0], [0], [1], [0, 0, 1, 1], [], []>, precision = #tpu.contract_precision<fp32>} : vector<8x32xf32>, vector<32x64xf32>, vector<8x64xf32> -> vector<8x64xf32>
    %c0_5 = arith.constant 0 : index
    %c0_6 = arith.constant 0 : index
    %5 = vector.load %arg4[%c0_5, %c0_6] : memref<1x64xf32, #tpu.memory_space<vmem>>, vector<1x64xf32>
    %6 = vector.broadcast %5 : vector<1x64xf32> to vector<8x64xf32>
    %7 = arith.addf %4, %6 : vector<8x64xf32>
    %c0_7 = arith.constant 0 : index
    %c0_8 = arith.constant 0 : index
    %8 = vector.load %arg5[%c0_7, %c0_8] : memref<32x32xf32, #tpu.memory_space<vmem>>, vector<32x32xf32>
    %cst_9 = arith.constant dense<0.000000e+00> : vector<8x32xf32>
    %9 = tpu.matmul %0, %8, %cst_9 {dimension_numbers = #tpu.dot_dimension_numbers<[1], [0], [0], [1], [0, 0, 1, 1], [], []>, precision = #tpu.contract_precision<fp32>} : vector<8x32xf32>, vector<32x32xf32>, vector<8x32xf32> -> vector<8x32xf32>
    %c0_10 = arith.constant 0 : index
    %c0_11 = arith.constant 0 : index
    %10 = vector.load %arg6[%c0_10, %c0_11] : memref<1x32xf32, #tpu.memory_space<vmem>>, vector<1x32xf32>
    %11 = vector.broadcast %10 : vector<1x32xf32> to vector<8x32xf32>
    %12 = arith.addf %9, %11 : vector<8x32xf32>
    %13 = vector.extract_strided_slice %7 {offsets = [0, 0], sizes = [8, 32], strides = [1, 1]} : vector<8x64xf32> to vector<8x32xf32>
    %14 = vector.extract_strided_slice %7 {offsets = [0, 32], sizes = [8, 32], strides = [1, 1]} : vector<8x64xf32> to vector<8x32xf32>
    %15 = vector.extract_strided_slice %13 {offsets = [0, 0], sizes = [8, 8], strides = [1, 1]} : vector<8x32xf32> to vector<8x8xf32>
    %16 = vector.shape_cast %15 : vector<8x8xf32> to vector<1x8x8xf32>
    %17 = vector.extract_strided_slice %13 {offsets = [0, 8], sizes = [8, 8], strides = [1, 1]} : vector<8x32xf32> to vector<8x8xf32>
    %18 = vector.shape_cast %17 : vector<8x8xf32> to vector<1x8x8xf32>
    %19 = vector.extract_strided_slice %13 {offsets = [0, 16], sizes = [8, 8], strides = [1, 1]} : vector<8x32xf32> to vector<8x8xf32>
    %20 = vector.shape_cast %19 : vector<8x8xf32> to vector<1x8x8xf32>
    %21 = vector.extract_strided_slice %13 {offsets = [0, 24], sizes = [8, 8], strides = [1, 1]} : vector<8x32xf32> to vector<8x8xf32>
    %22 = vector.shape_cast %21 : vector<8x8xf32> to vector<1x8x8xf32>
    %23 = tpu.concatenate %16, %18, %20, %22 in 0 : vector<1x8x8xf32>, vector<1x8x8xf32>, vector<1x8x8xf32>, vector<1x8x8xf32> -> vector<4x8x8xf32>
    %24 = vector.extract_strided_slice %14 {offsets = [0, 0], sizes = [8, 8], strides = [1, 1]} : vector<8x32xf32> to vector<8x8xf32>
    %25 = vector.shape_cast %24 : vector<8x8xf32> to vector<1x8x8xf32>
    %26 = vector.extract_strided_slice %14 {offsets = [0, 8], sizes = [8, 8], strides = [1, 1]} : vector<8x32xf32> to vector<8x8xf32>
    %27 = vector.shape_cast %26 : vector<8x8xf32> to vector<1x8x8xf32>
    %28 = vector.extract_strided_slice %14 {offsets = [0, 16], sizes = [8, 8], strides = [1, 1]} : vector<8x32xf32> to vector<8x8xf32>
    %29 = vector.shape_cast %28 : vector<8x8xf32> to vector<1x8x8xf32>
    %30 = vector.extract_strided_slice %14 {offsets = [0, 24], sizes = [8, 8], strides = [1, 1]} : vector<8x32xf32> to vector<8x8xf32>
    %31 = vector.shape_cast %30 : vector<8x8xf32> to vector<1x8x8xf32>
    %32 = tpu.concatenate %25, %27, %29, %31 in 0 : vector<1x8x8xf32>, vector<1x8x8xf32>, vector<1x8x8xf32>, vector<1x8x8xf32> -> vector<4x8x8xf32>
    %33 = vector.extract_strided_slice %12 {offsets = [0, 0], sizes = [8, 8], strides = [1, 1]} : vector<8x32xf32> to vector<8x8xf32>
    %34 = vector.shape_cast %33 : vector<8x8xf32> to vector<1x8x8xf32>
    %35 = vector.extract_strided_slice %12 {offsets = [0, 8], sizes = [8, 8], strides = [1, 1]} : vector<8x32xf32> to vector<8x8xf32>
    %36 = vector.shape_cast %35 : vector<8x8xf32> to vector<1x8x8xf32>
    %37 = vector.extract_strided_slice %12 {offsets = [0, 16], sizes = [8, 8], strides = [1, 1]} : vector<8x32xf32> to vector<8x8xf32>
    %38 = vector.shape_cast %37 : vector<8x8xf32> to vector<1x8x8xf32>
    %39 = vector.extract_strided_slice %12 {offsets = [0, 24], sizes = [8, 8], strides = [1, 1]} : vector<8x32xf32> to vector<8x8xf32>
    %40 = vector.shape_cast %39 : vector<8x8xf32> to vector<1x8x8xf32>
    %41 = tpu.concatenate %34, %36, %38, %40 in 0 : vector<1x8x8xf32>, vector<1x8x8xf32>, vector<1x8x8xf32>, vector<1x8x8xf32> -> vector<4x8x8xf32>
    "tpu.trace_start"() <{level = 10 : i32, message = "bqd,bkd->bqk"}> : () -> ()
    %cst_12 = arith.constant dense<0.000000e+00> : vector<4x8x8xf32>
    %42 = tpu.matmul %23, %32, %cst_12 {dimension_numbers = #tpu.dot_dimension_numbers<[2], [2], [1], [1], [0, 0, 0, 1, 1, 1], [0], [0]>, precision = #tpu.contract_precision<fp32>} : vector<4x8x8xf32>, vector<4x8x8xf32>, vector<4x8x8xf32> -> vector<4x8x8xf32>
    "tpu.trace_stop"() : () -> ()
    %cst_13 = arith.constant dense<0xFF800000> : vector<4x8xf32>
    %43 = vector.multi_reduction <maximumf>, %42, %cst_13 [2] : vector<4x8x8xf32> to vector<4x8xf32>
    %44 = vector.shape_cast %43 : vector<4x8xf32> to vector<4x8x1xf32>
    %45 = vector.broadcast %44 : vector<4x8x1xf32> to vector<4x8x8xf32>
    %46 = arith.subf %42, %45 : vector<4x8x8xf32>
    %47 = math.exp %46 : vector<4x8x8xf32>
    %cst_14 = arith.constant dense<0.000000e+00> : vector<4x8xf32>
    %48 = vector.multi_reduction <add>, %47, %cst_14 [2] : vector<4x8x8xf32> to vector<4x8xf32>
    %49 = vector.shape_cast %48 : vector<4x8xf32> to vector<4x8x1xf32>
    %50 = vector.broadcast %49 : vector<4x8x1xf32> to vector<4x8x8xf32>
    %51 = arith.divf %47, %50 : vector<4x8x8xf32>
    "tpu.trace_start"() <{level = 10 : i32, message = "bqk,bkd->bqd"}> : () -> ()
    %cst_15 = arith.constant dense<0.000000e+00> : vector<4x8x8xf32>
    %52 = tpu.matmul %51, %41, %cst_15 {dimension_numbers = #tpu.dot_dimension_numbers<[2], [1], [1], [2], [0, 0, 0, 1, 1, 2], [0], [0]>, precision = #tpu.contract_precision<fp32>} : vector<4x8x8xf32>, vector<4x8x8xf32>, vector<4x8x8xf32> -> vector<4x8x8xf32>
    "tpu.trace_stop"() : () -> ()
    %53 = vector.extract_strided_slice %52 {offsets = [0, 0, 0], sizes = [1, 8, 8], strides = [1, 1, 1]} : vector<4x8x8xf32> to vector<1x8x8xf32>
    %54 = vector.shape_cast %53 : vector<1x8x8xf32> to vector<8x8xf32>
    %55 = vector.extract_strided_slice %52 {offsets = [1, 0, 0], sizes = [1, 8, 8], strides = [1, 1, 1]} : vector<4x8x8xf32> to vector<1x8x8xf32>
    %56 = vector.shape_cast %55 : vector<1x8x8xf32> to vector<8x8xf32>
    %57 = vector.extract_strided_slice %52 {offsets = [2, 0, 0], sizes = [1, 8, 8], strides = [1, 1, 1]} : vector<4x8x8xf32> to vector<1x8x8xf32>
    %58 = vector.shape_cast %57 : vector<1x8x8xf32> to vector<8x8xf32>
    %59 = vector.extract_strided_slice %52 {offsets = [3, 0, 0], sizes = [1, 8, 8], strides = [1, 1, 1]} : vector<4x8x8xf32> to vector<1x8x8xf32>
    %60 = vector.shape_cast %59 : vector<1x8x8xf32> to vector<8x8xf32>
    %61 = tpu.concatenate %54, %56, %58, %60 in 1 : vector<8x8xf32>, vector<8x8xf32>, vector<8x8xf32>, vector<8x8xf32> -> vector<8x32xf32>
    %c0_16 = arith.constant 0 : index
    %c0_17 = arith.constant 0 : index
    %62 = vector.load %arg7[%c0_16, %c0_17] : memref<32x32xf32, #tpu.memory_space<vmem>>, vector<32x32xf32>
    %cst_18 = arith.constant dense<0.000000e+00> : vector<8x32xf32>
    %63 = tpu.matmul %61, %62, %cst_18 {dimension_numbers = #tpu.dot_dimension_numbers<[1], [0], [0], [1], [0, 0, 1, 1], [], []>, precision = #tpu.contract_precision<fp32>} : vector<8x32xf32>, vector<32x32xf32>, vector<8x32xf32> -> vector<8x32xf32>
    %c0_19 = arith.constant 0 : index
    %c0_20 = arith.constant 0 : index
    %64 = vector.load %arg8[%c0_19, %c0_20] : memref<1x32xf32, #tpu.memory_space<vmem>>, vector<1x32xf32>
    %65 = vector.broadcast %64 : vector<1x32xf32> to vector<8x32xf32>
    %66 = arith.addf %63, %65 : vector<8x32xf32>
    %67 = arith.addf %0, %66 : vector<8x32xf32>
    %cst_21 = arith.constant dense<0.000000e+00> : vector<8xf32>
    %68 = vector.multi_reduction <add>, %67, %cst_21 [1] : vector<8x32xf32> to vector<8xf32>
    %69 = vector.shape_cast %68 : vector<8xf32> to vector<8x1xf32>
    %cst_22 = arith.constant 3.200000e+01 : f32
    %70 = vector.broadcast %cst_22 : f32 to vector<8x1xf32>
    %71 = arith.divf %69, %70 : vector<8x1xf32>
    %72 = vector.broadcast %71 : vector<8x1xf32> to vector<8x32xf32>
    %73 = arith.subf %67, %72 : vector<8x32xf32>
    %74 = arith.mulf %73, %73 : vector<8x32xf32>
    %cst_23 = arith.constant dense<0.000000e+00> : vector<8xf32>
    %75 = vector.multi_reduction <add>, %74, %cst_23 [1] : vector<8x32xf32> to vector<8xf32>
    %76 = vector.shape_cast %75 : vector<8xf32> to vector<8x1xf32>
    %cst_24 = arith.constant 3.200000e+01 : f32
    %77 = vector.broadcast %cst_24 : f32 to vector<8x1xf32>
    %78 = arith.divf %76, %77 : vector<8x1xf32>
    %79 = vector.broadcast %71 : vector<8x1xf32> to vector<8x32xf32>
    %80 = arith.subf %67, %79 : vector<8x32xf32>
    %cst_25 = arith.constant 9.99999974E-6 : f32
    %81 = vector.broadcast %cst_25 : f32 to vector<8x1xf32>
    %82 = arith.addf %78, %81 : vector<8x1xf32>
    %83 = math.rsqrt %82 : vector<8x1xf32>
    %84 = vector.broadcast %83 : vector<8x1xf32> to vector<8x32xf32>
    %85 = arith.mulf %80, %84 : vector<8x32xf32>
    %c0_26 = arith.constant 0 : index
    %c0_27 = arith.constant 0 : index
    %86 = vector.load %arg9[%c0_26, %c0_27] : memref<1x32xf32, #tpu.memory_space<vmem>>, vector<1x32xf32>
    %87 = vector.broadcast %86 : vector<1x32xf32> to vector<8x32xf32>
    %88 = arith.mulf %85, %87 : vector<8x32xf32>
    %c0_28 = arith.constant 0 : index
    %c0_29 = arith.constant 0 : index
    %89 = vector.load %arg10[%c0_28, %c0_29] : memref<1x32xf32, #tpu.memory_space<vmem>>, vector<1x32xf32>
    %90 = vector.broadcast %89 : vector<1x32xf32> to vector<8x32xf32>
    %91 = arith.addf %88, %90 : vector<8x32xf32>
    %c0_30 = arith.constant 0 : index
    %c0_31 = arith.constant 0 : index
    %92 = vector.load %arg11[%c0_30, %c0_31] : memref<32x64xf32, #tpu.memory_space<vmem>>, vector<32x64xf32>
    %cst_32 = arith.constant dense<0.000000e+00> : vector<8x64xf32>
    %93 = tpu.matmul %91, %92, %cst_32 {dimension_numbers = #tpu.dot_dimension_numbers<[1], [0], [0], [1], [0, 0, 1, 1], [], []>, precision = #tpu.contract_precision<fp32>} : vector<8x32xf32>, vector<32x64xf32>, vector<8x64xf32> -> vector<8x64xf32>
    %c0_33 = arith.constant 0 : index
    %c0_34 = arith.constant 0 : index
    %94 = vector.load %arg12[%c0_33, %c0_34] : memref<1x64xf32, #tpu.memory_space<vmem>>, vector<1x64xf32>
    %95 = vector.broadcast %94 : vector<1x64xf32> to vector<8x64xf32>
    %96 = arith.addf %93, %95 : vector<8x64xf32>
    %cst_35 = arith.constant 0.000000e+00 : f32
    %97 = vector.broadcast %cst_35 : f32 to vector<8x64xf32>
    %98 = arith.maximumf %96, %97 : vector<8x64xf32>
    %c0_36 = arith.constant 0 : index
    %c0_37 = arith.constant 0 : index
    %99 = vector.load %arg13[%c0_36, %c0_37] : memref<64x32xf32, #tpu.memory_space<vmem>>, vector<64x32xf32>
    %cst_38 = arith.constant dense<0.000000e+00> : vector<8x32xf32>
    %100 = tpu.matmul %98, %99, %cst_38 {dimension_numbers = #tpu.dot_dimension_numbers<[1], [0], [0], [1], [0, 0, 1, 1], [], []>, precision = #tpu.contract_precision<fp32>} : vector<8x64xf32>, vector<64x32xf32>, vector<8x32xf32> -> vector<8x32xf32>
    %c0_39 = arith.constant 0 : index
    %c0_40 = arith.constant 0 : index
    %101 = vector.load %arg14[%c0_39, %c0_40] : memref<1x32xf32, #tpu.memory_space<vmem>>, vector<1x32xf32>
    %102 = vector.broadcast %101 : vector<1x32xf32> to vector<8x32xf32>
    %103 = arith.addf %100, %102 : vector<8x32xf32>
    %104 = arith.addf %91, %103 : vector<8x32xf32>
    %cst_41 = arith.constant dense<0.000000e+00> : vector<8xf32>
    %105 = vector.multi_reduction <add>, %104, %cst_41 [1] : vector<8x32xf32> to vector<8xf32>
    %106 = vector.shape_cast %105 : vector<8xf32> to vector<8x1xf32>
    %cst_42 = arith.constant 3.200000e+01 : f32
    %107 = vector.broadcast %cst_42 : f32 to vector<8x1xf32>
    %108 = arith.divf %106, %107 : vector<8x1xf32>
    %109 = vector.broadcast %108 : vector<8x1xf32> to vector<8x32xf32>
    %110 = arith.subf %104, %109 : vector<8x32xf32>
    %111 = arith.mulf %110, %110 : vector<8x32xf32>
    %cst_43 = arith.constant dense<0.000000e+00> : vector<8xf32>
    %112 = vector.multi_reduction <add>, %111, %cst_43 [1] : vector<8x32xf32> to vector<8xf32>
    %113 = vector.shape_cast %112 : vector<8xf32> to vector<8x1xf32>
    %cst_44 = arith.constant 3.200000e+01 : f32
    %114 = vector.broadcast %cst_44 : f32 to vector<8x1xf32>
    %115 = arith.divf %113, %114 : vector<8x1xf32>
    %116 = vector.broadcast %108 : vector<8x1xf32> to vector<8x32xf32>
    %117 = arith.subf %104, %116 : vector<8x32xf32>
    %cst_45 = arith.constant 9.99999974E-6 : f32
    %118 = vector.broadcast %cst_45 : f32 to vector<8x1xf32>
    %119 = arith.addf %115, %118 : vector<8x1xf32>
    %120 = math.rsqrt %119 : vector<8x1xf32>
    %121 = vector.broadcast %120 : vector<8x1xf32> to vector<8x32xf32>
    %122 = arith.mulf %117, %121 : vector<8x32xf32>
    %c0_46 = arith.constant 0 : index
    %c0_47 = arith.constant 0 : index
    %123 = vector.load %arg15[%c0_46, %c0_47] : memref<1x32xf32, #tpu.memory_space<vmem>>, vector<1x32xf32>
    %124 = vector.broadcast %123 : vector<1x32xf32> to vector<8x32xf32>
    %125 = arith.mulf %122, %124 : vector<8x32xf32>
    %c0_48 = arith.constant 0 : index
    %c0_49 = arith.constant 0 : index
    %126 = vector.load %arg16[%c0_48, %c0_49] : memref<1x32xf32, #tpu.memory_space<vmem>>, vector<1x32xf32>
    %127 = vector.broadcast %126 : vector<1x32xf32> to vector<8x32xf32>
    %128 = arith.addf %125, %127 : vector<8x32xf32>
    %c0_50 = arith.constant 0 : index
    %c0_51 = arith.constant 0 : index
    %129 = vector.load %arg17[%c0_50, %c0_51] : memref<8x32xf32, #tpu.memory_space<vmem>>, vector<8x32xf32>
    tpu.vector_store %arg17[%c0_50, %c0_51], %128 {strides = array<i32>} : memref<8x32xf32, #tpu.memory_space<vmem>>, vector<8x32xf32>,
    return
  }
  func.func @transform_0(%arg0: i32) -> (i32, i32) {
    %c0_i32 = arith.constant 0 : i32
    %c0_i32_0 = arith.constant 0 : i32
    return %arg0, %c0_i32 : i32, i32
  }
  func.func @transform_1(%arg0: i32) -> (i32, i32) {
    %c0_i32 = arith.constant 0 : i32
    %c0_i32_0 = arith.constant 0 : i32
    return %arg0, %c0_i32 : i32, i32
  }
  func.func @transform_2(%arg0: i32) -> (i32, i32) {
    %c0_i32 = arith.constant 0 : i32
    %c0_i32_0 = arith.constant 0 : i32
    %c0_i32_1 = arith.constant 0 : i32
    return %c0_i32, %c0_i32_0 : i32, i32
  }
  func.func @transform_3(%arg0: i32) -> (i32, i32) {
    %c0_i32 = arith.constant 0 : i32
    %c0_i32_0 = arith.constant 0 : i32
    %c0_i32_1 = arith.constant 0 : i32
    return %c0_i32, %c0_i32_0 : i32, i32
  }
  func.func @transform_4(%arg0: i32) -> (i32, i32) {
    %c0_i32 = arith.constant 0 : i32
    %c0_i32_0 = arith.constant 0 : i32
    %c0_i32_1 = arith.constant 0 : i32
    return %c0_i32, %c0_i32_0 : i32, i32
  }
  func.func @transform_5(%arg0: i32) -> (i32, i32) {
    %c0_i32 = arith.constant 0 : i32
    %c0_i32_0 = arith.constant 0 : i32
    %c0_i32_1 = arith.constant 0 : i32
    return %c0_i32, %c0_i32_0 : i32, i32
  }
  func.func @transform_6(%arg0: i32) -> (i32, i32) {
    %c0_i32 = arith.constant 0 : i32
    %c0_i32_0 = arith.constant 0 : i32
    %c0_i32_1 = arith.constant 0 : i32
    return %c0_i32, %c0_i32_0 : i32, i32
  }
  func.func @transform_7(%arg0: i32) -> (i32, i32) {
    %c0_i32 = arith.constant 0 : i32
    %c0_i32_0 = arith.constant 0 : i32
    %c0_i32_1 = arith.constant 0 : i32
    return %c0_i32, %c0_i32_0 : i32, i32
  }
  func.func @transform_8(%arg0: i32) -> (i32, i32) {
    %c0_i32 = arith.constant 0 : i32
    %c0_i32_0 = arith.constant 0 : i32
    %c0_i32_1 = arith.constant 0 : i32
    return %c0_i32, %c0_i32_0 : i32, i32
  }
  func.func @transform_9(%arg0: i32) -> (i32, i32) {
    %c0_i32 = arith.constant 0 : i32
    %c0_i32_0 = arith.constant 0 : i32
    %c0_i32_1 = arith.constant 0 : i32
    return %c0_i32, %c0_i32_0 : i32, i32
  }
  func.func @transform_10(%arg0: i32) -> (i32, i32) {
    %c0_i32 = arith.constant 0 : i32
    %c0_i32_0 = arith.constant 0 : i32
    %c0_i32_1 = arith.constant 0 : i32
    return %c0_i32, %c0_i32_0 : i32, i32
  }
  func.func @transform_11(%arg0: i32) -> (i32, i32) {
    %c0_i32 = arith.constant 0 : i32
    %c0_i32_0 = arith.constant 0 : i32
    %c0_i32_1 = arith.constant 0 : i32
    return %c0_i32, %c0_i32_0 : i32, i32
  }
  func.func @transform_12(%arg0: i32) -> (i32, i32) {
    %c0_i32 = arith.constant 0 : i32
    %c0_i32_0 = arith.constant 0 : i32
    %c0_i32_1 = arith.constant 0 : i32
    return %c0_i32, %c0_i32_0 : i32, i32
  }
  func.func @transform_13(%arg0: i32) -> (i32, i32) {
    %c0_i32 = arith.constant 0 : i32
    %c0_i32_0 = arith.constant 0 : i32
    %c0_i32_1 = arith.constant 0 : i32
    return %c0_i32, %c0_i32_0 : i32, i32
  }
  func.func @transform_14(%arg0: i32) -> (i32, i32) {
    %c0_i32 = arith.constant 0 : i32
    %c0_i32_0 = arith.constant 0 : i32
    %c0_i32_1 = arith.constant 0 : i32
    return %c0_i32, %c0_i32_0 : i32, i32
  }
  func.func @transform_15(%arg0: i32) -> (i32, i32) {
    %c0_i32 = arith.constant 0 : i32
    %c0_i32_0 = arith.constant 0 : i32
    %c0_i32_1 = arith.constant 0 : i32
    return %c0_i32, %c0_i32_0 : i32, i32
  }
  func.func @transform_16(%arg0: i32) -> (i32, i32) {
    %c0_i32 = arith.constant 0 : i32
    %c0_i32_0 = arith.constant 0 : i32
    return %arg0, %c0_i32 : i32, i32
  }
}

</mosaic_0001>

<bundles_post_ra>
// kernel: tpu_custom_call.1
= control target key start
LH: loop header
LB: loop body
LE: loop exit
PB: predicated region body
PF: predicated region fallthrough
CT: control target
= control target key end

     0   :  { %s9337_s0 = inlined_call_operand.hbm [shape: f32[16,32], index: 0, kind: input, shape index: {}]   ;;  %s9338_s1 = inlined_call_operand.hbm [shape: f32[16,32], index: 1, kind: input, shape index: {}]   ;;  %s9339_s2 = inlined_call_operand.vmem [shape: f32[32,64], index: 2, kind: input, shape index: {}]   ;;  %s9340_s3 = inlined_call_operand.vmem [shape: f32[1,64], index: 3, kind: input, shape index: {}]   ;;  %s9341_s4 = inlined_call_operand.vmem [shape: f32[32,32], index: 4, kind: input, shape index: {}]   ;;  %s9342_s5 = inlined_call_operand.vmem [shape: f32[1,32], index: 5, kind: input, shape index: {}]   ;;  %s9343_s6 = inlined_call_operand.vmem [shape: f32[32,32], index: 6, kind: input, shape index: {}]   ;;  %s9344_s7 = inlined_call_operand.vmem [shape: f32[1,32], index: 7, kind: input, shape index: {}]   ;;  %s9345_s8 = inlined_call_operand.vmem [shape: f32[1,32], index: 8, kind: input, shape index: {}]   ;;  %s9346_s9 = inlined_call_operand.vmem [shape: f32[1,32], index: 9, kind: input, shape index: {}]   ;;  %s9347_s10 = inlined_call_operand.hbm [shape: f32[32,64], index: 10, kind: input, shape index: {}]   ;;  %s9348_s11 = inlined_call_operand.vmem [shape: f32[1,64], index: 11, kind: input, shape index: {}]   ;;  %s9349_s12 = inlined_call_operand.vmem [shape: f32[64,32], index: 12, kind: input, shape index: {}]   ;;  %s9350_s13 = inlined_call_operand.vmem [shape: f32[1,32], index: 13, kind: input, shape index: {}]   ;;  %s9351_s14 = inlined_call_operand.vmem [shape: f32[1,32], index: 14, kind: input, shape index: {}]   ;;  %s9352_s15 = inlined_call_operand.vmem [shape: f32[1,32], index: 15, kind: input, shape index: {}]   ;;  %s9353_s16 = inlined_call_operand.hbm [shape: f32[16,32], index: 16, kind: output, shape index: {}]  }
   0x1   :  { %9368 = sst [smem:[#allocation19_spill]] %s9337_s0 }
   0x2   :  { %9369 = sst [smem:[#allocation20_spill]] %s9347_s10 }
   0x3   :  { %9370 = sst [smem:[#allocation21_spill]] %s9348_s11 }
   0x4   :  { %9371 = sst [smem:[#allocation22_spill]] %s9349_s12 }
   0x5   :  { %9372 = sst [smem:[#allocation23_spill]] %s9350_s13 }
   0x6   :  { %9373 = sst [smem:[#allocation24_spill]] %s9351_s14 }
   0x7   :  { %9374 = sst [smem:[#allocation25_spill]] %s9352_s15 }
   0x8   :  { %9375 = sst [smem:[#allocation26_spill]] %s9353_s16 }
   0x9   :  { %21 = vsyncpa [#allocation3], 0 }
   0xa   :  { %23 = vsyncpa [#allocation3 + $0x1], 0 }
   0xb   :  { %24 = vsyncpa [#allocation6], 0 }
   0xc   :  { %26 = vsyncpa [#allocation6 + $0x1], 0 }
   0xd   :  { %27 = vsyncpa [#allocation4], 0 }
   0xe   :  { %29 = vsyncpa [#allocation4 + $0x1], 0  ;;  %s8270_s21 = smov 0   ;;  %s8272_s22 = smov 0  }
   0xf   :  { %s8274_s23 = smov 0   ;;  %s8276_s24 = smov 0  }
  0x10 LB: > { %9376 = sst [smem:[#allocation13_spill]] %s8156_s21  ;;  %s8291_s25 = sadd.s32 4294967295, %s8168_s24   ;;  %s8168_s24 = sphi %s8276_s24, %s9408_s24   ;;  %s8164_s23 = sphi %s8274_s23, %s9410_s23   ;;  %s8160_s22 = sphi %s8272_s22, %s9412_s22   ;;  %s8156_s21 = sphi %s8270_s21, %s9411_s21  }
  0x11   : > { %9377 = sst [smem:[#allocation14_spill]] %s8164_s23  ;;  %s7006_s26 = sadd.s32 4294967294, %s8168_s24  }
  0x12   : > { %p55_p0 = scmp.ne.s32.totalorder %s8160_s22, %s8156_s21  ;;  %p9364_p1 = scmp.eq.s32.totalorder %s8291_s25, 0 }
  0x13   : > { %p405_p3 = scmp.eq.s32.totalorder %s7006_s26, 1  ;;  %p7007_p5 = scmp.ge.s32.totalorder %s8168_s24, 1 }
  0x14   : > { %p8300_p4 = por %p9364_p1, %p55_p0  ;;  %p412_p7 = scmp.lt.s32.totalorder %s8168_s24, 3 }
  0x15   : > { %p8305_p6 = por %p405_p3, %p55_p0  ;;  %s8170_s30 = smov [#allocation7]  }
  0x16   : > { %s9378_s27 = scalar_select %p8300_p4, 1, 0 }
  0x17   : > { %s9379_s28 = scalar_select %p8305_p6, 1, 0 }
  0x18   : > { %p8310_p8 = pnand %p7007_p5, %p412_p7  ;;  %s448_s0 = sshll.u32 %s8170_s30, 4  ;;  %s449_s0 = int_to_ptr.vmem [resolvable:$true] %s448_s0 }
  0x19   : > { %9380 = sst [smem:[#allocation15_spill]] %s9379_s28  ;;  %s8324_s18 = sadd.s32 1, %s8168_s24  }
  0x1a   : > { %s9381_s29 = scalar_select %p8310_p8, 1, 0 }
  0x1b   : > { %p7930_p9 = pneg %p8310_p8  ;;  %9383 = sst [smem:[#allocation16_spill]] %s8324_s18 }
  0x1c   : > { %s42_s19 = sadd.s32 1, %s8164_s23  ;;  %s39_s20 = ssub.s32 %s8168_s24, %s8324_s18 }
  0x1d   : > { %p8319_p11 = pnand %p7930_p9, %p9364_p1  ;;  %s8025_s26 = scalar_lea.vmem %s449_s0, 512 }
  0x1e   : > { %p8026_p13 = scmp.ne.s32.totalorder %s449_s0, %s8025_s26  ;;  %p8033_p5 = scmp.lt.s32.totalorder %s449_s0, %s449_s0 }
  0x1f   : > { %p8016_p12 = pneg %p8319_p11  ;;  %p8034_p7 = scmp.lt.s32.totalorder %s8025_s26, %s8025_s26 }
  0x21   : > { %p8028_p0 = pnand %p8026_p13, %p8016_p12  ;;  %p8035_p10 = por %p8034_p7, %p8033_p5 }
  0x23   : > { %p8029_p3 = pneg %p8028_p0 }
  0x25   : > { %p8036_p2 = pnand %p8035_p10, %p8029_p3 }
  0x27   : > { %8039 = shalt.err (!%p8036_p2)
}
  0x28   : > { %s8171_s30 = smov 128   ;;  %s8172_s18 = smov 8  }
  0x29   : > { %s9384_s10 = sld [smem:[#allocation20_spill]]  ;;  %p40_p9 = scmp.eq.s32.totalorder %s39_s20, 0 }
  0x2a   : > { %p49_p12 = scmp.ne.s32.totalorder %s8164_s23, %s8160_s22  ;;  %p50_p10 = scmp.eq.s32.totalorder %s8168_s24, 0 }
  0x2b   : > { %p7946_p2 = scmp.lt.s32.totalorder %s8168_s24, 2  ;;  %p9386_p0 = scmp.eq.s32.totalorder %s8291_s25, 1 }
  0x2c   : > { %s8341_s26 = scalar_select %p40_p9, %s8164_s23, %s42_s19  }
  0x2d   : > { %p51_p13 = por %p50_p10, %p49_p12  ;;  %p8345_p3 = por %p9386_p0, %p49_p12 }
  0x2e   : > { %9385 = sst [smem:[#allocation17_spill]] %s8341_s26  ;;  %s477_s15 = sand.u32 1, %s8164_s23  }
  0x2f   : > { %7933 = dma.hbm_to_vmem [thread:$0]  (!%p8319_p11), %s9384_s10, 512, %s449_s0, [#allocation6], %s8171_s30, %s8171_s30, %s8172_s18  }
  0x30   : > { %s9387_s16 = scalar_select %p8345_p3, 1, 0 }
  0x31   : > { %s7011_s14 = sshll.u32 %s8168_s24, 7  ;;  %s8351_s13 = sshll.u32 %s477_s15, 3 }
  0x32   : > { %9388 = sst [smem:[#allocation18_spill]] %s9387_s16  ;;  %s481_s18 = scalar_lea.vmem [#allocation2], %s8351_s13 }
  0x33   : > { %s9389_s21 = sld [smem:[#allocation19_spill]]  ;;  %s488_s19 = sshll.u32 %s481_s18, 4  ;;  %s489_s19 = int_to_ptr.vmem [resolvable:$true] %s488_s19 }
  0x34   : > { %p8359_p11 = pnand %p7946_p2, %p51_p13  ;;  %s8366_s26 = scalar_lea.hbm %s9338_s1, %s7011_s14 }
  0x35   : > { %s478_s11 = scalar_lea.sflag [#allocation3], %s477_s15 }
  0x36   : > { %p8042_p7 = pneg %p8359_p11 }
  0x39   : > { %s9390_s28 = smov %s9389_s21  ;;  %s8356_s0 = scalar_lea.hbm %s9389_s21, %s7011_s14 }
  0x3a   : > { %s8040_s17 = scalar_lea.hbm %s8356_s0, 128  ;;  %s8045_s23 = scalar_lea.hbm %s9390_s28, 256 }
  0x3b   : > { %p8041_p5 = scmp.ne.s32.totalorder %s8356_s0, %s8040_s17  ;;  %p8046_p10 = scmp.lt.s32.totalorder %s8356_s0, %s9390_s28 }
  0x3c   : > { %p8047_p2 = scmp.lt.s32.totalorder %s8045_s23, %s8040_s17 }
  0x3d   : > { %p8043_p9 = pnand %p8042_p7, %p8041_p5 }
  0x3e   : > { %p8048_p13 = por %p8047_p2, %p8046_p10 }
  0x3f   : > { %p8044_p12 = pneg %p8043_p9 }
  0x41   : > { %p8049_p0 = pnand %p8048_p13, %p8044_p12 }
  0x43   : > { %8052 = shalt.err (!%p8049_p0)
}
  0x44   : > { %s8053_s10 = scalar_lea.vmem %s489_s19, 128  ;;  %s8173_s14 = smov [#allocation2]  }
  0x45   : > { %p8054_p1 = scmp.ne.s32.totalorder %s489_s19, %s8053_s10  ;;  %s8058_s15 = sshll.u32 %s8173_s14, 4  ;;  %s8059_s15 = int_to_ptr.vmem [resolvable:$false] %s8058_s15 }
  0x46   : > { %s8060_s30 = scalar_lea.vmem %s8059_s15, 256  ;;  %p8061_p9 = scmp.lt.s32.totalorder %s489_s19, %s8059_s15 }
  0x47   : > { %p8056_p6 = pnand %p8054_p1, %p8042_p7  ;;  %p8062_p3 = scmp.lt.s32.totalorder %s8060_s30, %s8053_s10 }
  0x49   : > { %p8057_p5 = pneg %p8056_p6  ;;  %p8063_p4 = por %p8062_p3, %p8061_p9 }
  0x4b   : > { %p8064_p8 = pnand %p8063_p4, %p8057_p5 }
  0x4d   : > { %8067 = shalt.err (!%p8064_p8)
}
  0x4e   : > { %7937 = dma.hbm_to_vmem [thread:$0]  (!%p8359_p11), %s8356_s0, 128, %s489_s19, %s478_s11  }
  0x4f   : > { %s495_s12 = sand.u32 1, %s8168_s24   ;;  %s499_s16 = scalar_lea.vmem [#allocation5], %s8351_s13 }
  0x50   : > { %s506_s23 = sshll.u32 %s499_s16, 4  ;;  %s496_s17 = scalar_lea.sflag [#allocation6], %s495_s12  ;;  %s507_s23 = int_to_ptr.vmem [resolvable:$true] %s506_s23 }
  0x51   : > { %s8068_s21 = scalar_lea.hbm %s8366_s26, 128  ;;  %s8073_s14 = scalar_lea.hbm %s9338_s1, 256 }
  0x52   : > { %p8069_p1 = scmp.ne.s32.totalorder %s8366_s26, %s8068_s21  ;;  %p8074_p8 = scmp.lt.s32.totalorder %s8366_s26, %s9338_s1 }
  0x53   : > { %p8075_p3 = scmp.lt.s32.totalorder %s8073_s14, %s8068_s21 }
  0x54   : > { %p8071_p4 = pnand %p8069_p1, %p8042_p7 }
  0x55   : > { %p8076_p12 = por %p8075_p3, %p8074_p8 }
  0x56   : > { %p8072_p6 = pneg %p8071_p4 }
  0x58   : > { %p8077_p10 = pnand %p8076_p12, %p8072_p6 }
  0x5a   : > { %8080 = shalt.err (!%p8077_p10)
}
  0x5b   : > { %s8081_s13 = scalar_lea.vmem %s507_s23, 128  ;;  %s8174_s0 = smov [#allocation5]  }
  0x5c   : > { %p8082_p2 = scmp.ne.s32.totalorder %s507_s23, %s8081_s13  ;;  %s8086_s19 = sshll.u32 %s8174_s0, 4  ;;  %s8087_s19 = int_to_ptr.vmem [resolvable:$false] %s8086_s19 }
  0x5d   : > { %s8088_s11 = scalar_lea.vmem %s8087_s19, 256  ;;  %p8089_p5 = scmp.lt.s32.totalorder %s507_s23, %s8087_s19 }
  0x5e   : > { %p8084_p13 = pnand %p8082_p2, %p8042_p7  ;;  %p8090_p9 = scmp.lt.s32.totalorder %s8088_s11, %s8081_s13 }
  0x60   : > { %p8085_p0 = pneg %p8084_p13  ;;  %p8091_p1 = por %p8090_p9, %p8089_p5 }
  0x62   : > { %p8092_p4 = pnand %p8091_p1, %p8085_p0 }
  0x64   : > { %8095 = shalt.err (!%p8092_p4)
}
  0x65   : > { %7940 = dma.hbm_to_vmem [thread:$0]  (!%p8359_p11), %s8366_s26, 128, %s507_s23, %s496_s17  }
  0x66   : > { %p9392_p6 = scmp.ne.s32.totalorder %s9381_s29, 0 }
  0x67   : > { %s8411_s12 = sand.u32 (!%p9392_p6), 1, %s8160_s22   ;;  %p9393_p7 = scmp.ne.s32.totalorder (!%p9392_p6), %s9378_s27, 0 }
  0x68   : > { %515 = sbr.rel (%p9392_p6) target bundleno = 2823 (0xb07), region = 84  ;;  %s8414_s16 = sshll.u32 (!%p9392_p6), %s8411_s12, 3 }
  0x69   : > { %s518_s21 = scalar_lea.sflag (!%p9392_p6), [#allocation3], %s8411_s12  ;;  %s521_s18 = scalar_lea.vmem (!%p9392_p6), [#allocation2], %s8414_s16 }
  0x6d   : > { %8139 = dma.done.wait (%p9393_p7), %s518_s21, 128  }
  0x6e   : > { %8141 = vsyncadd (%p9393_p7), %s518_s21, 4294967168  ;;  %s526_s29 = sand.u32 1, %s8291_s25   ;;  %s530_s20 = scalar_lea.vmem [#allocation5], %s8414_s16 }
  0x6f   : > { %s527_s26 = scalar_lea.sflag [#allocation6], %s526_s29 }
  0x70   : > { %8143 = dma.done.wait (%p9393_p7), %s527_s26, 128  }
  0x71   : > { %8145 = vsyncadd (%p9393_p7), %s527_s26, 4294967168  ;;  %p9394_p11 = scmp.eq.s32.totalorder %s8291_s25, 0 }
  0x73   : > { %8147 = dma.done.wait (%p9394_p11), [#allocation6], 512   ;;  %p9395_p8 = pmov %p9394_p11 }
  0x74   : > { %v8175_v0 = vmov 0.0   ;;  %vm8176_vm0 = vmmov 0   ;;  %v594_v1 = vld [vmem:[%s9339_s2 + $0x18] sm:$0xff]  ;;  %v593_v2 = vld [vmem:[%s9339_s2 + $0x10] sm:$0xff]  ;;  %v592_v3 = vld [vmem:[%s9339_s2 + $0x8] sm:$0xff]  ;;  %vm602_vm1 = vcmask 261120  }
  0x75   : > { %8149 = vsyncadd (%p9395_p8), [#allocation6], 4294966784  ;;  %7302 = vmatprep.subr.mxu0 %v8175_v0  ;;  %7313 = vmatprep.subr.mxu1 %v8175_v0  ;;  %v8447_v4 = vand.u32 4294901760, %v594_v1  ;;  %v8449_v5 = vand.u32 4294901760, %v593_v2  ;;  %v8451_v6 = vand.u32 4294901760, %v592_v3  ;;  %v591_v7 = vld [vmem:[%s9339_s2] sm:$0xff] }
  0x76   : > { %7310 = vmatprep.mubr.msk.f32.mxu0 %vm8176_vm0, %v8175_v0  ;;  %7321 = vmatprep.mubr.msk.f32.mxu1 %vm8176_vm0, %v8175_v0  ;;  %v8458_v8 = vld [vmem:[%s521_s18] sm:$0xff]  ;;  %v589_v9 = vld [vmem:[%s530_s20] sm:$0xff]  ;;  %v8460_v10 = vand.u32 4294901760, %v591_v7  ;;  %s8177_s10 = smov 104   ;;  %s8178_s14 = smov 120   ;;  %vm1609_vm2 = vcmask 64512  }
  0x77   : > { %v590_v11 = vadd.f32 %v589_v9, %v8458_v8  ;;  %7303 = vmatpush3.msra.mxu0 %v8447_v4  ;;  %v711_v12 = vsub.f32 %v594_v1, %v8447_v4  ;;  %v718_v13 = vsub.f32 %v593_v2, %v8449_v5  ;;  %v725_v14 = vsub.f32 %v592_v3, %v8451_v6  ;;  %v1094_v34 = vld [vmem:[%s9341_s4 + $0x18] sm:$0xff]  ;;  %v1093_v35 = vld [vmem:[%s9341_s4 + $0x10] sm:$0xff]  ;;  %v1092_v36 = vld [vmem:[%s9341_s4 + $0x8] sm:$0xff]  ;;  %s8179_s15 = smov 96   ;;  %s8180_s30 = smov 112  }
  0x78   : > { %7304 = vmatprep.subr.mxu0 %v8175_v0  ;;  %v732_v16 = vsub.f32 %v591_v7, %v8460_v10  ;;  %v1103_v37 = vsel %vm602_vm1, %v8458_v8, 0  ;;  %v8533_v38 = vand.u32 4294901760, %v1094_v34  ;;  %v8535_v39 = vand.u32 4294901760, %v1093_v35  ;;  %v1091_v41 = vld [vmem:[%s9341_s4] sm:$0xff]  ;;  %s8181_s26 = smov 8   ;;  %s8182_s20 = smov 16  }
  0x79   : > { %v604_v15 = vsel %vm602_vm1, %v590_v11, 0  ;;  %7305 = vmatpush3.msra.mxu0 %v8449_v5  ;;  %v712_v17 = vand.u32 4294901760, %v711_v12  ;;  %v719_v18 = vand.u32 4294901760, %v718_v13  ;;  %v726_v20 = vand.u32 4294901760, %v725_v14  ;;  %s9396_s29 = sld [smem:[#allocation22_spill]]  ;;  %s7029_s19 = sshll.u32 %s8291_s25, 7 }
  0x7a   : > { %v8471_v19 = vand.u32 4294901760, %v604_v15  ;;  %7306 = vmatprep.subr.mxu0 %v8175_v0  ;;  %v733_v21 = vand.u32 4294901760, %v732_v16  ;;  %v8537_v40 = vand.u32 4294901760, %v1092_v36  ;;  %v8542_v42 = vand.u32 4294901760, %v1103_v37  ;;  %s9398_s17 = sld [smem:[#allocation23_spill]]  ;;  %s587_s11 = scalar_lea.vmem [#allocation8], %s8414_s16 }
  0x7b   : > { %7307 = vmatpush3.msra.mxu0 %v8451_v6  ;;  %v713_v22 = vsub.f32 %v711_v12, %v712_v17  ;;  %v720_v23 = vsub.f32 %v718_v13, %v719_v18  ;;  %v727_v25 = vsub.f32 %v725_v14, %v726_v20  ;;  %v8544_v43 = vand.u32 4294901760, %v1091_v41  ;;  %s9401_s0 = sld [smem:[#allocation25_spill]]  ;;  %s6904_s21 = sshll.u32 %s587_s11, 4  ;;  %s6905_s21 = int_to_ptr.vmem [resolvable:$true] %s6904_s21 }
  0x7c   : > { %v676_v24 = vsub.f32 %v604_v15, %v8471_v19  ;;  %7308 = vmatprep.subr.mxu0 %v8175_v0  ;;  %v734_v29 = vsub.f32 %v732_v16, %v733_v21  ;;  %v1210_v44 = vsub.f32 %v1094_v34, %v8533_v38  ;;  %v1217_v45 = vsub.f32 %v1093_v35, %v8535_v39  ;;  %s9402_s27 = sld [smem:[#allocation26_spill]] }
  0x7d   : > { %v714_v26 = vand.u32 4294901760, %v713_v22  ;;  %7309 = vmatpush3.msra.mxu0 %v8460_v10  ;;  %v721_v27 = vand.u32 4294901760, %v720_v23  ;;  %v728_v31 = vand.u32 4294901760, %v727_v25  ;;  %v1224_v46 = vsub.f32 %v1092_v36, %v8537_v40  ;;  %v7020_v36 = vld [vmem:[%s9342_s5] ss:$0 sm:$0xff] }
  0x7e   : > { %v677_v28 = vand.u32 4294901760, %v676_v24  ;;  %7324 = vmatprep.subr.mxu0 %v8175_v0  ;;  %v735_v33 = vand.u32 4294901760, %v734_v29  ;;  %v8551_v47 = vsub.f32 %v1103_v37, %v8542_v42  ;;  %v1231_v48 = vsub.f32 %v1091_v41, %v8544_v43 }
  0x7f   : > { %7314 = vmatpush3.msra.mxu1 %v714_v26  ;;  %v1211_v50 = vand.u32 4294901760, %v1210_v44  ;;  %v1218_v51 = vand.u32 4294901760, %v1217_v45  ;;  %v1225_v52 = vand.u32 4294901760, %v1224_v46  ;;  %vm5269_vm3 = vcmask 130048  }
  0x80   : > { %v678_v30 = vsub.f32 %v676_v24, %v677_v28  ;;  %7315 = vmatprep.subr.mxu1 %v8175_v0  ;;  %v1176_v49 = vand.u32 4294901760, %v8551_v47  ;;  %v1232_v53 = vand.u32 4294901760, %v1231_v48  ;;  %vm5271_vm4 = vcmask 195584  }
  0x81   : > { %7316 = vmatpush3.msra.mxu1 %v721_v27  ;;  %v1212_v55 = vsub.f32 %v1210_v44, %v1211_v50  ;;  %v1219_v56 = vsub.f32 %v1217_v45, %v1218_v51  ;;  %v1226_v57 = vsub.f32 %v1224_v46, %v1225_v52  ;;  %vm6318_vm5 = vcmask 523264  }
  0x82   : > { %v679_v32 = vand.u32 4294901760, %v678_v30  ;;  %7317 = vmatprep.subr.mxu1 %v8175_v0  ;;  %v1177_v54 = vsub.f32 %v8551_v47, %v1176_v49  ;;  %v1233_v61 = vsub.f32 %v1231_v48, %v1232_v53  ;;  %s6902_s23 = scalar_lea.hbm %s9402_s27, %s7029_s19 }
  0x83   : > { %7318 = vmatpush3.msra.mxu1 %v728_v31  ;;  %v1213_v59 = vand.u32 4294901760, %v1212_v55  ;;  %v1220_v60 = vand.u32 4294901760, %v1219_v56  ;;  %v1227_v62 = vand.u32 4294901760, %v1226_v57 }
  0x84   : > { %7311 = vmatmul.mubr.f32.vlgmr.msra.gmra.mxu0 %v679_v32  ;;  %7319 = vmatprep.subr.mxu1 %v8175_v0  ;;  %v1178_v58 = vand.u32 4294901760, %v1177_v54  ;;  %v1234_v63 = vand.u32 4294901760, %v1233_v61 }
  0x85   : > { %7325 = vmatpush3.msra.mxu0 %v711_v12  ;;  %7320 = vmatpush3.msra.mxu1 %v735_v33 }
  0x86   : > { %7326 = vmatprep.subr.mxu0 %v8175_v0  ;;  %7322 = vmatmul.mubr.f32.vlgmr.msra.gmra.mxu1 %v8471_v19 }
  0x87   : > { %7327 = vmatpush3.msra.mxu0 %v718_v13  ;;  %7335 = vmatprep.subr.mxu1 %v8175_v0 }
  0x88   : > { %7328 = vmatprep.subr.mxu0 %v8175_v0  ;;  %7336 = vmatpush3.msra.mxu1 %v8447_v4 }
  0x89   : > { %7329 = vmatpush3.msra.mxu0 %v725_v14  ;;  %7332 = vmatprep.mubr.msk.f32.mxu0 %vm8176_vm0, %v8175_v0 }
  0x8a   : > { %7330 = vmatprep.subr.mxu0 %v8175_v0  ;;  %7337 = vmatprep.subr.mxu1 %v8175_v0 }
  0x8b   : > { %7331 = vmatpush3.msra.mxu0 %v732_v16  ;;  %7338 = vmatpush3.msra.mxu1 %v8449_v5 }
  0x8c   : > { %7333 = vmatmul.mubr.f32.vlgmr.msra.gmra.mxu0 %v676_v24  ;;  %7346 = vmatprep.subr.mxu0 %v8175_v0 }
  0x8d   : > { %7339 = vmatprep.subr.mxu1 %v8175_v0  ;;  %7347 = vmatpush3.msra.mxu0 %v712_v17 }
  0x8e   : > { %7340 = vmatpush3.msra.mxu1 %v8451_v6  ;;  %7348 = vmatprep.subr.mxu0 %v8175_v0 }
  0x8f   : > { %7341 = vmatprep.subr.mxu1 %v8175_v0  ;;  %7349 = vmatpush3.msra.mxu0 %v719_v18 }
  0x90   : > { %7342 = vmatpush3.msra.mxu1 %v8460_v10  ;;  %7343 = vmatprep.mubr.msk.f32.mxu1 %vm8176_vm0, %v8175_v0 }
  0x91   : > { %7350 = vmatprep.subr.mxu0 %v8175_v0  ;;  %7344 = vmatmul.mubr.f32.vlgmr.msra.gmra.mxu1 %v677_v28 }
  0x92   : > { %7351 = vmatpush3.msra.mxu0 %v726_v20  ;;  %7357 = vmatprep.subr.mxu1 %v8175_v0 }
  0x93   : > { %7352 = vmatprep.subr.mxu0 %v8175_v0  ;;  %7358 = vmatpush3.msra.mxu1 %v8447_v4  ;;  %v7019_v4 = vld [vmem:[%s9340_s3] ss:$0 sm:$0xff] }
  0x94   : > { %7353 = vmatpush3.msra.mxu0 %v733_v21  ;;  %7354 = vmatprep.mubr.msk.f32.mxu0 %vm8176_vm0, %v8175_v0 }
  0x95   : > { %7359 = vmatprep.subr.mxu1 %v8175_v0  ;;  %7355 = vmatmul.mubr.f32.vlgmr.msra.gmra.mxu0 %v8471_v19 }
  0x96   : > { %7360 = vmatpush3.msra.mxu1 %v8449_v5  ;;  %7365 = vmatprep.mubr.msk.f32.mxu1 %vm8176_vm0, %v8175_v0 }
  0x97   : > { %7361 = vmatprep.subr.mxu1 %v8175_v0  ;;  %7368 = vmatprep.subr.mxu0 %v8175_v0 }
  0x98   : > { %7362 = vmatpush3.msra.mxu1 %v8451_v6  ;;  %7376 = vmatprep.mubr.msk.f32.mxu0 %vm8176_vm0, %v8175_v0 }
  0x99   : > { %7363 = vmatprep.subr.mxu1 %v8175_v0  ;;  %7369 = vmatpush3.msra.mxu0 %v8533_v38 }
  0x9a   : > { %7364 = vmatpush3.msra.mxu1 %v8460_v10  ;;  %7370 = vmatprep.subr.mxu0 %v8175_v0 }
  0x9b   : > { %7366 = vmatmul.mubr.f32.vlgmr.msra.gmra.mxu1 %v8471_v19  ;;  %7379 = vmatprep.subr.mxu1 %v8175_v0 }
  0x9c   : > { %7387 = vmatprep.mubr.msk.f32.mxu1 %vm8176_vm0, %v8175_v0  ;;  %7371 = vmatpush3.msra.mxu0 %v8535_v39 }
  0x9d   : > { %7372 = vmatprep.subr.mxu0 %v8175_v0  ;;  %7380 = vmatpush3.msra.mxu1 %v1213_v59 }
  0x9e   : > { %7373 = vmatpush3.msra.mxu0 %v8537_v40  ;;  %7381 = vmatprep.subr.mxu1 %v8175_v0 }
  0x9f   : > { %7374 = vmatprep.subr.mxu0 %v8175_v0  ;;  %7382 = vmatpush3.msra.mxu1 %v1220_v60 }
  0xa0   : > { %7375 = vmatpush3.msra.mxu0 %v8544_v43  ;;  %7383 = vmatprep.subr.mxu1 %v8175_v0 }
  0xa1   : > { %7390 = vmatprep.subr.mxu0 %v8175_v0  ;;  %7377 = vmatmul.mubr.f32.vlgmr.msra.gmra.mxu0 %v1178_v58 }
  0xa2   : > { %7391 = vmatpush3.msra.mxu0 %v1210_v44  ;;  %7384 = vmatpush3.msra.mxu1 %v1227_v62 }
  0xa3   : > { %7392 = vmatprep.subr.mxu0 %v8175_v0  ;;  %7385 = vmatprep.subr.mxu1 %v8175_v0 }
  0xa4   : > { %7393 = vmatpush3.msra.mxu0 %v1217_v45  ;;  %7386 = vmatpush3.msra.mxu1 %v1234_v63 }
  0xa5   : > { %7394 = vmatprep.subr.mxu0 %v8175_v0  ;;  %7398 = vmatprep.mubr.msk.f32.mxu0 %vm8176_vm0, %v8175_v0 }
  0xa6   : > { %7395 = vmatpush3.msra.mxu0 %v1224_v46  ;;  %7401 = vmatprep.subr.mxu1 %v8175_v0 }
  0xa7   : > { %7396 = vmatprep.subr.mxu0 %v8175_v0  ;;  %7388 = vmatmul.mubr.f32.vlgmr.msra.gmra.mxu1 %v8542_v42 }
  0xa8   : > { %7397 = vmatpush3.msra.mxu0 %v1231_v48  ;;  %7402 = vmatpush3.msra.mxu1 %v8533_v38 }
  0xa9   : > { %7412 = vmatprep.subr.mxu0 %v8175_v0  ;;  %7399 = vmatmul.mubr.f32.vlgmr.msra.gmra.mxu0 %v8551_v47 }
  0xaa   : > { %7413 = vmatpush3.msra.mxu0 %v1211_v50  ;;  %7403 = vmatprep.subr.mxu1 %v8175_v0 }
  0xab   : > { %7414 = vmatprep.subr.mxu0 %v8175_v0  ;;  %7404 = vmatpush3.msra.mxu1 %v8535_v39 }
  0xac   : > { %7415 = vmatpush3.msra.mxu0 %v1218_v51  ;;  %7405 = vmatprep.subr.mxu1 %v8175_v0 }
  0xad   : > { %7416 = vmatprep.subr.mxu0 %v8175_v0  ;;  %7406 = vmatpush3.msra.mxu1 %v8537_v40 }
  0xae   : > { %7417 = vmatpush3.msra.mxu0 %v1225_v52  ;;  %7407 = vmatprep.subr.mxu1 %v8175_v0 }
  0xaf   : > { %7418 = vmatprep.subr.mxu0 %v8175_v0  ;;  %7408 = vmatpush3.msra.mxu1 %v8544_v43 }
  0xb0   : > { %7419 = vmatpush3.msra.mxu0 %v1232_v53  ;;  %7420 = vmatprep.mubr.msk.f32.mxu0 %vm8176_vm0, %v8175_v0 }
  0xb1   : > { %7409 = vmatprep.mubr.msk.f32.mxu1 %vm8176_vm0, %v8175_v0  ;;  %7421 = vmatmul.mubr.f32.vlgmr.msra.gmra.mxu0 %v8542_v42 }
  0xb2   : > { %7423 = vmatprep.subr.mxu1 %v8175_v0  ;;  %7434 = vmatprep.subr.mxu0 %v8175_v0 }
  0xb3   : > { %7410 = vmatmul.mubr.f32.vlgmr.msra.gmra.mxu1 %v1176_v49  ;;  %7436 = vmatprep.mubr.msk.f32.mxu0 %vm8176_vm0, %v8175_v0 }
  0xb4   : > { %7424 = vmatpush3.msra.mxu1 %v8533_v38  ;;  %7431 = vmatprep.mubr.msk.f32.mxu1 %vm8176_vm0, %v8175_v0 }
  0xb5   : > { %7425 = vmatprep.subr.mxu1 %v8175_v0 }
  0xb6   : > { %7426 = vmatpush3.msra.mxu1 %v8535_v39 }
  0xb7   : > { %7427 = vmatprep.subr.mxu1 %v8175_v0 }
  0xb8   : > { %7428 = vmatpush3.msra.mxu1 %v8537_v40 }
  0xb9   : > { %7429 = vmatprep.subr.mxu1 %v8175_v0 }
  0xba   : > { %7430 = vmatpush3.msra.mxu1 %v8544_v43 }
  0xbb   : > { %7432 = vmatmul.mubr.f32.vlgmr.msra.gmra.mxu1 %v8542_v42  ;;  %7439 = vmatprep.subr.mxu1 %v8175_v0 }
  0xbc   : > { %7441 = vmatprep.mubr.msk.f32.mxu1 %vm8176_vm0, %v8175_v0 }
 0x144   : > { %v681_v1 = vpop.f32.mrf.mxu0 }
 0x145   : > { %v682_v6 = vadd.f32 %v7019_v4, %v681_v1 }
 0x146   : > { %v7312_v2 = vpop.f32.mrf.mxu0  ;;  %v772_v3 = vpop.f32.mrf.mxu1 }
 0x147   : > { %v773_v9 = vadd.f32 %v772_v3, %v682_v6 }
 0x148   : > { %v7323_v5 = vpop.f32.mrf.mxu1 }
 0x14c   : > { %v852_v7 = vpop.f32.mrf.mxu0 }
 0x14d   : > { %v853_v11 = vadd.f32 %v852_v7, %v773_v9 }
 0x14e   : > { %v7334_v8 = vpop.f32.mrf.mxu0 }
 0x151   : > { %v929_v10 = vpop.f32.mrf.mxu1 }
 0x152   : > { %v930_v13 = vadd.f32 %v929_v10, %v853_v11 }
 0x153   : > { %v7345_v12 = vpop.f32.mrf.mxu1 }
 0x155   : > { %v1012_v14 = vpop.f32.mrf.mxu0 }
 0x156   : > { %v1013_v16 = vadd.f32 %v1012_v14, %v930_v13 }
 0x157   : > { %v7356_v15 = vpop.f32.mrf.mxu0 }
 0x15b   : > { %v1087_v17 = vpop.f32.mrf.mxu1 }
 0x15c   : > { %v1088_v18 = vadd.f32 %v1087_v17, %v1013_v16 }
 0x15d   : > { %v7367_v19 = vpop.f32.mrf.mxu1 }
 0x15e   : > { %1595 = vrot.lane.b32.xlu1 %v1088_v18, %s8177_s10  ;;  %1591 = vrot.lane.b32.xlu0 %v1088_v18, %s8178_s14  ;;  %v1610_v20 = vsel %vm1609_vm2, %v1088_v18, 0 }
 0x15f   : > { %v1680_v21 = vand.u32 4294901760, %v1610_v20 }
 0x161   : > { %v1681_v22 = vsub.f32 %v1610_v20, %v1680_v21  ;;  %v1180_v37 = vpop.f32.mrf.mxu0 }
 0x162   : > { %1607 = vrot.lane.b32.xlu1 %v1088_v18, %s8179_s15  ;;  %1593 = vrot.lane.b32.xlu0 %v1088_v18, %s8180_s30  ;;  %v1181_v39 = vadd.f32 %v7020_v36, %v1180_v37 }
 0x163   : > { %v1682_v25 = vand.u32 4294901760, %v1681_v22  ;;  %v7378_v40 = vpop.f32.mrf.mxu0 }
 0x165   : > { %v1683_v29 = vsub.f32 %v1681_v22, %v1682_v25 }
 0x167   : > { %v1684_v32 = vand.u32 4294901760, %v1683_v29  ;;  %v1271_v38 = vpop.f32.mrf.mxu1 }
 0x168   : > { %v1272_v42 = vadd.f32 %v1271_v38, %v1181_v39 }
 0x169   : > { %v7389_v41 = vpop.f32.mrf.mxu1  ;;  %v1351_v43 = vpop.f32.mrf.mxu0 }
 0x16a   : > { %v1352_v45 = vadd.f32 %v1351_v43, %v1272_v42 }
 0x16b   : > { %v7400_v46 = vpop.f32.mrf.mxu0 }
 0x171   : > { %v1511_v49 = vpop.f32.mrf.mxu0 }
 0x173   : > { %v1428_v44 = vpop.f32.mrf.mxu1  ;;  %v7422_v50 = vpop.f32.mrf.mxu0 }
 0x174   : > { %v1429_v48 = vadd.f32 %v1428_v44, %v1352_v45 }
 0x175   : > { %v7411_v47 = vpop.f32.mrf.mxu1 }
 0x176   : > { %v1512_v51 = vadd.f32 %v1511_v49, %v1429_v48 }
 0x17b   : > { %v1586_v52 = vpop.f32.mrf.mxu1 }
 0x17c   : > { %v8639_v53 = vadd.f32 %v1586_v52, %v1512_v51 }
 0x17d   : > { %v7433_v54 = vpop.f32.mrf.mxu1 }
 0x1d0   : > { %v8614_v23 = vpop.permute.xlu1 %1595  ;;  %v1592_v24 = vpop.permute.xlu0 %1591 }
 0x1d1   : > { %2060 = vrot.lane.b32.xlu0 %v1592_v24, %s8179_s15  ;;  %v2062_v55 = vsel %vm1609_vm2, %v1592_v24, 0  ;;  %v2966_v11 = vsel %vm1609_vm2, %v8614_v23, 0 }
 0x1d2   : > { %v2132_v56 = vand.u32 4294901760, %v2062_v55  ;;  %v8660_v15 = vand.u32 4294901760, %v2966_v11 }
 0x1d4   : > { %v1608_v26 = vpop.permute.xlu1 %1607  ;;  %v1594_v27 = vpop.permute.xlu0 %1593  ;;  %v2133_v57 = vsub.f32 %v2062_v55, %v2132_v56  ;;  %v8670_v19 = vsub.f32 %v2966_v11, %v8660_v15 }
 0x1d5   : > { %v1612_v28 = vsel %vm1609_vm2, %v1608_v26, 0  ;;  %2964 = vrot.lane.b32.xlu0 %v8614_v23, %s8179_s15  ;;  %2512 = vrot.lane.b32.xlu1 %v1594_v27, %s8179_s15  ;;  %v2514_v59 = vsel %vm1609_vm2, %v1594_v27, 0  ;;  %s8184_s15 = smov [#allocation8]  }
 0x1d6   : > { %v1645_v30 = vand.u32 4294901760, %v1612_v28  ;;  %v2134_v58 = vand.u32 4294901760, %v2133_v57  ;;  %v8643_v62 = vand.u32 4294901760, %v2514_v59  ;;  %v3038_v23 = vand.u32 4294901760, %v8670_v19 }
 0x1d8   : > { %v1722_v31 = vsub.f32 %v1612_v28, %v1645_v30  ;;  %7435 = vmatpush3.xpose.msra.mxu0 %v1645_v30  ;;  %v2135_v61 = vsub.f32 %v2133_v57, %v2134_v58  ;;  %v8647_v4 = vsub.f32 %v2514_v59, %v8643_v62  ;;  %v3039_v26 = vsub.f32 %v8670_v19, %v3038_v23 }
 0x1d9   : > { %7444 = vmatprep.subr.mxu0 %v8175_v0  ;;  %v8701_v28 = vand.u32 4294901760, %v8639_v53 }
 0x1da   : > { %v1723_v33 = vand.u32 4294901760, %v1722_v31  ;;  %v2136_v6 = vand.u32 4294901760, %v2135_v61  ;;  %v2586_v10 = vand.u32 4294901760, %v8647_v4  ;;  %v3040_v29 = vand.u32 4294901760, %v3039_v26 }
 0x1db   : > { %7437 = vmatmul.mubr.f32.vlgmr.msra.gmra.mxu0 %v1684_v32 }
 0x1dc   : > { %v1724_v34 = vsub.f32 %v1722_v31, %v1723_v33  ;;  %7445 = vmatpush3.xpose.msra.mxu0 %v1722_v31  ;;  %7446 = vmatprep.mubr.msk.f32.mxu0 %vm8176_vm0, %v8175_v0  ;;  %v2587_v16 = vsub.f32 %v8647_v4, %v2586_v10  ;;  %v8712_v31 = vsub.f32 %v8639_v53, %v8701_v28 }
 0x1dd   : > { %7454 = vmatprep.subr.mxu0 %v8175_v0 }
 0x1de   : > { %v1725_v35 = vand.u32 4294901760, %v1724_v34  ;;  %v2588_v20 = vand.u32 4294901760, %v2587_v16 }
 0x1df   : > { %7447 = vmatmul.mubr.f32.vlgmr.msra.gmra.mxu0 %v1681_v22 }
 0x1e0   : > { %7440 = vmatpush3.xpose.msra.mxu1 %v1725_v35  ;;  %7455 = vmatpush3.xpose.msra.mxu0 %v1723_v33  ;;  %v3572_v33 = vand.u32 4294901760, %v8712_v31 }
 0x1e1   : > { %7456 = vmatprep.mubr.msk.f32.mxu0 %vm8176_vm0, %v8175_v0  ;;  %7449 = vmatprep.subr.mxu1 %v8175_v0 }
 0x1e2   : > { %7464 = vmatprep.subr.mxu0 %v8175_v0  ;;  %v3573_v34 = vsub.f32 %v8712_v31, %v3572_v33 }
 0x1e3   : > { %7442 = vmatmul.mubr.f32.vlgmr.msra.gmra.mxu1 %v1680_v21  ;;  %7457 = vmatmul.mubr.f32.vlgmr.msra.gmra.mxu0 %v1680_v21 }
 0x1e4   : > { %7450 = vmatpush3.xpose.msra.mxu1 %v1645_v30  ;;  %7451 = vmatprep.mubr.msk.f32.mxu1 %vm8176_vm0, %v8175_v0  ;;  %v3574_v35 = vand.u32 4294901760, %v3573_v34 }
 0x1e5   : > { %7459 = vmatprep.subr.mxu1 %v8175_v0  ;;  %7466 = vmatprep.mubr.msk.f32.mxu0 %vm8176_vm0, %v8175_v0 }
 0x1e7   : > { %7452 = vmatmul.mubr.f32.vlgmr.msra.gmra.mxu1 %v1682_v25 }
 0x1e8   : > { %7460 = vmatpush3.xpose.msra.mxu1 %v1645_v30  ;;  %7461 = vmatprep.mubr.msk.f32.mxu1 %vm8176_vm0, %v8175_v0 }
 0x1e9   : > { %7469 = vmatprep.subr.mxu1 %v8175_v0 }
 0x1eb   : > { %7462 = vmatmul.mubr.f32.vlgmr.msra.gmra.mxu1 %v1680_v21 }
 0x1ec   : > { %7471 = vmatprep.mubr.msk.f32.mxu1 %vm8176_vm0, %v8175_v0 }
 0x243   : > { %v2061_v60 = vpop.permute.xlu0 %2060 }
 0x244   : > { %v2064_v63 = vsel %vm1609_vm2, %v2061_v60, 0 }
 0x245   : > { %v2097_v1 = vand.u32 4294901760, %v2064_v63 }
 0x247   : > { %v2174_v2 = vsub.f32 %v2064_v63, %v2097_v1  ;;  %v2513_v3 = vpop.permute.xlu1 %2512  ;;  %7465 = vmatpush3.xpose.msra.mxu0 %v2097_v1  ;;  %v2965_v14 = vpop.permute.xlu0 %2964 }
 0x248   : > { %v2516_v5 = vsel %vm1609_vm2, %v2513_v3, 0  ;;  %7474 = vmatprep.subr.mxu0 %v8175_v0  ;;  %v2968_v18 = vsel %vm1609_vm2, %v2965_v14, 0 }
 0x249   : > { %v2175_v7 = vand.u32 4294901760, %v2174_v2  ;;  %v8651_v8 = vand.u32 4294901760, %v2516_v5  ;;  %v8676_v22 = vand.u32 4294901760, %v2968_v18 }
 0x24a   : > { %7467 = vmatmul.mubr.f32.vlgmr.msra.gmra.mxu0 %v2136_v6 }
 0x24b   : > { %v2176_v9 = vsub.f32 %v2174_v2, %v2175_v7  ;;  %7475 = vmatpush3.xpose.msra.mxu0 %v2174_v2  ;;  %7476 = vmatprep.mubr.msk.f32.mxu0 %vm8176_vm0, %v8175_v0  ;;  %v2626_v13 = vsub.f32 %v2516_v5, %v8651_v8  ;;  %v3078_v25 = vsub.f32 %v2968_v18, %v8676_v22 }
 0x24c   : > { %7484 = vmatprep.subr.mxu0 %v8175_v0 }
 0x24d   : > { %v2177_v12 = vand.u32 4294901760, %v2176_v9  ;;  %v2627_v17 = vand.u32 4294901760, %v2626_v13  ;;  %v3079_v27 = vand.u32 4294901760, %v3078_v25 }
 0x24e   : > { %7477 = vmatmul.mubr.f32.vlgmr.msra.gmra.mxu0 %v2133_v57 }
 0x24f   : > { %7470 = vmatpush3.xpose.msra.mxu1 %v2177_v12  ;;  %7485 = vmatpush3.xpose.msra.mxu0 %v2175_v7  ;;  %v2628_v21 = vsub.f32 %v2626_v13, %v2627_v17  ;;  %v3080_v30 = vsub.f32 %v3078_v25, %v3079_v27 }
 0x250   : > { %7486 = vmatprep.mubr.msk.f32.mxu0 %vm8176_vm0, %v8175_v0  ;;  %7479 = vmatprep.subr.mxu1 %v8175_v0 }
 0x251   : > { %7494 = vmatprep.subr.mxu0 %v8175_v0  ;;  %v2629_v24 = vand.u32 4294901760, %v2628_v21  ;;  %v3081_v32 = vand.u32 4294901760, %v3080_v30 }
 0x252   : > { %7472 = vmatmul.mubr.f32.vlgmr.msra.gmra.mxu1 %v2132_v56  ;;  %7487 = vmatmul.mubr.f32.vlgmr.msra.gmra.mxu0 %v2132_v56 }
 0x253   : > { %7480 = vmatpush3.xpose.msra.mxu1 %v2097_v1  ;;  %7495 = vmatpush3.xpose.msra.mxu0 %v8651_v8 }
 0x254   : > { %7481 = vmatprep.mubr.msk.f32.mxu1 %vm8176_vm0, %v8175_v0  ;;  %7496 = vmatprep.mubr.msk.f32.mxu0 %vm8176_vm0, %v8175_v0 }
 0x255   : > { %7489 = vmatprep.subr.mxu1 %v8175_v0  ;;  %7504 = vmatprep.subr.mxu0 %v8175_v0 }
 0x256   : > { %7482 = vmatmul.mubr.f32.vlgmr.msra.gmra.mxu1 %v2134_v58  ;;  %7497 = vmatmul.mubr.f32.vlgmr.msra.gmra.mxu0 %v2588_v20 }
 0x257   : > { %7490 = vmatpush3.xpose.msra.mxu1 %v2097_v1  ;;  %7505 = vmatpush3.xpose.msra.mxu0 %v2626_v13 }
 0x258   : > { %7491 = vmatprep.mubr.msk.f32.mxu1 %vm8176_vm0, %v8175_v0  ;;  %7506 = vmatprep.mubr.msk.f32.mxu0 %vm8176_vm0, %v8175_v0 }
 0x259   : > { %7499 = vmatprep.subr.mxu1 %v8175_v0  ;;  %7514 = vmatprep.subr.mxu0 %v8175_v0 }
 0x25a   : > { %7492 = vmatmul.mubr.f32.vlgmr.msra.gmra.mxu1 %v2132_v56  ;;  %7507 = vmatmul.mubr.f32.vlgmr.msra.gmra.mxu0 %v8647_v4 }
 0x25b   : > { %7500 = vmatpush3.xpose.msra.mxu1 %v2629_v24  ;;  %7515 = vmatpush3.xpose.msra.mxu0 %v2627_v17 }
 0x25c   : > { %7501 = vmatprep.mubr.msk.f32.mxu1 %vm8176_vm0, %v8175_v0  ;;  %7516 = vmatprep.mubr.msk.f32.mxu0 %vm8176_vm0, %v8175_v0 }
 0x25d   : > { %7509 = vmatprep.subr.mxu1 %v8175_v0  ;;  %7524 = vmatprep.subr.mxu0 %v8175_v0 }
 0x25e   : > { %7502 = vmatmul.mubr.f32.vlgmr.msra.gmra.mxu1 %v8643_v62  ;;  %7517 = vmatmul.mubr.f32.vlgmr.msra.gmra.mxu0 %v8643_v62 }
 0x25f   : > { %7510 = vmatpush3.xpose.msra.mxu1 %v8651_v8  ;;  %7525 = vmatpush3.xpose.msra.mxu0 %v8676_v22 }
 0x260   : > { %7511 = vmatprep.mubr.msk.f32.mxu1 %vm8176_vm0, %v8175_v0  ;;  %7526 = vmatprep.mubr.msk.f32.mxu0 %vm8176_vm0, %v8175_v0 }
 0x261   : > { %7519 = vmatprep.subr.mxu1 %v8175_v0  ;;  %7534 = vmatprep.subr.mxu0 %v8175_v0 }
 0x262   : > { %7512 = vmatmul.mubr.f32.vlgmr.msra.gmra.mxu1 %v2586_v10  ;;  %7527 = vmatmul.mubr.f32.vlgmr.msra.gmra.mxu0 %v3040_v29 }
 0x263   : > { %7520 = vmatpush3.xpose.msra.mxu1 %v8651_v8  ;;  %7535 = vmatpush3.xpose.msra.mxu0 %v3078_v25 }
 0x264   : > { %7521 = vmatprep.mubr.msk.f32.mxu1 %vm8176_vm0, %v8175_v0  ;;  %7536 = vmatprep.mubr.msk.f32.mxu0 %vm8176_vm0, %v8175_v0 }
 0x265   : > { %7529 = vmatprep.subr.mxu1 %v8175_v0  ;;  %7544 = vmatprep.subr.mxu0 %v8175_v0 }
 0x266   : > { %7522 = vmatmul.mubr.f32.vlgmr.msra.gmra.mxu1 %v8643_v62  ;;  %7537 = vmatmul.mubr.f32.vlgmr.msra.gmra.mxu0 %v8670_v19 }
 0x267   : > { %7530 = vmatpush3.xpose.msra.mxu1 %v3081_v32  ;;  %7545 = vmatpush3.xpose.msra.mxu0 %v3079_v27 }
 0x268   : > { %7531 = vmatprep.mubr.msk.f32.mxu1 %vm8176_vm0, %v8175_v0  ;;  %7546 = vmatprep.mubr.msk.f32.mxu0 %vm8176_vm0, %v8175_v0 }
 0x269   : > { %7539 = vmatprep.subr.mxu1 %v8175_v0  ;;  %7554 = vmatprep.subr.mxu0 %v8175_v0 }
 0x26a   : > { %7532 = vmatmul.mubr.f32.vlgmr.msra.gmra.mxu1 %v8660_v15  ;;  %7547 = vmatmul.mubr.f32.vlgmr.msra.gmra.mxu0 %v8660_v15 }
 0x26b   : > { %7540 = vmatpush3.xpose.msra.mxu1 %v8676_v22  ;;  %7541 = vmatprep.mubr.msk.f32.mxu1 %vm8176_vm0, %v8175_v0 }
 0x26c   : > { %7549 = vmatprep.subr.mxu1 %v8175_v0  ;;  %7555 = vmatpush3.msra.mxu0 %v8701_v28 }
 0x26d   : > { %7556 = vmatprep.mubr.msk.f32.mxu0 %vm8176_vm0, %v8175_v0  ;;  %7564 = vmatprep.subr.mxu0 %v8175_v0 }
 0x26e   : > { %7542 = vmatmul.mubr.f32.vlgmr.msra.gmra.mxu1 %v3038_v23 }
 0x26f   : > { %7550 = vmatpush3.xpose.msra.mxu1 %v8676_v22  ;;  %7551 = vmatprep.mubr.msk.f32.mxu1 %vm8176_vm0, %v8175_v0 }
 0x270   : > { %7559 = vmatprep.subr.mxu1 %v8175_v0 }
 0x272   : > { %7552 = vmatmul.mubr.f32.vlgmr.msra.gmra.mxu1 %v8660_v15 }
 0x273   : > { %7560 = vmatpush3.msra.mxu1 %v3574_v35  ;;  %7561 = vmatprep.mubr.msk.f32.mxu1 %vm8176_vm0, %v8175_v0 }
 0x274   : > { %7569 = vmatprep.subr.mxu1 %v8175_v0 }
 0x29b   : > { %v1686_v36 = vpop.f32.mrf.mxu0 }
 0x29d   : > { %v7438_v37 = vpop.f32.mrf.mxu0 }
 0x29f   : > { %v1836_v38 = vpop.f32.mrf.mxu0 }
 0x2a1   : > { %v7448_v39 = vpop.f32.mrf.mxu0 }
 0x2a3   : > { %v1762_v40 = vpop.f32.mrf.mxu1  ;;  %v1984_v41 = vpop.f32.mrf.mxu0 }
 0x2a4   : > { %v1763_v42 = vadd.f32 %v1762_v40, %v1686_v36 }
 0x2a5   : > { %v7443_v43 = vpop.f32.mrf.mxu1  ;;  %v7458_v44 = vpop.f32.mrf.mxu0 }
 0x2a6   : > { %v1837_v45 = vadd.f32 %v1836_v38, %v1763_v42 }
 0x2a7   : > { %v1910_v46 = vpop.f32.mrf.mxu1 }
 0x2a8   : > { %v1911_v47 = vadd.f32 %v1910_v46, %v1837_v45 }
 0x2a9   : > { %v7453_v48 = vpop.f32.mrf.mxu1 }
 0x2aa   : > { %v1985_v49 = vadd.f32 %v1984_v41, %v1911_v47 }
 0x2ab   : > { %v2056_v50 = vpop.f32.mrf.mxu1 }
 0x2ac   : > { %v8750_v51 = vadd.f32 %v2056_v50, %v1985_v49 }
 0x2ad   : > { %v7463_v52 = vpop.f32.mrf.mxu1 }
 0x2ae   : > { %v3416_v54 = vsel %vm1609_vm2, %v8750_v51, -inf }
 0x2af   : > { %3417 = vmax.xlane.f32.xlu1 %v3416_v54 }
 0x30a   : > { %v2138_v55 = vpop.f32.mrf.mxu0 }
 0x30c   : > { %v7468_v56 = vpop.f32.mrf.mxu0 }
 0x30e   : > { %v2288_v57 = vpop.f32.mrf.mxu0 }
 0x310   : > { %v7478_v58 = vpop.f32.mrf.mxu0 }
 0x312   : > { %v2214_v59 = vpop.f32.mrf.mxu1  ;;  %v2436_v60 = vpop.f32.mrf.mxu0 }
 0x313   : > { %v2215_v61 = vadd.f32 %v2214_v59, %v2138_v55 }
 0x314   : > { %v7473_v62 = vpop.f32.mrf.mxu1  ;;  %v7488_v63 = vpop.f32.mrf.mxu0 }
 0x315   : > { %v2289_v1 = vadd.f32 %v2288_v57, %v2215_v61 }
 0x316   : > { %v2362_v2 = vpop.f32.mrf.mxu1  ;;  %v2590_v3 = vpop.f32.mrf.mxu0 }
 0x317   : > { %v2363_v4 = vadd.f32 %v2362_v2, %v2289_v1 }
 0x318   : > { %v7483_v5 = vpop.f32.mrf.mxu1  ;;  %v7498_v6 = vpop.f32.mrf.mxu0 }
 0x319   : > { %v2437_v7 = vadd.f32 %v2436_v60, %v2363_v4 }
 0x31a   : > { %v2508_v8 = vpop.f32.mrf.mxu1  ;;  %v2740_v9 = vpop.f32.mrf.mxu0 }
 0x31b   : > { %v2509_v10 = vadd.f32 %v2508_v8, %v2437_v7 }
 0x31c   : > { %v7493_v11 = vpop.f32.mrf.mxu1  ;;  %v7508_v12 = vpop.f32.mrf.mxu0 }
 0x31d   : > { %v3419_v13 = vsel %vm1609_vm2, %v2509_v10, -inf }
 0x31e   : > { %v2666_v14 = vpop.f32.mrf.mxu1  ;;  %3420 = vmax.xlane.f32.xlu0 %v3419_v13  ;;  %v2888_v15 = vpop.f32.mrf.mxu0 }
 0x31f   : > { %v2667_v16 = vadd.f32 %v2666_v14, %v2590_v3 }
 0x320   : > { %v7503_v17 = vpop.f32.mrf.mxu1  ;;  %v7518_v18 = vpop.f32.mrf.mxu0 }
 0x321   : > { %v2741_v19 = vadd.f32 %v2740_v9, %v2667_v16 }
 0x322   : > { %v2814_v20 = vpop.f32.mrf.mxu1  ;;  %v3042_v21 = vpop.f32.mrf.mxu0 }
 0x323   : > { %v2815_v22 = vadd.f32 %v2814_v20, %v2741_v19 }
 0x324   : > { %v7513_v23 = vpop.f32.mrf.mxu1  ;;  %v7528_v24 = vpop.f32.mrf.mxu0 }
 0x325   : > { %v2889_v25 = vadd.f32 %v2888_v15, %v2815_v22 }
 0x326   : > { %v2960_v26 = vpop.f32.mrf.mxu1  ;;  %v3192_v27 = vpop.f32.mrf.mxu0 }
 0x327   : > { %v2961_v29 = vadd.f32 %v2960_v26, %v2889_v25 }
 0x328   : > { %v7523_v30 = vpop.f32.mrf.mxu1  ;;  %v7538_v32 = vpop.f32.mrf.mxu0 }
 0x329   : > { %v3422_v34 = vsel %vm1609_vm2, %v2961_v29, -inf }
 0x32a   : > { %v3118_v35 = vpop.f32.mrf.mxu1  ;;  %3423 = vmax.xlane.f32.xlu0 %v3422_v34  ;;  %v3340_v36 = vpop.f32.mrf.mxu0 }
 0x32b   : > { %v3119_v37 = vadd.f32 %v3118_v35, %v3042_v21 }
 0x32c   : > { %v7533_v38 = vpop.f32.mrf.mxu1  ;;  %v7548_v39 = vpop.f32.mrf.mxu0 }
 0x32d   : > { %v3193_v40 = vadd.f32 %v3192_v27, %v3119_v37 }
 0x32e   : > { %v3266_v41 = vpop.f32.mrf.mxu1 }
 0x32f   : > { %v3267_v42 = vadd.f32 %v3266_v41, %v3193_v40 }
 0x330   : > { %v7543_v43 = vpop.f32.mrf.mxu1 }
 0x331   : > { %v3341_v44 = vadd.f32 %v3340_v36, %v3267_v42 }
 0x332   : > { %v3412_v45 = vpop.f32.mrf.mxu1 }
 0x333   : > { %v3413_v46 = vadd.f32 %v3412_v45, %v3341_v44 }
 0x334   : > { %v7553_v47 = vpop.f32.mrf.mxu1 }
 0x335   : > { %v3425_v48 = vsel %vm1609_vm2, %v3413_v46, -inf }
 0x336   : > { %3426 = vmax.xlane.f32.xlu1 %v3425_v48 }
 0x338   : > { %v3418_v49 = vpop.xlane.xlu1 %3417 }
 0x339   : > { %v3428_v50 = vsub.f32 %v8750_v51, %v3418_v49 }
 0x33b   : > { %v3432_v52 = vmul.f32 1.442695, %v3428_v50 }
 0x33d   : > { %7993 = vpow2.f32 %v3432_v52 }
 0x34a   : > { %v7994_v54 = vpop.eup %7993 }
 0x34b   : > { %v3440_v55 = vsel %vm1609_vm2, %v7994_v54, 0.0 }
 0x34c   : > { %3441 = vadd.xlane.f32.xlu0 %v3440_v55 }
 0x3a7   : > { %v3421_v56 = vpop.xlane.xlu0 %3420 }
 0x3a8   : > { %v3429_v57 = vsub.f32 %v2509_v10, %v3421_v56 }
 0x3aa   : > { %v3434_v58 = vmul.f32 1.442695, %v3429_v57 }
 0x3ac   : > { %7995 = vpow2.f32 %v3434_v58 }
 0x3b3   : > { %v3424_v59 = vpop.xlane.xlu0 %3423 }
 0x3b4   : > { %v3430_v60 = vsub.f32 %v2961_v29, %v3424_v59 }
 0x3b6   : > { %v3436_v61 = vmul.f32 1.442695, %v3430_v60 }
 0x3b8   : > { %7997 = vpow2.f32 %v3436_v61 }
 0x3b9   : > { %v7996_v62 = vpop.eup %7995 }
 0x3ba   : > { %v3443_v63 = vsel %vm1609_vm2, %v7996_v62, 0.0 }
 0x3bb   : > { %3444 = vadd.xlane.f32.xlu1 %v3443_v63 }
 0x3bf   : > { %v3427_v2 = vpop.xlane.xlu1 %3426 }
 0x3c0   : > { %v3431_v4 = vsub.f32 %v3413_v46, %v3427_v2 }
 0x3c2   : > { %v3438_v5 = vmul.f32 1.442695, %v3431_v4 }
 0x3c5   : > { %v8760_v1 = vpop.eup %7997 }
 0x3c6   : > { %v3446_v51 = vsel %vm1609_vm2, %v8760_v1, 0.0 }
 0x3c7   : > { %3447 = vadd.xlane.f32.xlu0 %v3446_v51 }
 0x3cc   : > { %1601 = vrot.lane.b32.xlu1 %v8639_v53, %s8180_s30  ;;  %s9400_s30 = sld [smem:[#allocation24_spill]] }
 0x3d5   : > { %v3442_v3 = vpop.xlane.xlu0 %3441 }
 0x3d6   : > { %7999 = vrcp.f32 %v3442_v3 }
 0x3d7   : > { %8001 = vpow2.f32 %v3438_v5 }
 0x3dd   : > { %1598 = vrot.lane.b32.xlu0 %v8639_v53, %s8178_s14  ;;  %s8183_s14 = smov 24  }
 0x3e3   : > { %v8000_v6 = vpop.eup %7999 }
 0x3e4   : > { %v3453_v7 = vmul.f32 %v8000_v6, %v7994_v54  ;;  %v8773_v12 = vpop.eup %8001 }
 0x3e5   : > { %v3449_v14 = vsel %vm1609_vm2, %v8773_v12, 0.0 }
 0x3e6   : > { %v3461_v8 = vsel %vm1609_vm2, %v3453_v7, 0 }
 0x3e7   : > { %v3529_v9 = vand.u32 4294901760, %v3461_v8 }
 0x3e9   : > { %v3530_v10 = vsub.f32 %v3461_v8, %v3529_v9  ;;  %7562 = vmatmul.mubr.f32.vlgmr.msra.gmra.mxu1 %v3529_v9 }
 0x3ea   : > { %7570 = vmatpush3.msra.mxu1 %v8701_v28  ;;  %7571 = vmatprep.mubr.msk.f32.mxu1 %vm8176_vm0, %v8175_v0 }
 0x3eb   : > { %7579 = vmatprep.subr.mxu1 %v8175_v0  ;;  %v3531_v11 = vand.u32 4294901760, %v3530_v10 }
 0x3ed   : > { %7572 = vmatmul.mubr.f32.vlgmr.msra.gmra.mxu1 %v3531_v11  ;;  %v3532_v13 = vsub.f32 %v3530_v10, %v3531_v11 }
 0x3ee   : > { %7580 = vmatpush3.msra.mxu1 %v8701_v28  ;;  %7581 = vmatprep.mubr.msk.f32.mxu1 %vm8176_vm0, %v8175_v0 }
 0x3ef   : > { %v3533_v15 = vand.u32 4294901760, %v3532_v13  ;;  %7589 = vmatprep.subr.mxu1 %v8175_v0 }
 0x3f0   : > { %3450 = vadd.xlane.f32.xlu1 %v3449_v14 }
 0x3f1   : > { %7557 = vmatmul.mubr.f32.vlgmr.msra.gmra.mxu0 %v3533_v15  ;;  %7582 = vmatmul.mubr.f32.vlgmr.msra.gmra.mxu1 %v3529_v9 }
 0x3f2   : > { %7565 = vmatpush3.msra.mxu0 %v8712_v31  ;;  %7566 = vmatprep.mubr.msk.f32.mxu0 %vm8176_vm0, %v8175_v0 }
 0x3f3   : > { %7574 = vmatprep.subr.mxu0 %v8175_v0  ;;  %7591 = vmatprep.mubr.msk.f32.mxu1 %vm8176_vm0, %v8175_v0 }
 0x3f5   : > { %7567 = vmatmul.mubr.f32.vlgmr.msra.gmra.mxu0 %v3530_v10 }
 0x3f6   : > { %7575 = vmatpush3.msra.mxu0 %v3572_v33  ;;  %7576 = vmatprep.mubr.msk.f32.mxu0 %vm8176_vm0, %v8175_v0 }
 0x3f7   : > { %7584 = vmatprep.subr.mxu0 %v8175_v0 }
 0x3f9   : > { %7577 = vmatmul.mubr.f32.vlgmr.msra.gmra.mxu0 %v3529_v9 }
 0x3fa   : > { %7586 = vmatprep.mubr.msk.f32.mxu0 %vm8176_vm0, %v8175_v0 }
 0x401   : > { %1604 = vrot.lane.b32.xlu1 %v8639_v53, %s8177_s10  ;;  %s9399_s10 = sld [smem:[#allocation18_spill]] }
 0x407   : > { %p9403_p12 = scmp.ne.s32.totalorder %s9399_s10, 0 }
 0x444   : > { %v3445_v28 = vpop.xlane.xlu1 %3444 }
 0x445   : > { %8003 = vrcp.f32 %v3445_v28 }
 0x448   : > { %v1602_v33 = vpop.permute.xlu1 %1601 }
 0x449   : > { %v4392_v23 = vand.u32 4294901760, %v1602_v33 }
 0x44b   : > { %v4469_v27 = vsub.f32 %v1602_v33, %v4392_v23 }
 0x44d   : > { %v4470_v36 = vand.u32 4294901760, %v4469_v27 }
 0x44f   : > { %v4471_v39 = vsub.f32 %v4469_v27, %v4470_v36 }
 0x450   : > { %v3448_v16 = vpop.xlane.xlu0 %3447 }
 0x451   : > { %8005 = vrcp.f32 %v3448_v16  ;;  %v4472_v42 = vand.u32 4294901760, %v4471_v39 }
 0x452   : > { %v8004_v17 = vpop.eup %8003 }
 0x453   : > { %v3455_v18 = vmul.f32 %v8004_v17, %v7996_v62 }
 0x454   : > { %v1599_v31 = vpop.permute.xlu0 %1598 }
 0x455   : > { %v3943_v19 = vand.u32 4294901760, %v1599_v31  ;;  %v3910_v20 = vsel %vm1609_vm2, %v3455_v18, 0 }
 0x456   : > { %v3978_v21 = vand.u32 4294901760, %v3910_v20 }
 0x457   : > { %v4020_v22 = vsub.f32 %v1599_v31, %v3943_v19  ;;  %7585 = vmatpush3.msra.mxu0 %v3943_v19 }
 0x458   : > { %7594 = vmatprep.subr.mxu0 %v8175_v0  ;;  %v3979_v24 = vsub.f32 %v3910_v20, %v3978_v21 }
 0x459   : > { %v4021_v25 = vand.u32 4294901760, %v4020_v22 }
 0x45a   : > { %v3980_v53 = vand.u32 4294901760, %v3979_v24 }
 0x45b   : > { %v4022_v26 = vsub.f32 %v4020_v22, %v4021_v25 }
 0x45c   : > { %v3981_v29 = vsub.f32 %v3979_v24, %v3980_v53 }
 0x45d   : > { %v4023_v30 = vand.u32 4294901760, %v4022_v26 }
 0x45e   : > { %v8006_v32 = vpop.eup %8005  ;;  %v3982_v34 = vand.u32 4294901760, %v3981_v29 }
 0x45f   : > { %v3457_v35 = vmul.f32 %v8006_v32, %v8760_v1  ;;  %7590 = vmatpush3.msra.mxu1 %v4023_v30  ;;  %v5276_v30 = vld [vmem:[%s9343_s6 + $0x18] sm:$0xff]  ;;  %v5275_v32 = vld [vmem:[%s9343_s6 + $0x10] sm:$0xff] }
 0x460   : > { %7587 = vmatmul.mubr.f32.vlgmr.msra.gmra.mxu0 %v3982_v34  ;;  %7592 = vmatmul.mubr.f32.vlgmr.msra.gmra.mxu1 %v3978_v21 }
 0x461   : > { %7595 = vmatpush3.msra.mxu0 %v4020_v22  ;;  %7599 = vmatprep.subr.mxu1 %v8175_v0  ;;  %v4359_v37 = vsel %vm1609_vm2, %v3457_v35, 0  ;;  %v8863_v35 = vand.u32 4294901760, %v5276_v30 }
 0x462   : > { %7600 = vmatpush3.msra.mxu1 %v3943_v19  ;;  %7596 = vmatprep.mubr.msk.f32.mxu0 %vm8176_vm0, %v8175_v0  ;;  %v4427_v38 = vand.u32 4294901760, %v4359_v37 }
 0x463   : > { %7601 = vmatprep.mubr.msk.f32.mxu1 %vm8176_vm0, %v8175_v0  ;;  %7604 = vmatprep.subr.mxu0 %v8175_v0 }
 0x464   : > { %7609 = vmatprep.subr.mxu1 %v8175_v0  ;;  %7597 = vmatmul.mubr.f32.vlgmr.msra.gmra.mxu0 %v3979_v24  ;;  %v4428_v40 = vsub.f32 %v4359_v37, %v4427_v38 }
 0x465   : > { %7602 = vmatmul.mubr.f32.vlgmr.msra.gmra.mxu1 %v3980_v53  ;;  %7605 = vmatpush3.msra.mxu0 %v4021_v25 }
 0x466   : > { %7610 = vmatpush3.msra.mxu1 %v3943_v19  ;;  %7606 = vmatprep.mubr.msk.f32.mxu0 %vm8176_vm0, %v8175_v0  ;;  %v4429_v41 = vand.u32 4294901760, %v4428_v40 }
 0x467   : > { %7611 = vmatprep.mubr.msk.f32.mxu1 %vm8176_vm0, %v8175_v0  ;;  %7614 = vmatprep.subr.mxu0 %v8175_v0 }
 0x468   : > { %7619 = vmatprep.subr.mxu1 %v8175_v0  ;;  %7607 = vmatmul.mubr.f32.vlgmr.msra.gmra.mxu0 %v3978_v21  ;;  %v4430_v43 = vsub.f32 %v4428_v40, %v4429_v41 }
 0x469   : > { %7612 = vmatmul.mubr.f32.vlgmr.msra.gmra.mxu1 %v3978_v21  ;;  %7615 = vmatpush3.msra.mxu0 %v4392_v23 }
 0x46a   : > { %7620 = vmatpush3.msra.mxu1 %v4472_v42  ;;  %7616 = vmatprep.mubr.msk.f32.mxu0 %vm8176_vm0, %v8175_v0  ;;  %v4431_v44 = vand.u32 4294901760, %v4430_v43 }
 0x46b   : > { %7621 = vmatprep.mubr.msk.f32.mxu1 %vm8176_vm0, %v8175_v0  ;;  %7624 = vmatprep.subr.mxu0 %v8175_v0 }
 0x46c   : > { %7629 = vmatprep.subr.mxu1 %v8175_v0  ;;  %7617 = vmatmul.mubr.f32.vlgmr.msra.gmra.mxu0 %v4431_v44 }
 0x46d   : > { %7622 = vmatmul.mubr.f32.vlgmr.msra.gmra.mxu1 %v4427_v38  ;;  %7625 = vmatpush3.msra.mxu0 %v4469_v27 }
 0x46e   : > { %7630 = vmatpush3.msra.mxu1 %v4392_v23  ;;  %7626 = vmatprep.mubr.msk.f32.mxu0 %vm8176_vm0, %v8175_v0 }
 0x46f   : > { %7631 = vmatprep.mubr.msk.f32.mxu1 %vm8176_vm0, %v8175_v0  ;;  %7634 = vmatprep.subr.mxu0 %v8175_v0 }
 0x470   : > { %7639 = vmatprep.subr.mxu1 %v8175_v0  ;;  %7627 = vmatmul.mubr.f32.vlgmr.msra.gmra.mxu0 %v4428_v40  ;;  %v8868_v40 = vsub.f32 %v5276_v30, %v8863_v35 }
 0x471   : > { %7632 = vmatmul.mubr.f32.vlgmr.msra.gmra.mxu1 %v4429_v41  ;;  %7635 = vmatpush3.msra.mxu0 %v4470_v36  ;;  %v8865_v36 = vand.u32 4294901760, %v5275_v32 }
 0x472   : > { %7640 = vmatpush3.msra.mxu1 %v4392_v23  ;;  %7636 = vmatprep.mubr.msk.f32.mxu0 %vm8176_vm0, %v8175_v0 }
 0x473   : > { %7641 = vmatprep.mubr.msk.f32.mxu1 %vm8176_vm0, %v8175_v0  ;;  %7644 = vmatprep.subr.mxu0 %v8175_v0  ;;  %v8871_v41 = vsub.f32 %v5275_v32, %v8865_v36 }
 0x474   : > { %7637 = vmatmul.mubr.f32.vlgmr.msra.gmra.mxu0 %v4427_v38  ;;  %7649 = vmatprep.subr.mxu1 %v8175_v0 }
 0x475   : > { %7642 = vmatmul.mubr.f32.vlgmr.msra.gmra.mxu1 %v4427_v38  ;;  %7646 = vmatprep.mubr.msk.f32.mxu0 %vm8176_vm0, %v8175_v0 }
 0x476   : > { %7651 = vmatprep.mubr.msk.f32.mxu1 %vm8176_vm0, %v8175_v0 }
 0x479   : > { %v3451_v45 = vpop.xlane.xlu1 %3450 }
 0x47a   : > { %8007 = vrcp.f32 %v3451_v45  ;;  %v5393_v45 = vand.u32 4294901760, %v8868_v40 }
 0x47d   : > { %v1605_v46 = vpop.permute.xlu1 %1604 }
 0x47e   : > { %v4841_v47 = vand.u32 4294901760, %v1605_v46 }
 0x480   : > { %v4918_v48 = vsub.f32 %v1605_v46, %v4841_v47  ;;  %7645 = vmatpush3.msra.mxu0 %v4841_v47  ;;  %v5400_v46 = vand.u32 4294901760, %v8871_v41 }
 0x481   : > { %7654 = vmatprep.subr.mxu0 %v8175_v0 }
 0x482   : > { %v4919_v49 = vand.u32 4294901760, %v4918_v48 }
 0x484   : > { %v4920_v50 = vsub.f32 %v4918_v48, %v4919_v49 }
 0x486   : > { %v4921_v52 = vand.u32 4294901760, %v4920_v50  ;;  %v5394_v50 = vsub.f32 %v8868_v40, %v5393_v45 }
 0x487   : > { %v8008_v54 = vpop.eup %8007 }
 0x488   : > { %7650 = vmatpush3.msra.mxu1 %v4921_v52  ;;  %v3459_v55 = vmul.f32 %v8008_v54, %v8773_v12  ;;  %v5401_v52 = vsub.f32 %v8871_v41, %v5400_v46 }
 0x489   : > { %7659 = vmatprep.subr.mxu1 %v8175_v0 }
 0x48a   : > { %v4808_v56 = vsel %vm1609_vm2, %v3459_v55, 0 }
 0x48b   : > { %v4876_v57 = vand.u32 4294901760, %v4808_v56 }
 0x48d   : > { %v4877_v58 = vsub.f32 %v4808_v56, %v4876_v57  ;;  %7652 = vmatmul.mubr.f32.vlgmr.msra.gmra.mxu1 %v4876_v57 }
 0x48e   : > { %7660 = vmatpush3.msra.mxu1 %v4841_v47  ;;  %7661 = vmatprep.mubr.msk.f32.mxu1 %vm8176_vm0, %v8175_v0 }
 0x48f   : > { %7669 = vmatprep.subr.mxu1 %v8175_v0  ;;  %v4878_v59 = vand.u32 4294901760, %v4877_v58 }
 0x491   : > { %7662 = vmatmul.mubr.f32.vlgmr.msra.gmra.mxu1 %v4878_v59  ;;  %v4879_v60 = vsub.f32 %v4877_v58, %v4878_v59 }
 0x492   : > { %7670 = vmatpush3.msra.mxu1 %v4841_v47  ;;  %7671 = vmatprep.mubr.msk.f32.mxu1 %vm8176_vm0, %v8175_v0 }
 0x493   : > { %v4880_v61 = vand.u32 4294901760, %v4879_v60  ;;  %7685 = vmatprep.subr.mxu1 %v8175_v0 }
 0x495   : > { %7647 = vmatmul.mubr.f32.vlgmr.msra.gmra.mxu0 %v4880_v61  ;;  %7672 = vmatmul.mubr.f32.vlgmr.msra.gmra.mxu1 %v4876_v57 }
 0x496   : > { %7655 = vmatpush3.msra.mxu0 %v4918_v48  ;;  %7656 = vmatprep.mubr.msk.f32.mxu0 %vm8176_vm0, %v8175_v0 }
 0x497   : > { %7664 = vmatprep.subr.mxu0 %v8175_v0  ;;  %7693 = vmatprep.mubr.msk.f32.mxu1 %vm8176_vm0, %v8175_v0 }
 0x499   : > { %7657 = vmatmul.mubr.f32.vlgmr.msra.gmra.mxu0 %v4877_v58  ;;  %v5402_v58 = vand.u32 4294901760, %v5401_v52 }
 0x49a   : > { %7665 = vmatpush3.msra.mxu0 %v4919_v49  ;;  %7666 = vmatprep.mubr.msk.f32.mxu0 %vm8176_vm0, %v8175_v0 }
 0x49b   : > { %7674 = vmatprep.subr.mxu0 %v8175_v0 }
 0x49d   : > { %7667 = vmatmul.mubr.f32.vlgmr.msra.gmra.mxu0 %v4876_v57  ;;  %v5395_v57 = vand.u32 4294901760, %v5394_v50 }
 0x49e   : > { %7682 = vmatprep.mubr.msk.f32.mxu0 %vm8176_vm0, %v8175_v0  ;;  %7675 = vmatpush3.msra.mxu0 %v8863_v35 }
 0x49f   : > { %7676 = vmatprep.subr.mxu0 %v8175_v0  ;;  %7686 = vmatpush3.msra.mxu1 %v5395_v57 }
 0x4a0   : > { %7677 = vmatpush3.msra.mxu0 %v8865_v36  ;;  %7687 = vmatprep.subr.mxu1 %v8175_v0 }
 0x4a1   : > { %7678 = vmatprep.subr.mxu0 %v8175_v0  ;;  %7688 = vmatpush3.msra.mxu1 %v5402_v58 }
 0x4a2   : > { %7689 = vmatprep.subr.mxu1 %v8175_v0 }
 0x4a9   : > { %v3611_v62 = vpop.f32.mrf.mxu1 }
 0x4ab   : > { %v7563_v63 = vpop.f32.mrf.mxu1 }
 0x4ad   : > { %v3759_v1 = vpop.f32.mrf.mxu1 }
 0x4af   : > { %v7573_v51 = vpop.f32.mrf.mxu1 }
 0x4b0   : > { %v5273_v51 = vld [vmem:[%s9343_s6] sm:$0xff] }
 0x4b1   : > { %v3535_v2 = vpop.f32.mrf.mxu0  ;;  %v3905_v3 = vpop.f32.mrf.mxu1 }
 0x4b2   : > { %v3612_v4 = vadd.f32 %v3611_v62, %v3535_v2  ;;  %v5274_v62 = vld [vmem:[%s9343_s6 + $0x8] sm:$0xff] }
 0x4b3   : > { %v7558_v5 = vpop.f32.mrf.mxu0  ;;  %v7583_v6 = vpop.f32.mrf.mxu1 }
 0x4b5   : > { %v3685_v7 = vpop.f32.mrf.mxu0 }
 0x4b6   : > { %v3686_v8 = vadd.f32 %v3685_v7, %v3612_v4  ;;  %v8898_v4 = vand.u32 4294901760, %v5273_v51 }
 0x4b7   : > { %v7568_v9 = vpop.f32.mrf.mxu0 }
 0x4b8   : > { %v3760_v10 = vadd.f32 %v3759_v1, %v3686_v8  ;;  %v8890_v1 = vand.u32 4294901760, %v5274_v62  ;;  %v8904_v7 = vsub.f32 %v5273_v51, %v8898_v4 }
 0x4b9   : > { %v3833_v11 = vpop.f32.mrf.mxu0 }
 0x4ba   : > { %v3834_v12 = vadd.f32 %v3833_v11, %v3760_v10  ;;  %7679 = vmatpush3.msra.mxu0 %v8890_v1  ;;  %v5414_v10 = vand.u32 4294901760, %v8904_v7 }
 0x4bb   : > { %v7578_v13 = vpop.f32.mrf.mxu0  ;;  %7680 = vmatprep.subr.mxu0 %v8175_v0 }
 0x4bc   : > { %v8855_v14 = vadd.f32 %v3905_v3, %v3834_v12  ;;  %v8896_v3 = vsub.f32 %v5274_v62, %v8890_v1  ;;  %7681 = vmatpush3.msra.mxu0 %v8898_v4 }
 0x4bd   : > { %7696 = vmatprep.subr.mxu0 %v8175_v0 }
 0x4be   : > { %v5407_v6 = vand.u32 4294901760, %v8896_v3 }
 0x4c0   : > { %v5408_v9 = vsub.f32 %v8896_v3, %v5407_v6 }
 0x4c2   : > { %v5409_v13 = vand.u32 4294901760, %v5408_v9  ;;  %v5803_v9 = vld [vmem:[#allocation7] sm:$0xff] }
 0x4c4   : > { %7690 = vmatpush3.msra.mxu1 %v5409_v13 }
 0x4c5   : > { %7691 = vmatprep.subr.mxu1 %v8175_v0 }
 0x520   : > { %v3984_v15 = vpop.f32.mrf.mxu0  ;;  %v4060_v28 = vpop.f32.mrf.mxu1 }
 0x521   : > { %v4061_v18 = vadd.f32 %v4060_v28, %v3984_v15  ;;  %v5415_v15 = vsub.f32 %v8904_v7, %v5414_v10 }
 0x522   : > { %v7588_v16 = vpop.f32.mrf.mxu0  ;;  %v7593_v17 = vpop.f32.mrf.mxu1 }
 0x523   : > { %v5416_v17 = vand.u32 4294901760, %v5415_v15 }
 0x524   : > { %v4134_v31 = vpop.f32.mrf.mxu0 }
 0x525   : > { %v4135_v33 = vadd.f32 %v4134_v31, %v4061_v18  ;;  %v4208_v19 = vpop.f32.mrf.mxu1  ;;  %7692 = vmatpush3.msra.mxu1 %v5416_v17 }
 0x526   : > { %v7598_v20 = vpop.f32.mrf.mxu0  ;;  %7707 = vmatprep.subr.mxu1 %v8175_v0 }
 0x527   : > { %v4209_v21 = vadd.f32 %v4208_v19, %v4135_v33  ;;  %v7603_v22 = vpop.f32.mrf.mxu1 }
 0x528   : > { %v4282_v23 = vpop.f32.mrf.mxu0 }
 0x529   : > { %v4283_v24 = vadd.f32 %v4282_v23, %v4209_v21  ;;  %v4354_v25 = vpop.f32.mrf.mxu1 }
 0x52a   : > { %v7608_v53 = vpop.f32.mrf.mxu0 }
 0x52b   : > { %v4355_v26 = vadd.f32 %v4354_v25, %v4283_v24  ;;  %v7613_v27 = vpop.f32.mrf.mxu1 }
 0x52c   : > { %v4433_v29 = vpop.f32.mrf.mxu0 }
 0x52d   : > { %v4509_v34 = vpop.f32.mrf.mxu1  ;;  %5257 = vrot.lane.b32.xlu0 %v4355_v26, %s8181_s26 }
 0x52e   : > { %v7618_v37 = vpop.f32.mrf.mxu0  ;;  %v4510_v38 = vadd.f32 %v4509_v34, %v4433_v29 }
 0x52f   : > { %v7623_v39 = vpop.f32.mrf.mxu1 }
 0x530   : > { %v4583_v42 = vpop.f32.mrf.mxu0 }
 0x531   : > { %v4584_v43 = vadd.f32 %v4583_v42, %v4510_v38  ;;  %v4657_v44 = vpop.f32.mrf.mxu1 }
 0x532   : > { %v7628_v47 = vpop.f32.mrf.mxu0 }
 0x533   : > { %v4658_v48 = vadd.f32 %v4657_v44, %v4584_v43  ;;  %v7633_v49 = vpop.f32.mrf.mxu1  ;;  %v7021_v44 = vld [vmem:[%s9344_s7] ss:$0 sm:$0xff] }
 0x534   : > { %v4731_v54 = vpop.f32.mrf.mxu0 }
 0x535   : > { %v4732_v55 = vadd.f32 %v4731_v54, %v4658_v48  ;;  %v4803_v56 = vpop.f32.mrf.mxu1 }
 0x536   : > { %v7638_v59 = vpop.f32.mrf.mxu0 }
 0x537   : > { %v4804_v60 = vadd.f32 %v4803_v56, %v4732_v55  ;;  %v7643_v61 = vpop.f32.mrf.mxu1  ;;  %v8013_v59 = vld [vmem:[%s521_s18] sm:$0xff] }
 0x539   : > { %5261 = vrot.lane.b32.xlu1 %v4804_v60, %s8182_s20  ;;  %s9397_s20 = sld [smem:[#allocation21_spill]] }
 0x54d   : > { %v4958_v63 = vpop.f32.mrf.mxu1 }
 0x54f   : > { %v7653_v2 = vpop.f32.mrf.mxu1 }
 0x551   : > { %v5106_v5 = vpop.f32.mrf.mxu1 }
 0x553   : > { %v7663_v8 = vpop.f32.mrf.mxu1 }
 0x555   : > { %v4882_v11 = vpop.f32.mrf.mxu0  ;;  %v5252_v12 = vpop.f32.mrf.mxu1 }
 0x556   : > { %v4959_v18 = vadd.f32 %v4958_v63, %v4882_v11 }
 0x557   : > { %v7648_v28 = vpop.f32.mrf.mxu0  ;;  %v7673_v16 = vpop.f32.mrf.mxu1 }
 0x559   : > { %v5032_v31 = vpop.f32.mrf.mxu0 }
 0x55a   : > { %v5033_v33 = vadd.f32 %v5032_v31, %v4959_v18 }
 0x55b   : > { %v7658_v19 = vpop.f32.mrf.mxu0 }
 0x55c   : > { %v5107_v20 = vadd.f32 %v5106_v5, %v5033_v33  ;;  %v5804_v5 = vld [vmem:[#allocation7 + $0x8] sm:$0xff] }
 0x55d   : > { %v5180_v21 = vpop.f32.mrf.mxu0  ;;  %v8979_v8 = vand.u32 4294901760, %v5804_v5 }
 0x55e   : > { %v5181_v22 = vadd.f32 %v5180_v21, %v5107_v20 }
 0x55f   : > { %v7668_v23 = vpop.f32.mrf.mxu0  ;;  %v8990_v13 = vsub.f32 %v5804_v5, %v8979_v8  ;;  %v6304_v5 = vld [vmem:[%s9396_s29 + $0x8] sm:$0xff] }
 0x560   : > { %v5253_v24 = vadd.f32 %v5252_v12, %v5181_v22 }
 0x561   : > { %v5937_v17 = vand.u32 4294901760, %v8990_v13 }
 0x562   : > { %5265 = vrot.lane.b32.xlu0 %v5253_v24, %s8183_s14  ;;  %s8096_s14 = scalar_lea.vmem %s6905_s21, 128 }
 0x563   : > { %v5938_v19 = vsub.f32 %v8990_v13, %v5937_v17  ;;  %p8097_p3 = scmp.ne.s32.totalorder %s6905_s21, %s8096_s14 }
 0x565   : > { %v5939_v23 = vand.u32 4294901760, %v5938_v19  ;;  %p8098_p10 = pnand %p8097_p3, %p9403_p12 }
 0x567   : > { %p8099_p2 = pneg %p8098_p10 }
 0x59f   : > { %v5258_v25 = vpop.permute.xlu0 %5257 }
 0x5a0   : > { %v5268_v26 = vsel %vm1609_vm2, %v8855_v14, %v5258_v25 }
 0x5ab   : > { %v5262_v53 = vpop.permute.xlu1 %5261 }
 0x5ac   : > { %v5270_v27 = vsel %vm5269_vm3, %v5268_v26, %v5262_v53 }
 0x5d4   : > { %v5266_v29 = vpop.permute.xlu0 %5265 }
 0x5d5   : > { %v5272_v30 = vsel %vm5271_vm4, %v5270_v27, %v5266_v29  ;;  %v7022_v29 = vld [vmem:[%s9345_s8] ss:$0 sm:$0xff] }
 0x5d6   : > { %v5285_v32 = vsel %vm602_vm1, %v5272_v30, 0 }
 0x5d7   : > { %v5356_v34 = vand.u32 4294901760, %v5285_v32 }
 0x5d9   : > { %v5357_v37 = vsub.f32 %v5285_v32, %v5356_v34  ;;  %7694 = vmatmul.mubr.f32.vlgmr.msra.gmra.mxu1 %v5356_v34  ;;  %v7023_v32 = vld [vmem:[%s9346_s9] ss:$0 sm:$0xff] }
 0x5da   : > { %7708 = vmatpush3.msra.mxu1 %v8863_v35  ;;  %7715 = vmatprep.mubr.msk.f32.mxu1 %vm8176_vm0, %v8175_v0 }
 0x5db   : > { %7709 = vmatprep.subr.mxu1 %v8175_v0  ;;  %v5358_v38 = vand.u32 4294901760, %v5357_v37 }
 0x5dc   : > { %7710 = vmatpush3.msra.mxu1 %v8865_v36 }
 0x5dd   : > { %7711 = vmatprep.subr.mxu1 %v8175_v0  ;;  %v5359_v14 = vsub.f32 %v5357_v37, %v5358_v38 }
 0x5de   : > { %7712 = vmatpush3.msra.mxu1 %v8890_v1 }
 0x5df   : > { %7713 = vmatprep.subr.mxu1 %v8175_v0  ;;  %v5360_v39 = vand.u32 4294901760, %v5359_v14 }
 0x5e0   : > { %7714 = vmatpush3.msra.mxu1 %v8898_v4 }
 0x5e1   : > { %7716 = vmatmul.mubr.f32.vlgmr.msra.gmra.mxu1 %v5358_v38  ;;  %7729 = vmatprep.subr.mxu1 %v8175_v0 }
 0x5e2   : > { %7683 = vmatmul.mubr.f32.vlgmr.msra.gmra.mxu0 %v5360_v39  ;;  %7730 = vmatpush3.msra.mxu1 %v8863_v35 }
 0x5e3   : > { %7697 = vmatpush3.msra.mxu0 %v8868_v40  ;;  %7731 = vmatprep.subr.mxu1 %v8175_v0 }
 0x5e4   : > { %7698 = vmatprep.subr.mxu0 %v8175_v0  ;;  %7732 = vmatpush3.msra.mxu1 %v8865_v36 }
 0x5e5   : > { %7699 = vmatpush3.msra.mxu0 %v8871_v41  ;;  %7733 = vmatprep.subr.mxu1 %v8175_v0 }
 0x5e6   : > { %7700 = vmatprep.subr.mxu0 %v8175_v0  ;;  %7734 = vmatpush3.msra.mxu1 %v8890_v1 }
 0x5e7   : > { %7701 = vmatpush3.msra.mxu0 %v8896_v3  ;;  %7735 = vmatprep.subr.mxu1 %v8175_v0  ;;  %v5806_v3 = vld [vmem:[#allocation7 + $0x18] sm:$0xff] }
 0x5e8   : > { %7702 = vmatprep.subr.mxu0 %v8175_v0  ;;  %7704 = vmatprep.mubr.msk.f32.mxu0 %vm8176_vm0, %v8175_v0 }
 0x5e9   : > { %7703 = vmatpush3.msra.mxu0 %v8904_v7  ;;  %7736 = vmatpush3.msra.mxu1 %v8898_v4  ;;  %v5805_v4 = vld [vmem:[#allocation7 + $0x10] sm:$0xff] }
 0x5ea   : > { %7737 = vmatprep.mubr.msk.f32.mxu1 %vm8176_vm0, %v8175_v0  ;;  %7705 = vmatmul.mubr.f32.vlgmr.msra.gmra.mxu0 %v5357_v37  ;;  %v8977_v7 = vand.u32 4294901760, %v5805_v4 }
 0x5eb   : > { %7718 = vmatprep.subr.mxu0 %v8175_v0  ;;  %7738 = vmatmul.mubr.f32.vlgmr.msra.gmra.mxu1 %v5356_v34 }
 0x5ec   : > { %7719 = vmatpush3.msra.mxu0 %v5393_v45  ;;  %7726 = vmatprep.mubr.msk.f32.mxu0 %vm8176_vm0, %v8175_v0  ;;  %v8987_v12 = vsub.f32 %v5805_v4, %v8977_v7 }
 0x5ed   : > { %7720 = vmatprep.subr.mxu0 %v8175_v0  ;;  %7751 = vmatprep.subr.mxu1 %v8175_v0 }
 0x5ee   : > { %7721 = vmatpush3.msra.mxu0 %v5400_v46  ;;  %7759 = vmatprep.mubr.msk.f32.mxu1 %vm8176_vm0, %v8175_v0  ;;  %v5930_v16 = vand.u32 4294901760, %v8987_v12 }
 0x5ef   : > { %7722 = vmatprep.subr.mxu0 %v8175_v0 }
 0x5f0   : > { %7723 = vmatpush3.msra.mxu0 %v5407_v6  ;;  %v8975_v6 = vand.u32 4294901760, %v5806_v3  ;;  %v5931_v33 = vsub.f32 %v8987_v12, %v5930_v16 }
 0x5f1   : > { %7724 = vmatprep.subr.mxu0 %v8175_v0 }
 0x5f2   : > { %7725 = vmatpush3.msra.mxu0 %v5414_v10  ;;  %v8981_v10 = vand.u32 4294901760, %v5803_v9  ;;  %v8984_v11 = vsub.f32 %v5806_v3, %v8975_v6  ;;  %v5932_v21 = vand.u32 4294901760, %v5931_v33 }
 0x5f3   : > { %7727 = vmatmul.mubr.f32.vlgmr.msra.gmra.mxu0 %v5356_v34  ;;  %7740 = vmatprep.subr.mxu0 %v8175_v0 }
 0x5f4   : > { %7748 = vmatprep.mubr.msk.f32.mxu0 %vm8176_vm0, %v8175_v0  ;;  %7741 = vmatpush3.msra.mxu0 %v8975_v6  ;;  %v8994_v15 = vsub.f32 %v5803_v9, %v8981_v10  ;;  %v5923_v28 = vand.u32 4294901760, %v8984_v11  ;;  %v9158_v9 = vand.u32 4294901760, %v6304_v5 }
 0x5f5   : > { %7742 = vmatprep.subr.mxu0 %v8175_v0 }
 0x5f6   : > { %7743 = vmatpush3.msra.mxu0 %v8977_v7  ;;  %v5944_v18 = vand.u32 4294901760, %v8994_v15  ;;  %v5924_v31 = vsub.f32 %v8984_v11, %v5923_v28 }
 0x5f7   : > { %7744 = vmatprep.subr.mxu0 %v8175_v0 }
 0x5f8   : > { %7745 = vmatpush3.msra.mxu0 %v8979_v8  ;;  %v5925_v20 = vand.u32 4294901760, %v5924_v31  ;;  %v5945_v22 = vsub.f32 %v8994_v15, %v5944_v18 }
 0x5f9   : > { %7746 = vmatprep.subr.mxu0 %v8175_v0 }
 0x5fa   : > { %7747 = vmatpush3.msra.mxu0 %v8981_v10  ;;  %7752 = vmatpush3.msra.mxu1 %v5925_v20  ;;  %v5946_v24 = vand.u32 4294901760, %v5945_v22 }
 0x5fb   : > { %7762 = vmatprep.subr.mxu0 %v8175_v0  ;;  %7753 = vmatprep.subr.mxu1 %v8175_v0 }
 0x5fc   : > { %7754 = vmatpush3.msra.mxu1 %v5932_v21 }
 0x5fd   : > { %7755 = vmatprep.subr.mxu1 %v8175_v0 }
 0x5fe   : > { %7756 = vmatpush3.msra.mxu1 %v5939_v23 }
 0x5ff   : > { %7757 = vmatprep.subr.mxu1 %v8175_v0 }
 0x600   : > { %7758 = vmatpush3.msra.mxu1 %v5946_v24 }
 0x601   : > { %7773 = vmatprep.subr.mxu1 %v8175_v0 }
 0x699   : > { %v5453_v35 = vpop.f32.mrf.mxu1 }
 0x69b   : > { %v7695_v36 = vpop.f32.mrf.mxu1 }
 0x6a1   : > { %v5610_v40 = vpop.f32.mrf.mxu1 }
 0x6a2   : > { %v5362_v41 = vpop.f32.mrf.mxu0 }
 0x6a3   : > { %v7717_v42 = vpop.f32.mrf.mxu1  ;;  %v5363_v45 = vadd.f32 %v7021_v44, %v5362_v41  ;;  %v6310_v41 = vld [vmem:[%s9396_s29 + $0x38] sm:$0xff] }
 0x6a4   : > { %v7684_v43 = vpop.f32.mrf.mxu0  ;;  %v9084_v42 = vand.u32 4294901760, %v6310_v41 }
 0x6a5   : > { %v5454_v48 = vadd.f32 %v5453_v35, %v5363_v45  ;;  %v6309_v43 = vld [vmem:[%s9396_s29 + $0x30] sm:$0xff] }
 0x6a6   : > { %v9090_v44 = vsub.f32 %v6310_v41, %v9084_v42  ;;  %v9092_v45 = vand.u32 4294901760, %v6309_v43 }
 0x6aa   : > { %v5533_v46 = vpop.f32.mrf.mxu0 }
 0x6ab   : > { %v5768_v47 = vpop.f32.mrf.mxu1  ;;  %v5534_v52 = vadd.f32 %v5533_v46, %v5454_v48  ;;  %v6308_v46 = vld [vmem:[%s9396_s29 + $0x28] sm:$0xff]  ;;  %v9101_v48 = vsub.f32 %v6309_v43, %v9092_v45 }
 0x6ac   : > { %v7706_v49 = vpop.f32.mrf.mxu0 }
 0x6ad   : > { %v7739_v50 = vpop.f32.mrf.mxu1  ;;  %v5611_v54 = vadd.f32 %v5610_v40, %v5534_v52  ;;  %v9103_v49 = vand.u32 4294901760, %v6308_v46 }
 0x6ae   : > { %v6307_v50 = vld [vmem:[%s9396_s29 + $0x20] sm:$0xff] }
 0x6b3   : > { %v5693_v55 = vpop.f32.mrf.mxu0 }
 0x6b4   : > { %v5694_v56 = vadd.f32 %v5693_v55, %v5611_v54  ;;  %v6431_v54 = vand.u32 4294901760, %v9101_v48  ;;  %v9115_v55 = vsub.f32 %v6308_v46, %v9103_v49 }
 0x6b5   : > { %v7728_v57 = vpop.f32.mrf.mxu0 }
 0x6b6   : > { %v5769_v58 = vadd.f32 %v5768_v47, %v5694_v56  ;;  %v6424_v47 = vand.u32 4294901760, %v9090_v44  ;;  %v9117_v56 = vand.u32 4294901760, %v6307_v50  ;;  %v6306_v57 = vld [vmem:[%s9396_s29 + $0x18] sm:$0xff] }
 0x6b8   : > { %v5772_v60 = vadd.f32 %v8013_v59, %v5769_v58  ;;  %v6425_v52 = vsub.f32 %v9090_v44, %v6424_v47  ;;  %v6432_v59 = vsub.f32 %v9101_v48, %v6431_v54 }
 0x6ba   : > { %v5773_v61 = vsel %vm602_vm1, %v5772_v60, 0.0  ;;  %v6426_v58 = vand.u32 4294901760, %v6425_v52 }
 0x6bb   : > { %5774 = vadd.xlane.f32.xlu1 %v5773_v61  ;;  %v9129_v61 = vsub.f32 %v6307_v50, %v9117_v56 }
 0x744   : > { %v5775_v62 = vpop.xlane.xlu1 %5774 }
 0x745   : > { %v5777_v63 = vmul.f32 0.03125, %v5775_v62  ;;  %v9132_v62 = vand.u32 4294901760, %v6306_v57 }
 0x747   : > { %v5778_v1 = vsub.f32 %v5772_v60, %v5777_v63  ;;  %v6438_v60 = vand.u32 4294901760, %v9115_v55  ;;  %v6305_v63 = vld [vmem:[%s9396_s29 + $0x10] sm:$0xff]  ;;  %v9146_v4 = vsub.f32 %v6306_v57, %v9132_v62 }
 0x748   : > { %v9142_v3 = vand.u32 4294901760, %v6305_v63 }
 0x749   : > { %v5779_v51 = vmul.f32 %v5778_v1, %v5778_v1 }
 0x74b   : > { %v5780_v2 = vsel %vm602_vm1, %v5779_v51, 0.0  ;;  %v6439_v51 = vsub.f32 %v9115_v55, %v6438_v60 }
 0x74c   : > { %5781 = vadd.xlane.f32.xlu0 %v5780_v2  ;;  %v6445_v2 = vand.u32 4294901760, %v9129_v61 }
 0x7d5   : > { %v5782_v25 = vpop.xlane.xlu0 %5781 }
 0x7d6   : > { %v5783_v53 = vmul.f32 0.03125, %v5782_v25 }
 0x7d8   : > { %v5784_v26 = vadd.f32 1e-05, %v5783_v53 }
 0x7da   : > { %8009 = vrsqrt.f32 %v5784_v26 }
 0x7e7   : > { %v8010_v27 = vpop.eup %8009 }
 0x7e8   : > { %v5786_v30 = vmul.f32 %v8010_v27, %v5778_v1  ;;  %v6433_v1 = vand.u32 4294901760, %v6432_v59 }
 0x7ea   : > { %v5794_v34 = vmul.f32 %v7022_v29, %v5786_v30 }
 0x7ec   : > { %v9029_v37 = vadd.f32 %v7023_v32, %v5794_v34  ;;  %v7024_v32 = vld [vmem:[%s9397_s20] ss:$0 sm:$0xff] }
 0x7ee   : > { %v5815_v38 = vsel %vm602_vm1, %v9029_v37, 0 }
 0x7ef   : > { %v5886_v14 = vand.u32 4294901760, %v5815_v38 }
 0x7f1   : > { %v5887_v39 = vsub.f32 %v5815_v38, %v5886_v14  ;;  %7760 = vmatmul.mubr.f32.vlgmr.msra.gmra.mxu1 %v5886_v14 }
 0x7f2   : > { %7774 = vmatpush3.msra.mxu1 %v8975_v6  ;;  %7781 = vmatprep.mubr.msk.f32.mxu1 %vm8176_vm0, %v8175_v0 }
 0x7f3   : > { %7775 = vmatprep.subr.mxu1 %v8175_v0  ;;  %v5888_v35 = vand.u32 4294901760, %v5887_v39 }
 0x7f4   : > { %7776 = vmatpush3.msra.mxu1 %v8977_v7 }
 0x7f5   : > { %7777 = vmatprep.subr.mxu1 %v8175_v0  ;;  %v5889_v36 = vsub.f32 %v5887_v39, %v5888_v35 }
 0x7f6   : > { %7778 = vmatpush3.msra.mxu1 %v8979_v8 }
 0x7f7   : > { %7779 = vmatprep.subr.mxu1 %v8175_v0  ;;  %v5890_v40 = vand.u32 4294901760, %v5889_v36 }
 0x7f8   : > { %7780 = vmatpush3.msra.mxu1 %v8981_v10 }
 0x7f9   : > { %7782 = vmatmul.mubr.f32.vlgmr.msra.gmra.mxu1 %v5888_v35  ;;  %7795 = vmatprep.subr.mxu1 %v8175_v0 }
 0x7fa   : > { %7749 = vmatmul.mubr.f32.vlgmr.msra.gmra.mxu0 %v5890_v40  ;;  %7796 = vmatpush3.msra.mxu1 %v8975_v6  ;;  %v6440_v6 = vand.u32 4294901760, %v6439_v51 }
 0x7fb   : > { %7763 = vmatpush3.msra.mxu0 %v8984_v11  ;;  %7797 = vmatprep.subr.mxu1 %v8175_v0  ;;  %v6303_v11 = vld [vmem:[%s9396_s29] sm:$0xff] }
 0x7fc   : > { %7764 = vmatprep.subr.mxu0 %v8175_v0  ;;  %7798 = vmatpush3.msra.mxu1 %v8977_v7  ;;  %v6446_v7 = vsub.f32 %v9129_v61, %v6445_v2 }
 0x7fd   : > { %7765 = vmatpush3.msra.mxu0 %v8987_v12  ;;  %7799 = vmatprep.subr.mxu1 %v8175_v0 }
 0x7fe   : > { %7766 = vmatprep.subr.mxu0 %v8175_v0  ;;  %7800 = vmatpush3.msra.mxu1 %v8979_v8  ;;  %v9156_v8 = vsub.f32 %v6305_v63, %v9142_v3  ;;  %v6447_v12 = vand.u32 4294901760, %v6446_v7 }
 0x7ff   : > { %7767 = vmatpush3.msra.mxu0 %v8990_v13  ;;  %7801 = vmatprep.subr.mxu1 %v8175_v0 }
 0x800   : > { %7768 = vmatprep.subr.mxu0 %v8175_v0  ;;  %7770 = vmatprep.mubr.msk.f32.mxu0 %vm8176_vm0, %v8175_v0  ;;  %v6459_v13 = vand.u32 4294901760, %v9156_v8 }
 0x801   : > { %7769 = vmatpush3.msra.mxu0 %v8994_v15  ;;  %7802 = vmatpush3.msra.mxu1 %v8981_v10  ;;  %v6452_v10 = vand.u32 4294901760, %v9146_v4  ;;  %v9169_v15 = vsub.f32 %v6304_v5, %v9158_v9 }
 0x802   : > { %7803 = vmatprep.mubr.msk.f32.mxu1 %vm8176_vm0, %v8175_v0  ;;  %7771 = vmatmul.mubr.f32.vlgmr.msra.gmra.mxu0 %v5887_v39 }
 0x803   : > { %7784 = vmatprep.subr.mxu0 %v8175_v0  ;;  %7804 = vmatmul.mubr.f32.vlgmr.msra.gmra.mxu1 %v5886_v14 }
 0x804   : > { %7785 = vmatpush3.msra.mxu0 %v5923_v28  ;;  %7792 = vmatprep.mubr.msk.f32.mxu0 %vm8176_vm0, %v8175_v0  ;;  %v9171_v28 = vand.u32 4294901760, %v6303_v11 }
 0x805   : > { %7786 = vmatprep.subr.mxu0 %v8175_v0  ;;  %7825 = vmatprep.subr.mxu1 %v8175_v0 }
 0x806   : > { %7787 = vmatpush3.msra.mxu0 %v5930_v16  ;;  %7841 = vmatprep.mubr.msk.f32.mxu1 %vm8176_vm0, %v8175_v0  ;;  %v6453_v16 = vsub.f32 %v9146_v4, %v6452_v10  ;;  %v9184_v31 = vsub.f32 %v6303_v11, %v9171_v28 }
 0x807   : > { %7788 = vmatprep.subr.mxu0 %v8175_v0  ;;  %7826 = vmatpush3.msra.mxu1 %v6426_v58 }
 0x808   : > { %7789 = vmatpush3.msra.mxu0 %v5937_v17  ;;  %7827 = vmatprep.subr.mxu1 %v8175_v0  ;;  %v6460_v17 = vsub.f32 %v9156_v8, %v6459_v13  ;;  %v6454_v33 = vand.u32 4294901760, %v6453_v16  ;;  %v6473_v21 = vand.u32 4294901760, %v9184_v31 }
 0x809   : > { %7790 = vmatprep.subr.mxu0 %v8175_v0  ;;  %7828 = vmatpush3.msra.mxu1 %v6433_v1 }
 0x80a   : > { %7791 = vmatpush3.msra.mxu0 %v5944_v18  ;;  %7829 = vmatprep.subr.mxu1 %v8175_v0  ;;  %v6466_v18 = vand.u32 4294901760, %v9169_v15  ;;  %v6461_v19 = vand.u32 4294901760, %v6460_v17  ;;  %v6474_v23 = vsub.f32 %v9184_v31, %v6473_v21 }
 0x80b   : > { %7793 = vmatmul.mubr.f32.vlgmr.msra.gmra.mxu0 %v5886_v14  ;;  %7806 = vmatprep.subr.mxu0 %v8175_v0 }
 0x80c   : > { %7822 = vmatprep.mubr.msk.f32.mxu0 %vm8176_vm0, %v8175_v0  ;;  %7807 = vmatpush3.msra.mxu0 %v9084_v42  ;;  %v6467_v20 = vsub.f32 %v9169_v15, %v6466_v18  ;;  %v6475_v24 = vand.u32 4294901760, %v6474_v23 }
 0x80d   : > { %7808 = vmatprep.subr.mxu0 %v8175_v0  ;;  %7830 = vmatpush3.msra.mxu1 %v6440_v6 }
 0x80e   : > { %7809 = vmatpush3.msra.mxu0 %v9092_v45  ;;  %7831 = vmatprep.subr.mxu1 %v8175_v0  ;;  %v6468_v22 = vand.u32 4294901760, %v6467_v20 }
 0x80f   : > { %7810 = vmatprep.subr.mxu0 %v8175_v0  ;;  %7832 = vmatpush3.msra.mxu1 %v6447_v12 }
 0x810   : > { %7811 = vmatpush3.msra.mxu0 %v9103_v49  ;;  %7833 = vmatprep.subr.mxu1 %v8175_v0 }
 0x811   : > { %7812 = vmatprep.subr.mxu0 %v8175_v0  ;;  %7834 = vmatpush3.msra.mxu1 %v6454_v33 }
 0x812   : > { %7813 = vmatpush3.msra.mxu0 %v9117_v56  ;;  %7835 = vmatprep.subr.mxu1 %v8175_v0 }
 0x813   : > { %7814 = vmatprep.subr.mxu0 %v8175_v0  ;;  %7836 = vmatpush3.msra.mxu1 %v6461_v19  ;;  %v7027_v19 = vld [vmem:[%s9401_s0] ss:$0 sm:$0xff] }
 0x814   : > { %7815 = vmatpush3.msra.mxu0 %v9132_v62  ;;  %7837 = vmatprep.subr.mxu1 %v8175_v0 }
 0x815   : > { %7816 = vmatprep.subr.mxu0 %v8175_v0  ;;  %7838 = vmatpush3.msra.mxu1 %v6468_v22 }
 0x816   : > { %7817 = vmatpush3.msra.mxu0 %v9142_v3  ;;  %7839 = vmatprep.subr.mxu1 %v8175_v0 }
 0x817   : > { %7818 = vmatprep.subr.mxu0 %v8175_v0  ;;  %7840 = vmatpush3.msra.mxu1 %v6475_v24 }
 0x818   : > { %7819 = vmatpush3.msra.mxu0 %v9158_v9  ;;  %7863 = vmatprep.subr.mxu1 %v8175_v0 }
 0x819   : > { %7820 = vmatprep.subr.mxu0 %v8175_v0 }
 0x81a   : > { %7821 = vmatpush3.msra.mxu0 %v9171_v28 }
 0x81b   : > { %7844 = vmatprep.subr.mxu0 %v8175_v0 }
 0x8b1   : > { %v5983_v25 = vpop.f32.mrf.mxu1 }
 0x8b3   : > { %v7761_v53 = vpop.f32.mrf.mxu1 }
 0x8b9   : > { %v6140_v26 = vpop.f32.mrf.mxu1 }
 0x8ba   : > { %v5892_v27 = vpop.f32.mrf.mxu0 }
 0x8bb   : > { %v7783_v29 = vpop.f32.mrf.mxu1  ;;  %v5893_v34 = vadd.f32 %v7024_v32, %v5892_v27 }
 0x8bc   : > { %v7750_v30 = vpop.f32.mrf.mxu0 }
 0x8bd   : > { %v5984_v39 = vadd.f32 %v5983_v25, %v5893_v34 }
 0x8c2   : > { %v6063_v38 = vpop.f32.mrf.mxu0 }
 0x8c3   : > { %v6298_v14 = vpop.f32.mrf.mxu1  ;;  %v6064_v40 = vadd.f32 %v6063_v38, %v5984_v39 }
 0x8c4   : > { %v7772_v35 = vpop.f32.mrf.mxu0 }
 0x8c5   : > { %v7805_v36 = vpop.f32.mrf.mxu1  ;;  %v6141_v41 = vadd.f32 %v6140_v26, %v6064_v40 }
 0x8cb   : > { %v6223_v43 = vpop.f32.mrf.mxu0 }
 0x8cc   : > { %v6224_v46 = vadd.f32 %v6223_v43, %v6141_v41 }
 0x8cd   : > { %v7794_v50 = vpop.f32.mrf.mxu0 }
 0x8ce   : > { %v6299_v52 = vadd.f32 %v6298_v14, %v6224_v46 }
 0x8d0   : > { %v6302_v57 = vmax.f32 %v6299_v52, 0.0 }
 0x8d2   : > { %v6320_v58 = vsel %vm6318_vm5, %v6302_v57, 0 }
 0x8d3   : > { %v9204_v59 = vand.u32 4294901760, %v6320_v58 }
 0x8d5   : > { %v6396_v63 = vsub.f32 %v6320_v58, %v9204_v59  ;;  %7842 = vmatmul.mubr.f32.vlgmr.msra.gmra.mxu1 %v9204_v59 }
 0x8d6   : > { %7864 = vmatpush3.msra.mxu1 %v9084_v42  ;;  %7879 = vmatprep.mubr.msk.f32.mxu1 %vm8176_vm0, %v8175_v0 }
 0x8d7   : > { %7865 = vmatprep.subr.mxu1 %v8175_v0  ;;  %v6397_v1 = vand.u32 4294901760, %v6396_v63 }
 0x8d8   : > { %7866 = vmatpush3.msra.mxu1 %v9092_v45 }
 0x8d9   : > { %7867 = vmatprep.subr.mxu1 %v8175_v0  ;;  %v6398_v51 = vsub.f32 %v6396_v63, %v6397_v1 }
 0x8da   : > { %7868 = vmatpush3.msra.mxu1 %v9103_v49 }
 0x8db   : > { %7869 = vmatprep.subr.mxu1 %v8175_v0  ;;  %v6399_v5 = vand.u32 4294901760, %v6398_v51 }
 0x8dc   : > { %7870 = vmatpush3.msra.mxu1 %v9117_v56 }
 0x8dd   : > { %7871 = vmatprep.subr.mxu1 %v8175_v0  ;;  %7823 = vmatmul.mubr.f32.vlgmr.msra.gmra.mxu0 %v6399_v5 }
 0x8de   : > { %7845 = vmatpush3.msra.mxu0 %v9090_v44  ;;  %7872 = vmatpush3.msra.mxu1 %v9132_v62 }
 0x8df   : > { %7846 = vmatprep.subr.mxu0 %v8175_v0  ;;  %7873 = vmatprep.subr.mxu1 %v8175_v0 }
 0x8e0   : > { %7847 = vmatpush3.msra.mxu0 %v9101_v48  ;;  %7874 = vmatpush3.msra.mxu1 %v9142_v3 }
 0x8e1   : > { %7848 = vmatprep.subr.mxu0 %v8175_v0  ;;  %7875 = vmatprep.subr.mxu1 %v8175_v0 }
 0x8e2   : > { %7849 = vmatpush3.msra.mxu0 %v9115_v55  ;;  %7876 = vmatpush3.msra.mxu1 %v9158_v9 }
 0x8e3   : > { %7850 = vmatprep.subr.mxu0 %v8175_v0  ;;  %7877 = vmatprep.subr.mxu1 %v8175_v0 }
 0x8e4   : > { %7851 = vmatpush3.msra.mxu0 %v9129_v61  ;;  %7878 = vmatpush3.msra.mxu1 %v9171_v28 }
 0x8e5   : > { %7852 = vmatprep.subr.mxu0 %v8175_v0  ;;  %7880 = vmatmul.mubr.f32.vlgmr.msra.gmra.mxu1 %v6397_v1 }
 0x8e6   : > { %7901 = vmatprep.subr.mxu1 %v8175_v0  ;;  %7853 = vmatpush3.msra.mxu0 %v9146_v4 }
 0x8e7   : > { %7902 = vmatpush3.msra.mxu1 %v9084_v42  ;;  %7854 = vmatprep.subr.mxu0 %v8175_v0 }
 0x8e8   : > { %7903 = vmatprep.subr.mxu1 %v8175_v0  ;;  %7855 = vmatpush3.msra.mxu0 %v9156_v8 }
 0x8e9   : > { %7904 = vmatpush3.msra.mxu1 %v9092_v45  ;;  %7856 = vmatprep.subr.mxu0 %v8175_v0 }
 0x8ea   : > { %7905 = vmatprep.subr.mxu1 %v8175_v0  ;;  %7857 = vmatpush3.msra.mxu0 %v9169_v15 }
 0x8eb   : > { %7906 = vmatpush3.msra.mxu1 %v9103_v49  ;;  %7858 = vmatprep.subr.mxu0 %v8175_v0 }
 0x8ec   : > { %7907 = vmatprep.subr.mxu1 %v8175_v0  ;;  %7859 = vmatpush3.msra.mxu0 %v9184_v31 }
 0x8ed   : > { %7860 = vmatprep.mubr.msk.f32.mxu0 %vm8176_vm0, %v8175_v0  ;;  %7908 = vmatpush3.msra.mxu1 %v9117_v56  ;;  %v7025_v56 = vld [vmem:[%s9398_s17] ss:$0 sm:$0xff]  ;;  %s6891_s17 = scalar_lea.sflag [#allocation4], %s8411_s12 }
 0x8ee   : > { %7861 = vmatmul.mubr.f32.vlgmr.msra.gmra.mxu0 %v6396_v63  ;;  %7882 = vmatprep.subr.mxu0 %v8175_v0 }
 0x8ef   : > { %7909 = vmatprep.subr.mxu1 %v8175_v0  ;;  %7883 = vmatpush3.msra.mxu0 %v6424_v47 }
 0x8f0   : > { %7910 = vmatpush3.msra.mxu1 %v9132_v62  ;;  %7884 = vmatprep.subr.mxu0 %v8175_v0 }
 0x8f1   : > { %7911 = vmatprep.subr.mxu1 %v8175_v0  ;;  %7885 = vmatpush3.msra.mxu0 %v6431_v54 }
 0x8f2   : > { %7912 = vmatpush3.msra.mxu1 %v9142_v3  ;;  %7886 = vmatprep.subr.mxu0 %v8175_v0 }
 0x8f3   : > { %7913 = vmatprep.subr.mxu1 %v8175_v0  ;;  %7887 = vmatpush3.msra.mxu0 %v6438_v60 }
 0x8f4   : > { %7914 = vmatpush3.msra.mxu1 %v9158_v9  ;;  %7888 = vmatprep.subr.mxu0 %v8175_v0 }
 0x8f5   : > { %7915 = vmatprep.subr.mxu1 %v8175_v0  ;;  %7889 = vmatpush3.msra.mxu0 %v6445_v2 }
 0x8f6   : > { %7916 = vmatpush3.msra.mxu1 %v9171_v28  ;;  %7917 = vmatprep.mubr.msk.f32.mxu1 %vm8176_vm0, %v8175_v0 }
 0x8f7   : > { %7890 = vmatprep.subr.mxu0 %v8175_v0  ;;  %7918 = vmatmul.mubr.f32.vlgmr.msra.gmra.mxu1 %v9204_v59 }
 0x8f8   : > { %7891 = vmatpush3.msra.mxu0 %v6452_v10  ;;  %7898 = vmatprep.mubr.msk.f32.mxu0 %vm8176_vm0, %v8175_v0 }
 0x8f9   : > { %7892 = vmatprep.subr.mxu0 %v8175_v0 }
 0x8fa   : > { %7893 = vmatpush3.msra.mxu0 %v6459_v13 }
 0x8fb   : > { %7894 = vmatprep.subr.mxu0 %v8175_v0 }
 0x8fc   : > { %7895 = vmatpush3.msra.mxu0 %v6466_v18 }
 0x8fd   : > { %7896 = vmatprep.subr.mxu0 %v8175_v0 }
 0x8fe   : > { %7897 = vmatpush3.msra.mxu0 %v6473_v21 }
 0x8ff   : > { %7899 = vmatmul.mubr.f32.vlgmr.msra.gmra.mxu0 %v9204_v59 }
 0x995   : > { %v6512_v42 = vpop.f32.mrf.mxu1 }
 0x997   : > { %v7843_v44 = vpop.f32.mrf.mxu1 }
 0x99d   : > { %v6401_v45 = vpop.f32.mrf.mxu0 }
 0x99e   : > { %v6402_v60 = vadd.f32 %v7025_v56, %v6401_v45 }
 0x99f   : > { %v7824_v47 = vpop.f32.mrf.mxu0 }
 0x9a0   : > { %v6513_v0 = vadd.f32 %v6512_v42, %v6402_v60 }
 0x9a5   : > { %v6681_v48 = vpop.f32.mrf.mxu1 }
 0x9a7   : > { %v7881_v49 = vpop.f32.mrf.mxu1 }
 0x9ae   : > { %v6600_v54 = vpop.f32.mrf.mxu0 }
 0x9af   : > { %v6601_v2 = vadd.f32 %v6600_v54, %v6513_v0 }
 0x9b0   : > { %v7862_v55 = vpop.f32.mrf.mxu0 }
 0x9b1   : > { %v6682_v3 = vadd.f32 %v6681_v48, %v6601_v2 }
 0x9b7   : > { %v6855_v61 = vpop.f32.mrf.mxu1 }
 0x9b9   : > { %v7919_v62 = vpop.f32.mrf.mxu1 }
 0x9bf   : > { %v6776_v4 = vpop.f32.mrf.mxu0 }
 0x9c0   : > { %v6777_v6 = vadd.f32 %v6776_v4, %v6682_v3 }
 0x9c1   : > { %v7900_v7 = vpop.f32.mrf.mxu0 }
 0x9c2   : > { %v6856_v8 = vadd.f32 %v6855_v61, %v6777_v6 }
 0x9c4   : > { %v6859_v9 = vadd.f32 %v6856_v8, %v9029_v37  ;;  %v7026_v37 = vld [vmem:[%s9400_s30] ss:$0 sm:$0xff]  ;;  %s8100_s30 = sshll.u32 %s8184_s15, 4  ;;  %s8101_s30 = int_to_ptr.vmem [resolvable:$false] %s8100_s30 }
 0x9c5   : > { %s8102_s25 = scalar_lea.vmem %s8101_s30, 256  ;;  %p8103_p13 = scmp.lt.s32.totalorder %s6905_s21, %s8101_s30 }
 0x9c6   : > { %v6860_v10 = vsel %vm602_vm1, %v6859_v9, 0.0  ;;  %p8104_p0 = scmp.lt.s32.totalorder %s8102_s25, %s8096_s14 }
 0x9c7   : > { %6861 = vadd.xlane.f32.xlu0 %v6860_v10 }
 0x9c8   : > { %p8105_p5 = por %p8104_p0, %p8103_p13 }
 0x9ca   : > { %p8106_p9 = pnand %p8105_p5, %p8099_p2 }
 0xa50   : > { %v6862_v11 = vpop.xlane.xlu0 %6861 }
 0xa51   : > { %v6863_v12 = vmul.f32 0.03125, %v6862_v11 }
 0xa53   : > { %v6864_v13 = vsub.f32 %v6859_v9, %v6863_v12 }
 0xa55   : > { %v6865_v15 = vmul.f32 %v6864_v13, %v6864_v13 }
 0xa57   : > { %v6866_v28 = vsel %vm602_vm1, %v6865_v15, 0.0 }
 0xa58   : > { %6867 = vadd.xlane.f32.xlu1 %v6866_v28 }
 0xae1   : > { %v6868_v16 = vpop.xlane.xlu1 %6867 }
 0xae2   : > { %v6869_v17 = vmul.f32 0.03125, %v6868_v16 }
 0xae4   : > { %v6870_v18 = vadd.f32 1e-05, %v6869_v17 }
 0xae6   : > { %8011 = vrsqrt.f32 %v6870_v18 }
 0xaf3   : > { %v8012_v31 = vpop.eup %8011 }
 0xaf4   : > { %v6872_v33 = vmul.f32 %v8012_v31, %v6864_v13 }
 0xaf6   : > { %v6880_v20 = vmul.f32 %v7026_v37, %v6872_v33 }
 0xaf8   : > { %v6888_v21 = vadd.f32 %v7027_v19, %v6880_v20 }
 0xafa   : > { %6889 = vst.msk [vmem:[%s587_s11] sm:$0xff] %vm602_vm1, %v6888_v21 }
 0xafb   : > { %8109 = shalt.err (!%p8106_p9)
}
 0xafc   : > { %s8110_s16 = scalar_lea.hbm %s6902_s23, 128  ;;  %s8114_s13 = scalar_lea.hbm %s9402_s27, 256 }
 0xafd   : > { %p8111_p1 = scmp.ne.s32.totalorder %s6902_s23, %s8110_s16  ;;  %p8115_p7 = scmp.lt.s32.totalorder %s6902_s23, %s9402_s27 }
 0xafe   : > { %p8116_p11 = scmp.lt.s32.totalorder %s8114_s13, %s8110_s16 }
 0xaff   : > { %p8112_p4 = pnand %p8111_p1, %p9403_p12 }
 0xb00   : > { %p8117_p8 = por %p8116_p11, %p8115_p7 }
 0xb01   : > { %p8113_p6 = pneg %p8112_p4 }
 0xb03   : > { %p8118_p3 = pnand %p8117_p8, %p8113_p6 }
 0xb05   : > { %8121 = shalt.err (!%p8118_p3)
}
 0xb06   : > { %7928 = dma.vmem_to_hbm [thread:$0]  (%p9403_p12), %s6905_s21, 128, %s6902_s23, %s6891_s17  }
 0xb07 PF: > { %s9404_s11 = sld [smem:[#allocation13_spill]]  ;;  %p9407_p2 = scmp.ge.s32.totalorder %s8168_s24, 2 }
 0xb08   : > { %s9405_s26 = sld [smem:[#allocation15_spill]] }
 0xb0d   : > { %s6916_s20 = sand.u32 1, %s9404_s11  }
 0xb0e   : > { %p9406_p10 = scmp.ne.s32.totalorder %s9405_s26, 0  ;;  %s6917_s14 = scalar_lea.sflag [#allocation4], %s6916_s20 }
 0xb10   : > { %p7942_p13 = pnand %p9407_p2, %p9406_p10 }
 0xb12   : > { %p7943_p0 = pneg %p7942_p13 }
 0xb14   : > { %8151 = dma.done.wait (%p7943_p0), %s6917_s14, 128  }
 0xb15   : > { %8153 = vsyncadd (%p7943_p0), %s6917_s14, 4294967168  ;;  %s9408_s24 = sld [smem:[#allocation16_spill]]  ;;  %s9411_s21 = smov %s8160_s22 }
 0xb16   : > { %s9409_s15 = sld [smem:[#allocation14_spill]] }
 0xb17   : > { %s9410_s23 = sld [smem:[#allocation17_spill]] }
 0xb1b   : > { %p32_p5 = scmp.ge.s32.totalorder %s9408_s24, 4  }
 0xb1c   : > { %s9412_s22 = smov %s9409_s15 }
 0xb1d   :  { %34 = sbr.rel (!%p32_p5) target bundleno = 16 (0x10), region = 146 }
 0xb22   :  { %6922 = vsyncpa [#allocation3], 1 }
 0xb23   :  { %6924 = vsyncpa [#allocation3 + $0x1], 1 }
 0xb24   :  { %6925 = vsyncpa [#allocation6], 1 }
 0xb25   :  { %6927 = vsyncpa [#allocation6 + $0x1], 1 }
 0xb26   :  { %6928 = vsyncpa [#allocation4], 1 }
 0xb27   :  { %6930 = vsyncpa [#allocation4 + $0x1], 1 }

// kernel: tpu_custom_call.1
= control target key start
LH: loop header
LB: loop body
LE: loop exit
PB: predicated region body
PF: predicated region fallthrough
CT: control target
= control target key end

     0   :  { %s9337_s0 = inlined_call_operand.hbm [shape: f32[16,32], index: 0, kind: input, shape index: {}]   ;;  %s9338_s1 = inlined_call_operand.hbm [shape: f32[16,32], index: 1, kind: input, shape index: {}]   ;;  %s9339_s2 = inlined_call_operand.vmem [shape: f32[32,64], index: 2, kind: input, shape index: {}]   ;;  %s9340_s3 = inlined_call_operand.vmem [shape: f32[1,64], index: 3, kind: input, shape index: {}]   ;;  %s9341_s4 = inlined_call_operand.vmem [shape: f32[32,32], index: 4, kind: input, shape index: {}]   ;;  %s9342_s5 = inlined_call_operand.vmem [shape: f32[1,32], index: 5, kind: input, shape index: {}]   ;;  %s9343_s6 = inlined_call_operand.vmem [shape: f32[32,32], index: 6, kind: input, shape index: {}]   ;;  %s9344_s7 = inlined_call_operand.vmem [shape: f32[1,32], index: 7, kind: input, shape index: {}]   ;;  %s9345_s8 = inlined_call_operand.vmem [shape: f32[1,32], index: 8, kind: input, shape index: {}]   ;;  %s9346_s9 = inlined_call_operand.vmem [shape: f32[1,32], index: 9, kind: input, shape index: {}]   ;;  %s9347_s10 = inlined_call_operand.hbm [shape: f32[32,64], index: 10, kind: input, shape index: {}]   ;;  %s9348_s11 = inlined_call_operand.vmem [shape: f32[1,64], index: 11, kind: input, shape index: {}]   ;;  %s9349_s12 = inlined_call_operand.vmem [shape: f32[64,32], index: 12, kind: input, shape index: {}]   ;;  %s9350_s13 = inlined_call_operand.vmem [shape: f32[1,32], index: 13, kind: input, shape index: {}]   ;;  %s9351_s14 = inlined_call_operand.vmem [shape: f32[1,32], index: 14, kind: input, shape index: {}]   ;;  %s9352_s15 = inlined_call_operand.vmem [shape: f32[1,32], index: 15, kind: input, shape index: {}]   ;;  %s9353_s16 = inlined_call_operand.hbm [shape: f32[16,32], index: 16, kind: output, shape index: {}]  }
   0x1   :  { %9368 = sst [smem:[#allocation19_spill]] %s9337_s0 }
   0x2   :  { %9369 = sst [smem:[#allocation20_spill]] %s9347_s10 }
   0x3   :  { %9370 = sst [smem:[#allocation21_spill]] %s9348_s11 }
   0x4   :  { %9371 = sst [smem:[#allocation22_spill]] %s9349_s12 }
   0x5   :  { %9372 = sst [smem:[#allocation23_spill]] %s9350_s13 }
   0x6   :  { %9373 = sst [smem:[#allocation24_spill]] %s9351_s14 }
   0x7   :  { %9374 = sst [smem:[#allocation25_spill]] %s9352_s15 }
   0x8   :  { %9375 = sst [smem:[#allocation26_spill]] %s9353_s16 }
   0x9   :  { %21 = vsyncpa [#allocation3], 0 }
   0xa   :  { %23 = vsyncpa [#allocation3 + $0x1], 0 }
   0xb   :  { %24 = vsyncpa [#allocation6], 0 }
   0xc   :  { %26 = vsyncpa [#allocation6 + $0x1], 0 }
   0xd   :  { %27 = vsyncpa [#allocation4], 0 }
   0xe   :  { %29 = vsyncpa [#allocation4 + $0x1], 0  ;;  %s8270_s21 = smov 0   ;;  %s8272_s22 = smov 0  }
   0xf   :  { %s8274_s23 = smov 0   ;;  %s8276_s24 = smov 0  }
  0x10 LB: > { %9376 = sst [smem:[#allocation13_spill]] %s8156_s21  ;;  %s8291_s25 = sadd.s32 4294967295, %s8168_s24   ;;  %s8168_s24 = sphi %s8276_s24, %s9408_s24   ;;  %s8164_s23 = sphi %s8274_s23, %s9410_s23   ;;  %s8160_s22 = sphi %s8272_s22, %s9412_s22   ;;  %s8156_s21 = sphi %s8270_s21, %s9411_s21  }
  0x11   : > { %9377 = sst [smem:[#allocation14_spill]] %s8164_s23  ;;  %s7006_s26 = sadd.s32 4294967294, %s8168_s24  }
  0x12   : > { %p55_p0 = scmp.ne.s32.totalorder %s8160_s22, %s8156_s21  ;;  %p9364_p1 = scmp.eq.s32.totalorder %s8291_s25, 0 }
  0x13   : > { %p405_p3 = scmp.eq.s32.totalorder %s7006_s26, 1  ;;  %p7007_p5 = scmp.ge.s32.totalorder %s8168_s24, 1 }
  0x14   : > { %p8300_p4 = por %p9364_p1, %p55_p0  ;;  %p412_p7 = scmp.lt.s32.totalorder %s8168_s24, 3 }
  0x15   : > { %p8305_p6 = por %p405_p3, %p55_p0  ;;  %s8170_s30 = smov [#allocation7]  }
  0x16   : > { %s9378_s27 = scalar_select %p8300_p4, 1, 0 }
  0x17   : > { %s9379_s28 = scalar_select %p8305_p6, 1, 0 }
  0x18   : > { %p8310_p8 = pnand %p7007_p5, %p412_p7  ;;  %s448_s0 = sshll.u32 %s8170_s30, 4  ;;  %s449_s0 = int_to_ptr.vmem [resolvable:$true] %s448_s0 }
  0x19   : > { %9380 = sst [smem:[#allocation15_spill]] %s9379_s28  ;;  %s8324_s18 = sadd.s32 1, %s8168_s24  }
  0x1a   : > { %s9381_s29 = scalar_select %p8310_p8, 1, 0 }
  0x1b   : > { %p7930_p9 = pneg %p8310_p8  ;;  %9383 = sst [smem:[#allocation16_spill]] %s8324_s18 }
  0x1c   : > { %s42_s19 = sadd.s32 1, %s8164_s23  ;;  %s39_s20 = ssub.s32 %s8168_s24, %s8324_s18 }
  0x1d   : > { %p8319_p11 = pnand %p7930_p9, %p9364_p1  ;;  %s8025_s26 = scalar_lea.vmem %s449_s0, 512 }
  0x1e   : > { %p8026_p13 = scmp.ne.s32.totalorder %s449_s0, %s8025_s26  ;;  %p8033_p5 = scmp.lt.s32.totalorder %s449_s0, %s449_s0 }
  0x1f   : > { %p8016_p12 = pneg %p8319_p11  ;;  %p8034_p7 = scmp.lt.s32.totalorder %s8025_s26, %s8025_s26 }
  0x21   : > { %p8028_p0 = pnand %p8026_p13, %p8016_p12  ;;  %p8035_p10 = por %p8034_p7, %p8033_p5 }
  0x23   : > { %p8029_p3 = pneg %p8028_p0 }
  0x25   : > { %p8036_p2 = pnand %p8035_p10, %p8029_p3 }
  0x27   : > { %8039 = shalt.err (!%p8036_p2)
}
  0x28   : > { %s8171_s30 = smov 128   ;;  %s8172_s18 = smov 8  }
  0x29   : > { %s9384_s10 = sld [smem:[#allocation20_spill]]  ;;  %p40_p9 = scmp.eq.s32.totalorder %s39_s20, 0 }
  0x2a   : > { %p49_p12 = scmp.ne.s32.totalorder %s8164_s23, %s8160_s22  ;;  %p50_p10 = scmp.eq.s32.totalorder %s8168_s24, 0 }
  0x2b   : > { %p7946_p2 = scmp.lt.s32.totalorder %s8168_s24, 2  ;;  %p9386_p0 = scmp.eq.s32.totalorder %s8291_s25, 1 }
  0x2c   : > { %s8341_s26 = scalar_select %p40_p9, %s8164_s23, %s42_s19  }
  0x2d   : > { %p51_p13 = por %p50_p10, %p49_p12  ;;  %p8345_p3 = por %p9386_p0, %p49_p12 }
  0x2e   : > { %9385 = sst [smem:[#allocation17_spill]] %s8341_s26  ;;  %s477_s15 = sand.u32 1, %s8164_s23  }
  0x2f   : > { %7933 = dma.hbm_to_vmem [thread:$0]  (!%p8319_p11), %s9384_s10, 512, %s449_s0, [#allocation6], %s8171_s30, %s8171_s30, %s8172_s18  }
  0x30   : > { %s9387_s16 = scalar_select %p8345_p3, 1, 0 }
  0x31   : > { %s7011_s14 = sshll.u32 %s8168_s24, 7  ;;  %s8351_s13 = sshll.u32 %s477_s15, 3 }
  0x32   : > { %9388 = sst [smem:[#allocation18_spill]] %s9387_s16  ;;  %s481_s18 = scalar_lea.vmem [#allocation2], %s8351_s13 }
  0x33   : > { %s9389_s21 = sld [smem:[#allocation19_spill]]  ;;  %s488_s19 = sshll.u32 %s481_s18, 4  ;;  %s489_s19 = int_to_ptr.vmem [resolvable:$true] %s488_s19 }
  0x34   : > { %p8359_p11 = pnand %p7946_p2, %p51_p13  ;;  %s8366_s26 = scalar_lea.hbm %s9338_s1, %s7011_s14 }
  0x35   : > { %s478_s11 = scalar_lea.sflag [#allocation3], %s477_s15 }
  0x36   : > { %p8042_p7 = pneg %p8359_p11 }
  0x39   : > { %s9390_s28 = smov %s9389_s21  ;;  %s8356_s0 = scalar_lea.hbm %s9389_s21, %s7011_s14 }
  0x3a   : > { %s8040_s17 = scalar_lea.hbm %s8356_s0, 128  ;;  %s8045_s23 = scalar_lea.hbm %s9390_s28, 256 }
  0x3b   : > { %p8041_p5 = scmp.ne.s32.totalorder %s8356_s0, %s8040_s17  ;;  %p8046_p10 = scmp.lt.s32.totalorder %s8356_s0, %s9390_s28 }
  0x3c   : > { %p8047_p2 = scmp.lt.s32.totalorder %s8045_s23, %s8040_s17 }
  0x3d   : > { %p8043_p9 = pnand %p8042_p7, %p8041_p5 }
  0x3e   : > { %p8048_p13 = por %p8047_p2, %p8046_p10 }
  0x3f   : > { %p8044_p12 = pneg %p8043_p9 }
  0x41   : > { %p8049_p0 = pnand %p8048_p13, %p8044_p12 }
  0x43   : > { %8052 = shalt.err (!%p8049_p0)
}
  0x44   : > { %s8053_s10 = scalar_lea.vmem %s489_s19, 128  ;;  %s8173_s14 = smov [#allocation2]  }
  0x45   : > { %p8054_p1 = scmp.ne.s32.totalorder %s489_s19, %s8053_s10  ;;  %s8058_s15 = sshll.u32 %s8173_s14, 4  ;;  %s8059_s15 = int_to_ptr.vmem [resolvable:$false] %s8058_s15 }
  0x46   : > { %s8060_s30 = scalar_lea.vmem %s8059_s15, 256  ;;  %p8061_p9 = scmp.lt.s32.totalorder %s489_s19, %s8059_s15 }
  0x47   : > { %p8056_p6 = pnand %p8054_p1, %p8042_p7  ;;  %p8062_p3 = scmp.lt.s32.totalorder %s8060_s30, %s8053_s10 }
  0x49   : > { %p8057_p5 = pneg %p8056_p6  ;;  %p8063_p4 = por %p8062_p3, %p8061_p9 }
  0x4b   : > { %p8064_p8 = pnand %p8063_p4, %p8057_p5 }
  0x4d   : > { %8067 = shalt.err (!%p8064_p8)
}
  0x4e   : > { %7937 = dma.hbm_to_vmem [thread:$0]  (!%p8359_p11), %s8356_s0, 128, %s489_s19, %s478_s11  }
  0x4f   : > { %s495_s12 = sand.u32 1, %s8168_s24   ;;  %s499_s16 = scalar_lea.vmem [#allocation5], %s8351_s13 }
  0x50   : > { %s506_s23 = sshll.u32 %s499_s16, 4  ;;  %s496_s17 = scalar_lea.sflag [#allocation6], %s495_s12  ;;  %s507_s23 = int_to_ptr.vmem [resolvable:$true] %s506_s23 }
  0x51   : > { %s8068_s21 = scalar_lea.hbm %s8366_s26, 128  ;;  %s8073_s14 = scalar_lea.hbm %s9338_s1, 256 }
  0x52   : > { %p8069_p1 = scmp.ne.s32.totalorder %s8366_s26, %s8068_s21  ;;  %p8074_p8 = scmp.lt.s32.totalorder %s8366_s26, %s9338_s1 }
  0x53   : > { %p8075_p3 = scmp.lt.s32.totalorder %s8073_s14, %s8068_s21 }
  0x54   : > { %p8071_p4 = pnand %p8069_p1, %p8042_p7 }
  0x55   : > { %p8076_p12 = por %p8075_p3, %p8074_p8 }
  0x56   : > { %p8072_p6 = pneg %p8071_p4 }
  0x58   : > { %p8077_p10 = pnand %p8076_p12, %p8072_p6 }
  0x5a   : > { %8080 = shalt.err (!%p8077_p10)
}
  0x5b   : > { %s8081_s13 = scalar_lea.vmem %s507_s23, 128  ;;  %s8174_s0 = smov [#allocation5]  }
  0x5c   : > { %p8082_p2 = scmp.ne.s32.totalorder %s507_s23, %s8081_s13  ;;  %s8086_s19 = sshll.u32 %s8174_s0, 4  ;;  %s8087_s19 = int_to_ptr.vmem [resolvable:$false] %s8086_s19 }
  0x5d   : > { %s8088_s11 = scalar_lea.vmem %s8087_s19, 256  ;;  %p8089_p5 = scmp.lt.s32.totalorder %s507_s23, %s8087_s19 }
  0x5e   : > { %p8084_p13 = pnand %p8082_p2, %p8042_p7  ;;  %p8090_p9 = scmp.lt.s32.totalorder %s8088_s11, %s8081_s13 }
  0x60   : > { %p8085_p0 = pneg %p8084_p13  ;;  %p8091_p1 = por %p8090_p9, %p8089_p5 }
  0x62   : > { %p8092_p4 = pnand %p8091_p1, %p8085_p0 }
  0x64   : > { %8095 = shalt.err (!%p8092_p4)
}
  0x65   : > { %7940 = dma.hbm_to_vmem [thread:$0]  (!%p8359_p11), %s8366_s26, 128, %s507_s23, %s496_s17  }
  0x66   : > { %p9392_p6 = scmp.ne.s32.totalorder %s9381_s29, 0 }
  0x67   : > { %s8411_s12 = sand.u32 (!%p9392_p6), 1, %s8160_s22   ;;  %p9393_p7 = scmp.ne.s32.totalorder (!%p9392_p6), %s9378_s27, 0 }
  0x68   : > { %515 = sbr.rel (%p9392_p6) target bundleno = 2823 (0xb07), region = 84  ;;  %s8414_s16 = sshll.u32 (!%p9392_p6), %s8411_s12, 3 }
  0x69   : > { %s518_s21 = scalar_lea.sflag (!%p9392_p6), [#allocation3], %s8411_s12  ;;  %s521_s18 = scalar_lea.vmem (!%p9392_p6), [#allocation2], %s8414_s16 }
  0x6d   : > { %8139 = dma.done.wait (%p9393_p7), %s518_s21, 128  }
  0x6e   : > { %8141 = vsyncadd (%p9393_p7), %s518_s21, 4294967168  ;;  %s526_s29 = sand.u32 1, %s8291_s25   ;;  %s530_s20 = scalar_lea.vmem [#allocation5], %s8414_s16 }
  0x6f   : > { %s527_s26 = scalar_lea.sflag [#allocation6], %s526_s29 }
  0x70   : > { %8143 = dma.done.wait (%p9393_p7), %s527_s26, 128  }
  0x71   : > { %8145 = vsyncadd (%p9393_p7), %s527_s26, 4294967168  ;;  %p9394_p11 = scmp.eq.s32.totalorder %s8291_s25, 0 }
  0x73   : > { %8147 = dma.done.wait (%p9394_p11), [#allocation6], 512   ;;  %p9395_p8 = pmov %p9394_p11 }
  0x74   : > { %v8175_v0 = vmov 0.0   ;;  %vm8176_vm0 = vmmov 0   ;;  %v594_v1 = vld [vmem:[%s9339_s2 + $0x18] sm:$0xff]  ;;  %v593_v2 = vld [vmem:[%s9339_s2 + $0x10] sm:$0xff]  ;;  %v592_v3 = vld [vmem:[%s9339_s2 + $0x8] sm:$0xff]  ;;  %vm602_vm1 = vcmask 261120  }
  0x75   : > { %8149 = vsyncadd (%p9395_p8), [#allocation6], 4294966784  ;;  %7302 = vmatprep.subr.mxu0 %v8175_v0  ;;  %7313 = vmatprep.subr.mxu1 %v8175_v0  ;;  %v8447_v4 = vand.u32 4294901760, %v594_v1  ;;  %v8449_v5 = vand.u32 4294901760, %v593_v2  ;;  %v8451_v6 = vand.u32 4294901760, %v592_v3  ;;  %v591_v7 = vld [vmem:[%s9339_s2] sm:$0xff] }
  0x76   : > { %7310 = vmatprep.mubr.msk.f32.mxu0 %vm8176_vm0, %v8175_v0  ;;  %7321 = vmatprep.mubr.msk.f32.mxu1 %vm8176_vm0, %v8175_v0  ;;  %v8458_v8 = vld [vmem:[%s521_s18] sm:$0xff]  ;;  %v589_v9 = vld [vmem:[%s530_s20] sm:$0xff]  ;;  %v8460_v10 = vand.u32 4294901760, %v591_v7  ;;  %s8177_s10 = smov 104   ;;  %s8178_s14 = smov 120   ;;  %vm1609_vm2 = vcmask 64512  }
  0x77   : > { %v590_v11 = vadd.f32 %v589_v9, %v8458_v8  ;;  %7303 = vmatpush3.msra.mxu0 %v8447_v4  ;;  %v711_v12 = vsub.f32 %v594_v1, %v8447_v4  ;;  %v718_v13 = vsub.f32 %v593_v2, %v8449_v5  ;;  %v725_v14 = vsub.f32 %v592_v3, %v8451_v6  ;;  %v1094_v34 = vld [vmem:[%s9341_s4 + $0x18] sm:$0xff]  ;;  %v1093_v35 = vld [vmem:[%s9341_s4 + $0x10] sm:$0xff]  ;;  %v1092_v36 = vld [vmem:[%s9341_s4 + $0x8] sm:$0xff]  ;;  %s8179_s15 = smov 96   ;;  %s8180_s30 = smov 112  }
  0x78   : > { %7304 = vmatprep.subr.mxu0 %v8175_v0  ;;  %v732_v16 = vsub.f32 %v591_v7, %v8460_v10  ;;  %v1103_v37 = vsel %vm602_vm1, %v8458_v8, 0  ;;  %v8533_v38 = vand.u32 4294901760, %v1094_v34  ;;  %v8535_v39 = vand.u32 4294901760, %v1093_v35  ;;  %v1091_v41 = vld [vmem:[%s9341_s4] sm:$0xff]  ;;  %s8181_s26 = smov 8   ;;  %s8182_s20 = smov 16  }
  0x79   : > { %v604_v15 = vsel %vm602_vm1, %v590_v11, 0  ;;  %7305 = vmatpush3.msra.mxu0 %v8449_v5  ;;  %v712_v17 = vand.u32 4294901760, %v711_v12  ;;  %v719_v18 = vand.u32 4294901760, %v718_v13  ;;  %v726_v20 = vand.u32 4294901760, %v725_v14  ;;  %s9396_s29 = sld [smem:[#allocation22_spill]]  ;;  %s7029_s19 = sshll.u32 %s8291_s25, 7 }
  0x7a   : > { %v8471_v19 = vand.u32 4294901760, %v604_v15  ;;  %7306 = vmatprep.subr.mxu0 %v8175_v0  ;;  %v733_v21 = vand.u32 4294901760, %v732_v16  ;;  %v8537_v40 = vand.u32 4294901760, %v1092_v36  ;;  %v8542_v42 = vand.u32 4294901760, %v1103_v37  ;;  %s9398_s17 = sld [smem:[#allocation23_spill]]  ;;  %s587_s11 = scalar_lea.vmem [#allocation8], %s8414_s16 }
  0x7b   : > { %7307 = vmatpush3.msra.mxu0 %v8451_v6  ;;  %v713_v22 = vsub.f32 %v711_v12, %v712_v17  ;;  %v720_v23 = vsub.f32 %v718_v13, %v719_v18  ;;  %v727_v25 = vsub.f32 %v725_v14, %v726_v20  ;;  %v8544_v43 = vand.u32 4294901760, %v1091_v41  ;;  %s9401_s0 = sld [smem:[#allocation25_spill]]  ;;  %s6904_s21 = sshll.u32 %s587_s11, 4  ;;  %s6905_s21 = int_to_ptr.vmem [resolvable:$true] %s6904_s21 }
  0x7c   : > { %v676_v24 = vsub.f32 %v604_v15, %v8471_v19  ;;  %7308 = vmatprep.subr.mxu0 %v8175_v0  ;;  %v734_v29 = vsub.f32 %v732_v16, %v733_v21  ;;  %v1210_v44 = vsub.f32 %v1094_v34, %v8533_v38  ;;  %v1217_v45 = vsub.f32 %v1093_v35, %v8535_v39  ;;  %s9402_s27 = sld [smem:[#allocation26_spill]] }
  0x7d   : > { %v714_v26 = vand.u32 4294901760, %v713_v22  ;;  %7309 = vmatpush3.msra.mxu0 %v8460_v10  ;;  %v721_v27 = vand.u32 4294901760, %v720_v23  ;;  %v728_v31 = vand.u32 4294901760, %v727_v25  ;;  %v1224_v46 = vsub.f32 %v1092_v36, %v8537_v40  ;;  %v7020_v36 = vld [vmem:[%s9342_s5] ss:$0 sm:$0xff] }
  0x7e   : > { %v677_v28 = vand.u32 4294901760, %v676_v24  ;;  %7324 = vmatprep.subr.mxu0 %v8175_v0  ;;  %v735_v33 = vand.u32 4294901760, %v734_v29  ;;  %v8551_v47 = vsub.f32 %v1103_v37, %v8542_v42  ;;  %v1231_v48 = vsub.f32 %v1091_v41, %v8544_v43 }
  0x7f   : > { %7314 = vmatpush3.msra.mxu1 %v714_v26  ;;  %v1211_v50 = vand.u32 4294901760, %v1210_v44  ;;  %v1218_v51 = vand.u32 4294901760, %v1217_v45  ;;  %v1225_v52 = vand.u32 4294901760, %v1224_v46  ;;  %vm5269_vm3 = vcmask 130048  }
  0x80   : > { %v678_v30 = vsub.f32 %v676_v24, %v677_v28  ;;  %7315 = vmatprep.subr.mxu1 %v8175_v0  ;;  %v1176_v49 = vand.u32 4294901760, %v8551_v47  ;;  %v1232_v53 = vand.u32 4294901760, %v1231_v48  ;;  %vm5271_vm4 = vcmask 195584  }
  0x81   : > { %7316 = vmatpush3.msra.mxu1 %v721_v27  ;;  %v1212_v55 = vsub.f32 %v1210_v44, %v1211_v50  ;;  %v1219_v56 = vsub.f32 %v1217_v45, %v1218_v51  ;;  %v1226_v57 = vsub.f32 %v1224_v46, %v1225_v52  ;;  %vm6318_vm5 = vcmask 523264  }
  0x82   : > { %v679_v32 = vand.u32 4294901760, %v678_v30  ;;  %7317 = vmatprep.subr.mxu1 %v8175_v0  ;;  %v1177_v54 = vsub.f32 %v8551_v47, %v1176_v49  ;;  %v1233_v61 = vsub.f32 %v1231_v48, %v1232_v53  ;;  %s6902_s23 = scalar_lea.hbm %s9402_s27, %s7029_s19 }
  0x83   : > { %7318 = vmatpush3.msra.mxu1 %v728_v31  ;;  %v1213_v59 = vand.u32 4294901760, %v1212_v55  ;;  %v1220_v60 = vand.u32 4294901760, %v1219_v56  ;;  %v1227_v62 = vand.u32 4294901760, %v1226_v57 }
  0x84   : > { %7311 = vmatmul.mubr.f32.vlgmr.msra.gmra.mxu0 %v679_v32  ;;  %7319 = vmatprep.subr.mxu1 %v8175_v0  ;;  %v1178_v58 = vand.u32 4294901760, %v1177_v54  ;;  %v1234_v63 = vand.u32 4294901760, %v1233_v61 }
  0x85   : > { %7325 = vmatpush3.msra.mxu0 %v711_v12  ;;  %7320 = vmatpush3.msra.mxu1 %v735_v33 }
  0x86   : > { %7326 = vmatprep.subr.mxu0 %v8175_v0  ;;  %7322 = vmatmul.mubr.f32.vlgmr.msra.gmra.mxu1 %v8471_v19 }
  0x87   : > { %7327 = vmatpush3.msra.mxu0 %v718_v13  ;;  %7335 = vmatprep.subr.mxu1 %v8175_v0 }
  0x88   : > { %7328 = vmatprep.subr.mxu0 %v8175_v0  ;;  %7336 = vmatpush3.msra.mxu1 %v8447_v4 }
  0x89   : > { %7329 = vmatpush3.msra.mxu0 %v725_v14  ;;  %7332 = vmatprep.mubr.msk.f32.mxu0 %vm8176_vm0, %v8175_v0 }
  0x8a   : > { %7330 = vmatprep.subr.mxu0 %v8175_v0  ;;  %7337 = vmatprep.subr.mxu1 %v8175_v0 }
  0x8b   : > { %7331 = vmatpush3.msra.mxu0 %v732_v16  ;;  %7338 = vmatpush3.msra.mxu1 %v8449_v5 }
  0x8c   : > { %7333 = vmatmul.mubr.f32.vlgmr.msra.gmra.mxu0 %v676_v24  ;;  %7346 = vmatprep.subr.mxu0 %v8175_v0 }
  0x8d   : > { %7339 = vmatprep.subr.mxu1 %v8175_v0  ;;  %7347 = vmatpush3.msra.mxu0 %v712_v17 }
  0x8e   : > { %7340 = vmatpush3.msra.mxu1 %v8451_v6  ;;  %7348 = vmatprep.subr.mxu0 %v8175_v0 }
  0x8f   : > { %7341 = vmatprep.subr.mxu1 %v8175_v0  ;;  %7349 = vmatpush3.msra.mxu0 %v719_v18 }
  0x90   : > { %7342 = vmatpush3.msra.mxu1 %v8460_v10  ;;  %7343 = vmatprep.mubr.msk.f32.mxu1 %vm8176_vm0, %v8175_v0 }
  0x91   : > { %7350 = vmatprep.subr.mxu0 %v8175_v0  ;;  %7344 = vmatmul.mubr.f32.vlgmr.msra.gmra.mxu1 %v677_v28 }
  0x92   : > { %7351 = vmatpush3.msra.mxu0 %v726_v20  ;;  %7357 = vmatprep.subr.mxu1 %v8175_v0 }
  0x93   : > { %7352 = vmatprep.subr.mxu0 %v8175_v0  ;;  %7358 = vmatpush3.msra.mxu1 %v8447_v4  ;;  %v7019_v4 = vld [vmem:[%s9340_s3] ss:$0 sm:$0xff] }
  0x94   : > { %7353 = vmatpush3.msra.mxu0 %v733_v21  ;;  %7354 = vmatprep.mubr.msk.f32.mxu0 %vm8176_vm0, %v8175_v0 }
  0x95   : > { %7359 = vmatprep.subr.mxu1 %v8175_v0  ;;  %7355 = vmatmul.mubr.f32.vlgmr.msra.gmra.mxu0 %v8471_v19 }
  0x96   : > { %7360 = vmatpush3.msra.mxu1 %v8449_v5  ;;  %7365 = vmatprep.mubr.msk.f32.mxu1 %vm8176_vm0, %v8175_v0 }
  0x97   : > { %7361 = vmatprep.subr.mxu1 %v8175_v0  ;;  %7368 = vmatprep.subr.mxu0 %v8175_v0 }
  0x98   : > { %7362 = vmatpush3.msra.mxu1 %v8451_v6  ;;  %7376 = vmatprep.mubr.msk.f32.mxu0 %vm8176_vm0, %v8175_v0 }
  0x99   : > { %7363 = vmatprep.subr.mxu1 %v8175_v0  ;;  %7369 = vmatpush3.msra.mxu0 %v8533_v38 }
  0x9a   : > { %7364 = vmatpush3.msra.mxu1 %v8460_v10  ;;  %7370 = vmatprep.subr.mxu0 %v8175_v0 }
  0x9b   : > { %7366 = vmatmul.mubr.f32.vlgmr.msra.gmra.mxu1 %v8471_v19  ;;  %7379 = vmatprep.subr.mxu1 %v8175_v0 }
  0x9c   : > { %7387 = vmatprep.mubr.msk.f32.mxu1 %vm8176_vm0, %v8175_v0  ;;  %7371 = vmatpush3.msra.mxu0 %v8535_v39 }
  0x9d   : > { %7372 = vmatprep.subr.mxu0 %v8175_v0  ;;  %7380 = vmatpush3.msra.mxu1 %v1213_v59 }
  0x9e   : > { %7373 = vmatpush3.msra.mxu0 %v8537_v40  ;;  %7381 = vmatprep.subr.mxu1 %v8175_v0 }
  0x9f   : > { %7374 = vmatprep.subr.mxu0 %v8175_v0  ;;  %7382 = vmatpush3.msra.mxu1 %v1220_v60 }
  0xa0   : > { %7375 = vmatpush3.msra.mxu0 %v8544_v43  ;;  %7383 = vmatprep.subr.mxu1 %v8175_v0 }
  0xa1   : > { %7390 = vmatprep.subr.mxu0 %v8175_v0  ;;  %7377 = vmatmul.mubr.f32.vlgmr.msra.gmra.mxu0 %v1178_v58 }
  0xa2   : > { %7391 = vmatpush3.msra.mxu0 %v1210_v44  ;;  %7384 = vmatpush3.msra.mxu1 %v1227_v62 }
  0xa3   : > { %7392 = vmatprep.subr.mxu0 %v8175_v0  ;;  %7385 = vmatprep.subr.mxu1 %v8175_v0 }
  0xa4   : > { %7393 = vmatpush3.msra.mxu0 %v1217_v45  ;;  %7386 = vmatpush3.msra.mxu1 %v1234_v63 }
  0xa5   : > { %7394 = vmatprep.subr.mxu0 %v8175_v0  ;;  %7398 = vmatprep.mubr.msk.f32.mxu0 %vm8176_vm0, %v8175_v0 }
  0xa6   : > { %7395 = vmatpush3.msra.mxu0 %v1224_v46  ;;  %7401 = vmatprep.subr.mxu1 %v8175_v0 }
  0xa7   : > { %7396 = vmatprep.subr.mxu0 %v8175_v0  ;;  %7388 = vmatmul.mubr.f32.vlgmr.msra.gmra.mxu1 %v8542_v42 }
  0xa8   : > { %7397 = vmatpush3.msra.mxu0 %v1231_v48  ;;  %7402 = vmatpush3.msra.mxu1 %v8533_v38 }
  0xa9   : > { %7412 = vmatprep.subr.mxu0 %v8175_v0  ;;  %7399 = vmatmul.mubr.f32.vlgmr.msra.gmra.mxu0 %v8551_v47 }
  0xaa   : > { %7413 = vmatpush3.msra.mxu0 %v1211_v50  ;;  %7403 = vmatprep.subr.mxu1 %v8175_v0 }
  0xab   : > { %7414 = vmatprep.subr.mxu0 %v8175_v0  ;;  %7404 = vmatpush3.msra.mxu1 %v8535_v39 }
  0xac   : > { %7415 = vmatpush3.msra.mxu0 %v1218_v51  ;;  %7405 = vmatprep.subr.mxu1 %v8175_v0 }
  0xad   : > { %7416 = vmatprep.subr.mxu0 %v8175_v0  ;;  %7406 = vmatpush3.msra.mxu1 %v8537_v40 }
  0xae   : > { %7417 = vmatpush3.msra.mxu0 %v1225_v52  ;;  %7407 = vmatprep.subr.mxu1 %v8175_v0 }
  0xaf   : > { %7418 = vmatprep.subr.mxu0 %v8175_v0  ;;  %7408 = vmatpush3.msra.mxu1 %v8544_v43 }
  0xb0   : > { %7419 = vmatpush3.msra.mxu0 %v1232_v53  ;;  %7420 = vmatprep.mubr.msk.f32.mxu0 %vm8176_vm0, %v8175_v0 }
  0xb1   : > { %7409 = vmatprep.mubr.msk.f32.mxu1 %vm8176_vm0, %v8175_v0  ;;  %7421 = vmatmul.mubr.f32.vlgmr.msra.gmra.mxu0 %v8542_v42 }
  0xb2   : > { %7423 = vmatprep.subr.mxu1 %v8175_v0  ;;  %7434 = vmatprep.subr.mxu0 %v8175_v0 }
  0xb3   : > { %7410 = vmatmul.mubr.f32.vlgmr.msra.gmra.mxu1 %v1176_v49  ;;  %7436 = vmatprep.mubr.msk.f32.mxu0 %vm8176_vm0, %v8175_v0 }
  0xb4   : > { %7424 = vmatpush3.msra.mxu1 %v8533_v38  ;;  %7431 = vmatprep.mubr.msk.f32.mxu1 %vm8176_vm0, %v8175_v0 }
  0xb5   : > { %7425 = vmatprep.subr.mxu1 %v8175_v0 }
  0xb6   : > { %7426 = vmatpush3.msra.mxu1 %v8535_v39 }
  0xb7   : > { %7427 = vmatprep.subr.mxu1 %v8175_v0 }
  0xb8   : > { %7428 = vmatpush3.msra.mxu1 %v8537_v40 }
  0xb9   : > { %7429 = vmatprep.subr.mxu1 %v8175_v0 }
  0xba   : > { %7430 = vmatpush3.msra.mxu1 %v8544_v43 }
  0xbb   : > { %7432 = vmatmul.mubr.f32.vlgmr.msra.gmra.mxu1 %v8542_v42  ;;  %7439 = vmatprep.subr.mxu1 %v8175_v0 }
  0xbc   : > { %7441 = vmatprep.mubr.msk.f32.mxu1 %vm8176_vm0, %v8175_v0 }
 0x144   : > { %v681_v1 = vpop.f32.mrf.mxu0 }
 0x145   : > { %v682_v6 = vadd.f32 %v7019_v4, %v681_v1 }
 0x146   : > { %v7312_v2 = vpop.f32.mrf.mxu0  ;;  %v772_v3 = vpop.f32.mrf.mxu1 }
 0x147   : > { %v773_v9 = vadd.f32 %v772_v3, %v682_v6 }
 0x148   : > { %v7323_v5 = vpop.f32.mrf.mxu1 }
 0x14c   : > { %v852_v7 = vpop.f32.mrf.mxu0 }
 0x14d   : > { %v853_v11 = vadd.f32 %v852_v7, %v773_v9 }
 0x14e   : > { %v7334_v8 = vpop.f32.mrf.mxu0 }
 0x151   : > { %v929_v10 = vpop.f32.mrf.mxu1 }
 0x152   : > { %v930_v13 = vadd.f32 %v929_v10, %v853_v11 }
 0x153   : > { %v7345_v12 = vpop.f32.mrf.mxu1 }
 0x155   : > { %v1012_v14 = vpop.f32.mrf.mxu0 }
 0x156   : > { %v1013_v16 = vadd.f32 %v1012_v14, %v930_v13 }
 0x157   : > { %v7356_v15 = vpop.f32.mrf.mxu0 }
 0x15b   : > { %v1087_v17 = vpop.f32.mrf.mxu1 }
 0x15c   : > { %v1088_v18 = vadd.f32 %v1087_v17, %v1013_v16 }
 0x15d   : > { %v7367_v19 = vpop.f32.mrf.mxu1 }
 0x15e   : > { %1595 = vrot.lane.b32.xlu1 %v1088_v18, %s8177_s10  ;;  %1591 = vrot.lane.b32.xlu0 %v1088_v18, %s8178_s14  ;;  %v1610_v20 = vsel %vm1609_vm2, %v1088_v18, 0 }
 0x15f   : > { %v1680_v21 = vand.u32 4294901760, %v1610_v20 }
 0x161   : > { %v1681_v22 = vsub.f32 %v1610_v20, %v1680_v21  ;;  %v1180_v37 = vpop.f32.mrf.mxu0 }
 0x162   : > { %1607 = vrot.lane.b32.xlu1 %v1088_v18, %s8179_s15  ;;  %1593 = vrot.lane.b32.xlu0 %v1088_v18, %s8180_s30  ;;  %v1181_v39 = vadd.f32 %v7020_v36, %v1180_v37 }
 0x163   : > { %v1682_v25 = vand.u32 4294901760, %v1681_v22  ;;  %v7378_v40 = vpop.f32.mrf.mxu0 }
 0x165   : > { %v1683_v29 = vsub.f32 %v1681_v22, %v1682_v25 }
 0x167   : > { %v1684_v32 = vand.u32 4294901760, %v1683_v29  ;;  %v1271_v38 = vpop.f32.mrf.mxu1 }
 0x168   : > { %v1272_v42 = vadd.f32 %v1271_v38, %v1181_v39 }
 0x169   : > { %v7389_v41 = vpop.f32.mrf.mxu1  ;;  %v1351_v43 = vpop.f32.mrf.mxu0 }
 0x16a   : > { %v1352_v45 = vadd.f32 %v1351_v43, %v1272_v42 }
 0x16b   : > { %v7400_v46 = vpop.f32.mrf.mxu0 }
 0x171   : > { %v1511_v49 = vpop.f32.mrf.mxu0 }
 0x173   : > { %v1428_v44 = vpop.f32.mrf.mxu1  ;;  %v7422_v50 = vpop.f32.mrf.mxu0 }
 0x174   : > { %v1429_v48 = vadd.f32 %v1428_v44, %v1352_v45 }
 0x175   : > { %v7411_v47 = vpop.f32.mrf.mxu1 }
 0x176   : > { %v1512_v51 = vadd.f32 %v1511_v49, %v1429_v48 }
 0x17b   : > { %v1586_v52 = vpop.f32.mrf.mxu1 }
 0x17c   : > { %v8639_v53 = vadd.f32 %v1586_v52, %v1512_v51 }
 0x17d   : > { %v7433_v54 = vpop.f32.mrf.mxu1 }
 0x1d0   : > { %v8614_v23 = vpop.permute.xlu1 %1595  ;;  %v1592_v24 = vpop.permute.xlu0 %1591 }
 0x1d1   : > { %2060 = vrot.lane.b32.xlu0 %v1592_v24, %s8179_s15  ;;  %v2062_v55 = vsel %vm1609_vm2, %v1592_v24, 0  ;;  %v2966_v11 = vsel %vm1609_vm2, %v8614_v23, 0 }
 0x1d2   : > { %v2132_v56 = vand.u32 4294901760, %v2062_v55  ;;  %v8660_v15 = vand.u32 4294901760, %v2966_v11 }
 0x1d4   : > { %v1608_v26 = vpop.permute.xlu1 %1607  ;;  %v1594_v27 = vpop.permute.xlu0 %1593  ;;  %v2133_v57 = vsub.f32 %v2062_v55, %v2132_v56  ;;  %v8670_v19 = vsub.f32 %v2966_v11, %v8660_v15 }
 0x1d5   : > { %v1612_v28 = vsel %vm1609_vm2, %v1608_v26, 0  ;;  %2964 = vrot.lane.b32.xlu0 %v8614_v23, %s8179_s15  ;;  %2512 = vrot.lane.b32.xlu1 %v1594_v27, %s8179_s15  ;;  %v2514_v59 = vsel %vm1609_vm2, %v1594_v27, 0  ;;  %s8184_s15 = smov [#allocation8]  }
 0x1d6   : > { %v1645_v30 = vand.u32 4294901760, %v1612_v28  ;;  %v2134_v58 = vand.u32 4294901760, %v2133_v57  ;;  %v8643_v62 = vand.u32 4294901760, %v2514_v59  ;;  %v3038_v23 = vand.u32 4294901760, %v8670_v19 }
 0x1d8   : > { %v1722_v31 = vsub.f32 %v1612_v28, %v1645_v30  ;;  %7435 = vmatpush3.xpose.msra.mxu0 %v1645_v30  ;;  %v2135_v61 = vsub.f32 %v2133_v57, %v2134_v58  ;;  %v8647_v4 = vsub.f32 %v2514_v59, %v8643_v62  ;;  %v3039_v26 = vsub.f32 %v8670_v19, %v3038_v23 }
 0x1d9   : > { %7444 = vmatprep.subr.mxu0 %v8175_v0  ;;  %v8701_v28 = vand.u32 4294901760, %v8639_v53 }
 0x1da   : > { %v1723_v33 = vand.u32 4294901760, %v1722_v31  ;;  %v2136_v6 = vand.u32 4294901760, %v2135_v61  ;;  %v2586_v10 = vand.u32 4294901760, %v8647_v4  ;;  %v3040_v29 = vand.u32 4294901760, %v3039_v26 }
 0x1db   : > { %7437 = vmatmul.mubr.f32.vlgmr.msra.gmra.mxu0 %v1684_v32 }
 0x1dc   : > { %v1724_v34 = vsub.f32 %v1722_v31, %v1723_v33  ;;  %7445 = vmatpush3.xpose.msra.mxu0 %v1722_v31  ;;  %7446 = vmatprep.mubr.msk.f32.mxu0 %vm8176_vm0, %v8175_v0  ;;  %v2587_v16 = vsub.f32 %v8647_v4, %v2586_v10  ;;  %v8712_v31 = vsub.f32 %v8639_v53, %v8701_v28 }
 0x1dd   : > { %7454 = vmatprep.subr.mxu0 %v8175_v0 }
 0x1de   : > { %v1725_v35 = vand.u32 4294901760, %v1724_v34  ;;  %v2588_v20 = vand.u32 4294901760, %v2587_v16 }
 0x1df   : > { %7447 = vmatmul.mubr.f32.vlgmr.msra.gmra.mxu0 %v1681_v22 }
 0x1e0   : > { %7440 = vmatpush3.xpose.msra.mxu1 %v1725_v35  ;;  %7455 = vmatpush3.xpose.msra.mxu0 %v1723_v33  ;;  %v3572_v33 = vand.u32 4294901760, %v8712_v31 }
 0x1e1   : > { %7456 = vmatprep.mubr.msk.f32.mxu0 %vm8176_vm0, %v8175_v0  ;;  %7449 = vmatprep.subr.mxu1 %v8175_v0 }
 0x1e2   : > { %7464 = vmatprep.subr.mxu0 %v8175_v0  ;;  %v3573_v34 = vsub.f32 %v8712_v31, %v3572_v33 }
 0x1e3   : > { %7442 = vmatmul.mubr.f32.vlgmr.msra.gmra.mxu1 %v1680_v21  ;;  %7457 = vmatmul.mubr.f32.vlgmr.msra.gmra.mxu0 %v1680_v21 }
 0x1e4   : > { %7450 = vmatpush3.xpose.msra.mxu1 %v1645_v30  ;;  %7451 = vmatprep.mubr.msk.f32.mxu1 %vm8176_vm0, %v8175_v0  ;;  %v3574_v35 = vand.u32 4294901760, %v3573_v34 }
 0x1e5   : > { %7459 = vmatprep.subr.mxu1 %v8175_v0  ;;  %7466 = vmatprep.mubr.msk.f32.mxu0 %vm8176_vm0, %v8175_v0 }
 0x1e7   : > { %7452 = vmatmul.mubr.f32.vlgmr.msra.gmra.mxu1 %v1682_v25 }
 0x1e8   : > { %7460 = vmatpush3.xpose.msra.mxu1 %v1645_v30  ;;  %7461 = vmatprep.mubr.msk.f32.mxu1 %vm8176_vm0, %v8175_v0 }
 0x1e9   : > { %7469 = vmatprep.subr.mxu1 %v8175_v0 }
 0x1eb   : > { %7462 = vmatmul.mubr.f32.vlgmr.msra.gmra.mxu1 %v1680_v21 }
 0x1ec   : > { %7471 = vmatprep.mubr.msk.f32.mxu1 %vm8176_vm0, %v8175_v0 }
 0x243   : > { %v2061_v60 = vpop.permute.xlu0 %2060 }
 0x244   : > { %v2064_v63 = vsel %vm1609_vm2, %v2061_v60, 0 }
 0x245   : > { %v2097_v1 = vand.u32 4294901760, %v2064_v63 }
 0x247   : > { %v2174_v2 = vsub.f32 %v2064_v63, %v2097_v1  ;;  %v2513_v3 = vpop.permute.xlu1 %2512  ;;  %7465 = vmatpush3.xpose.msra.mxu0 %v2097_v1  ;;  %v2965_v14 = vpop.permute.xlu0 %2964 }
 0x248   : > { %v2516_v5 = vsel %vm1609_vm2, %v2513_v3, 0  ;;  %7474 = vmatprep.subr.mxu0 %v8175_v0  ;;  %v2968_v18 = vsel %vm1609_vm2, %v2965_v14, 0 }
 0x249   : > { %v2175_v7 = vand.u32 4294901760, %v2174_v2  ;;  %v8651_v8 = vand.u32 4294901760, %v2516_v5  ;;  %v8676_v22 = vand.u32 4294901760, %v2968_v18 }
 0x24a   : > { %7467 = vmatmul.mubr.f32.vlgmr.msra.gmra.mxu0 %v2136_v6 }
 0x24b   : > { %v2176_v9 = vsub.f32 %v2174_v2, %v2175_v7  ;;  %7475 = vmatpush3.xpose.msra.mxu0 %v2174_v2  ;;  %7476 = vmatprep.mubr.msk.f32.mxu0 %vm8176_vm0, %v8175_v0  ;;  %v2626_v13 = vsub.f32 %v2516_v5, %v8651_v8  ;;  %v3078_v25 = vsub.f32 %v2968_v18, %v8676_v22 }
 0x24c   : > { %7484 = vmatprep.subr.mxu0 %v8175_v0 }
 0x24d   : > { %v2177_v12 = vand.u32 4294901760, %v2176_v9  ;;  %v2627_v17 = vand.u32 4294901760, %v2626_v13  ;;  %v3079_v27 = vand.u32 4294901760, %v3078_v25 }
 0x24e   : > { %7477 = vmatmul.mubr.f32.vlgmr.msra.gmra.mxu0 %v2133_v57 }
 0x24f   : > { %7470 = vmatpush3.xpose.msra.mxu1 %v2177_v12  ;;  %7485 = vmatpush3.xpose.msra.mxu0 %v2175_v7  ;;  %v2628_v21 = vsub.f32 %v2626_v13, %v2627_v17  ;;  %v3080_v30 = vsub.f32 %v3078_v25, %v3079_v27 }
 0x250   : > { %7486 = vmatprep.mubr.msk.f32.mxu0 %vm8176_vm0, %v8175_v0  ;;  %7479 = vmatprep.subr.mxu1 %v8175_v0 }
 0x251   : > { %7494 = vmatprep.subr.mxu0 %v8175_v0  ;;  %v2629_v24 = vand.u32 4294901760, %v2628_v21  ;;  %v3081_v32 = vand.u32 4294901760, %v3080_v30 }
 0x252   : > { %7472 = vmatmul.mubr.f32.vlgmr.msra.gmra.mxu1 %v2132_v56  ;;  %7487 = vmatmul.mubr.f32.vlgmr.msra.gmra.mxu0 %v2132_v56 }
 0x253   : > { %7480 = vmatpush3.xpose.msra.mxu1 %v2097_v1  ;;  %7495 = vmatpush3.xpose.msra.mxu0 %v8651_v8 }
 0x254   : > { %7481 = vmatprep.mubr.msk.f32.mxu1 %vm8176_vm0, %v8175_v0  ;;  %7496 = vmatprep.mubr.msk.f32.mxu0 %vm8176_vm0, %v8175_v0 }
 0x255   : > { %7489 = vmatprep.subr.mxu1 %v8175_v0  ;;  %7504 = vmatprep.subr.mxu0 %v8175_v0 }
 0x256   : > { %7482 = vmatmul.mubr.f32.vlgmr.msra.gmra.mxu1 %v2134_v58  ;;  %7497 = vmatmul.mubr.f32.vlgmr.msra.gmra.mxu0 %v2588_v20 }
 0x257   : > { %7490 = vmatpush3.xpose.msra.mxu1 %v2097_v1  ;;  %7505 = vmatpush3.xpose.msra.mxu0 %v2626_v13 }
 0x258   : > { %7491 = vmatprep.mubr.msk.f32.mxu1 %vm8176_vm0, %v8175_v0  ;;  %7506 = vmatprep.mubr.msk.f32.mxu0 %vm8176_vm0, %v8175_v0 }
 0x259   : > { %7499 = vmatprep.subr.mxu1 %v8175_v0  ;;  %7514 = vmatprep.subr.mxu0 %v8175_v0 }
 0x25a   : > { %7492 = vmatmul.mubr.f32.vlgmr.msra.gmra.mxu1 %v2132_v56  ;;  %7507 = vmatmul.mubr.f32.vlgmr.msra.gmra.mxu0 %v8647_v4 }
 0x25b   : > { %7500 = vmatpush3.xpose.msra.mxu1 %v2629_v24  ;;  %7515 = vmatpush3.xpose.msra.mxu0 %v2627_v17 }
 0x25c   : > { %7501 = vmatprep.mubr.msk.f32.mxu1 %vm8176_vm0, %v8175_v0  ;;  %7516 = vmatprep.mubr.msk.f32.mxu0 %vm8176_vm0, %v8175_v0 }
 0x25d   : > { %7509 = vmatprep.subr.mxu1 %v8175_v0  ;;  %7524 = vmatprep.subr.mxu0 %v8175_v0 }
 0x25e   : > { %7502 = vmatmul.mubr.f32.vlgmr.msra.gmra.mxu1 %v8643_v62  ;;  %7517 = vmatmul.mubr.f32.vlgmr.msra.gmra.mxu0 %v8643_v62 }
 0x25f   : > { %7510 = vmatpush3.xpose.msra.mxu1 %v8651_v8  ;;  %7525 = vmatpush3.xpose.msra.mxu0 %v8676_v22 }
 0x260   : > { %7511 = vmatprep.mubr.msk.f32.mxu1 %vm8176_vm0, %v8175_v0  ;;  %7526 = vmatprep.mubr.msk.f32.mxu0 %vm8176_vm0, %v8175_v0 }
 0x261   : > { %7519 = vmatprep.subr.mxu1 %v8175_v0  ;;  %7534 = vmatprep.subr.mxu0 %v8175_v0 }
 0x262   : > { %7512 = vmatmul.mubr.f32.vlgmr.msra.gmra.mxu1 %v2586_v10  ;;  %7527 = vmatmul.mubr.f32.vlgmr.msra.gmra.mxu0 %v3040_v29 }
 0x263   : > { %7520 = vmatpush3.xpose.msra.mxu1 %v8651_v8  ;;  %7535 = vmatpush3.xpose.msra.mxu0 %v3078_v25 }
 0x264   : > { %7521 = vmatprep.mubr.msk.f32.mxu1 %vm8176_vm0, %v8175_v0  ;;  %7536 = vmatprep.mubr.msk.f32.mxu0 %vm8176_vm0, %v8175_v0 }
 0x265   : > { %7529 = vmatprep.subr.mxu1 %v8175_v0  ;;  %7544 = vmatprep.subr.mxu0 %v8175_v0 }
 0x266   : > { %7522 = vmatmul.mubr.f32.vlgmr.msra.gmra.mxu1 %v8643_v62  ;;  %7537 = vmatmul.mubr.f32.vlgmr.msra.gmra.mxu0 %v8670_v19 }
 0x267   : > { %7530 = vmatpush3.xpose.msra.mxu1 %v3081_v32  ;;  %7545 = vmatpush3.xpose.msra.mxu0 %v3079_v27 }
 0x268   : > { %7531 = vmatprep.mubr.msk.f32.mxu1 %vm8176_vm0, %v8175_v0  ;;  %7546 = vmatprep.mubr.msk.f32.mxu0 %vm8176_vm0, %v8175_v0 }
 0x269   : > { %7539 = vmatprep.subr.mxu1 %v8175_v0  ;;  %7554 = vmatprep.subr.mxu0 %v8175_v0 }
 0x26a   : > { %7532 = vmatmul.mubr.f32.vlgmr.msra.gmra.mxu1 %v8660_v15  ;;  %7547 = vmatmul.mubr.f32.vlgmr.msra.gmra.mxu0 %v8660_v15 }
 0x26b   : > { %7540 = vmatpush3.xpose.msra.mxu1 %v8676_v22  ;;  %7541 = vmatprep.mubr.msk.f32.mxu1 %vm8176_vm0, %v8175_v0 }
 0x26c   : > { %7549 = vmatprep.subr.mxu1 %v8175_v0  ;;  %7555 = vmatpush3.msra.mxu0 %v8701_v28 }
 0x26d   : > { %7556 = vmatprep.mubr.msk.f32.mxu0 %vm8176_vm0, %v8175_v0  ;;  %7564 = vmatprep.subr.mxu0 %v8175_v0 }
 0x26e   : > { %7542 = vmatmul.mubr.f32.vlgmr.msra.gmra.mxu1 %v3038_v23 }
 0x26f   : > { %7550 = vmatpush3.xpose.msra.mxu1 %v8676_v22  ;;  %7551 = vmatprep.mubr.msk.f32.mxu1 %vm8176_vm0, %v8175_v0 }
 0x270   : > { %7559 = vmatprep.subr.mxu1 %v8175_v0 }
 0x272   : > { %7552 = vmatmul.mubr.f32.vlgmr.msra.gmra.mxu1 %v8660_v15 }
 0x273   : > { %7560 = vmatpush3.msra.mxu1 %v3574_v35  ;;  %7561 = vmatprep.mubr.msk.f32.mxu1 %vm8176_vm0, %v8175_v0 }
 0x274   : > { %7569 = vmatprep.subr.mxu1 %v8175_v0 }
 0x29b   : > { %v1686_v36 = vpop.f32.mrf.mxu0 }
 0x29d   : > { %v7438_v37 = vpop.f32.mrf.mxu0 }
 0x29f   : > { %v1836_v38 = vpop.f32.mrf.mxu0 }
 0x2a1   : > { %v7448_v39 = vpop.f32.mrf.mxu0 }
 0x2a3   : > { %v1762_v40 = vpop.f32.mrf.mxu1  ;;  %v1984_v41 = vpop.f32.mrf.mxu0 }
 0x2a4   : > { %v1763_v42 = vadd.f32 %v1762_v40, %v1686_v36 }
 0x2a5   : > { %v7443_v43 = vpop.f32.mrf.mxu1  ;;  %v7458_v44 = vpop.f32.mrf.mxu0 }
 0x2a6   : > { %v1837_v45 = vadd.f32 %v1836_v38, %v1763_v42 }
 0x2a7   : > { %v1910_v46 = vpop.f32.mrf.mxu1 }
 0x2a8   : > { %v1911_v47 = vadd.f32 %v1910_v46, %v1837_v45 }
 0x2a9   : > { %v7453_v48 = vpop.f32.mrf.mxu1 }
 0x2aa   : > { %v1985_v49 = vadd.f32 %v1984_v41, %v1911_v47 }
 0x2ab   : > { %v2056_v50 = vpop.f32.mrf.mxu1 }
 0x2ac   : > { %v8750_v51 = vadd.f32 %v2056_v50, %v1985_v49 }
 0x2ad   : > { %v7463_v52 = vpop.f32.mrf.mxu1 }
 0x2ae   : > { %v3416_v54 = vsel %vm1609_vm2, %v8750_v51, -inf }
 0x2af   : > { %3417 = vmax.xlane.f32.xlu1 %v3416_v54 }
 0x30a   : > { %v2138_v55 = vpop.f32.mrf.mxu0 }
 0x30c   : > { %v7468_v56 = vpop.f32.mrf.mxu0 }
 0x30e   : > { %v2288_v57 = vpop.f32.mrf.mxu0 }
 0x310   : > { %v7478_v58 = vpop.f32.mrf.mxu0 }
 0x312   : > { %v2214_v59 = vpop.f32.mrf.mxu1  ;;  %v2436_v60 = vpop.f32.mrf.mxu0 }
 0x313   : > { %v2215_v61 = vadd.f32 %v2214_v59, %v2138_v55 }
 0x314   : > { %v7473_v62 = vpop.f32.mrf.mxu1  ;;  %v7488_v63 = vpop.f32.mrf.mxu0 }
 0x315   : > { %v2289_v1 = vadd.f32 %v2288_v57, %v2215_v61 }
 0x316   : > { %v2362_v2 = vpop.f32.mrf.mxu1  ;;  %v2590_v3 = vpop.f32.mrf.mxu0 }
 0x317   : > { %v2363_v4 = vadd.f32 %v2362_v2, %v2289_v1 }
 0x318   : > { %v7483_v5 = vpop.f32.mrf.mxu1  ;;  %v7498_v6 = vpop.f32.mrf.mxu0 }
 0x319   : > { %v2437_v7 = vadd.f32 %v2436_v60, %v2363_v4 }
 0x31a   : > { %v2508_v8 = vpop.f32.mrf.mxu1  ;;  %v2740_v9 = vpop.f32.mrf.mxu0 }
 0x31b   : > { %v2509_v10 = vadd.f32 %v2508_v8, %v2437_v7 }
 0x31c   : > { %v7493_v11 = vpop.f32.mrf.mxu1  ;;  %v7508_v12 = vpop.f32.mrf.mxu0 }
 0x31d   : > { %v3419_v13 = vsel %vm1609_vm2, %v2509_v10, -inf }
 0x31e   : > { %v2666_v14 = vpop.f32.mrf.mxu1  ;;  %3420 = vmax.xlane.f32.xlu0 %v3419_v13  ;;  %v2888_v15 = vpop.f32.mrf.mxu0 }
 0x31f   : > { %v2667_v16 = vadd.f32 %v2666_v14, %v2590_v3 }
 0x320   : > { %v7503_v17 = vpop.f32.mrf.mxu1  ;;  %v7518_v18 = vpop.f32.mrf.mxu0 }
 0x321   : > { %v2741_v19 = vadd.f32 %v2740_v9, %v2667_v16 }
 0x322   : > { %v2814_v20 = vpop.f32.mrf.mxu1  ;;  %v3042_v21 = vpop.f32.mrf.mxu0 }
 0x323   : > { %v2815_v22 = vadd.f32 %v2814_v20, %v2741_v19 }
 0x324   : > { %v7513_v23 = vpop.f32.mrf.mxu1  ;;  %v7528_v24 = vpop.f32.mrf.mxu0 }
 0x325   : > { %v2889_v25 = vadd.f32 %v2888_v15, %v2815_v22 }
 0x326   : > { %v2960_v26 = vpop.f32.mrf.mxu1  ;;  %v3192_v27 = vpop.f32.mrf.mxu0 }
 0x327   : > { %v2961_v29 = vadd.f32 %v2960_v26, %v2889_v25 }
 0x328   : > { %v7523_v30 = vpop.f32.mrf.mxu1  ;;  %v7538_v32 = vpop.f32.mrf.mxu0 }
 0x329   : > { %v3422_v34 = vsel %vm1609_vm2, %v2961_v29, -inf }
 0x32a   : > { %v3118_v35 = vpop.f32.mrf.mxu1  ;;  %3423 = vmax.xlane.f32.xlu0 %v3422_v34  ;;  %v3340_v36 = vpop.f32.mrf.mxu0 }
 0x32b   : > { %v3119_v37 = vadd.f32 %v3118_v35, %v3042_v21 }
 0x32c   : > { %v7533_v38 = vpop.f32.mrf.mxu1  ;;  %v7548_v39 = vpop.f32.mrf.mxu0 }
 0x32d   : > { %v3193_v40 = vadd.f32 %v3192_v27, %v3119_v37 }
 0x32e   : > { %v3266_v41 = vpop.f32.mrf.mxu1 }
 0x32f   : > { %v3267_v42 = vadd.f32 %v3266_v41, %v3193_v40 }
 0x330   : > { %v7543_v43 = vpop.f32.mrf.mxu1 }
 0x331   : > { %v3341_v44 = vadd.f32 %v3340_v36, %v3267_v42 }
 0x332   : > { %v3412_v45 = vpop.f32.mrf.mxu1 }
 0x333   : > { %v3413_v46 = vadd.f32 %v3412_v45, %v3341_v44 }
 0x334   : > { %v7553_v47 = vpop.f32.mrf.mxu1 }
 0x335   : > { %v3425_v48 = vsel %vm1609_vm2, %v3413_v46, -inf }
 0x336   : > { %3426 = vmax.xlane.f32.xlu1 %v3425_v48 }
 0x338   : > { %v3418_v49 = vpop.xlane.xlu1 %3417 }
 0x339   : > { %v3428_v50 = vsub.f32 %v8750_v51, %v3418_v49 }
 0x33b   : > { %v3432_v52 = vmul.f32 1.442695, %v3428_v50 }
 0x33d   : > { %7993 = vpow2.f32 %v3432_v52 }
 0x34a   : > { %v7994_v54 = vpop.eup %7993 }
 0x34b   : > { %v3440_v55 = vsel %vm1609_vm2, %v7994_v54, 0.0 }
 0x34c   : > { %3441 = vadd.xlane.f32.xlu0 %v3440_v55 }
 0x3a7   : > { %v3421_v56 = vpop.xlane.xlu0 %3420 }
 0x3a8   : > { %v3429_v57 = vsub.f32 %v2509_v10, %v3421_v56 }
 0x3aa   : > { %v3434_v58 = vmul.f32 1.442695, %v3429_v57 }
 0x3ac   : > { %7995 = vpow2.f32 %v3434_v58 }
 0x3b3   : > { %v3424_v59 = vpop.xlane.xlu0 %3423 }
 0x3b4   : > { %v3430_v60 = vsub.f32 %v2961_v29, %v3424_v59 }
 0x3b6   : > { %v3436_v61 = vmul.f32 1.442695, %v3430_v60 }
 0x3b8   : > { %7997 = vpow2.f32 %v3436_v61 }
 0x3b9   : > { %v7996_v62 = vpop.eup %7995 }
 0x3ba   : > { %v3443_v63 = vsel %vm1609_vm2, %v7996_v62, 0.0 }
 0x3bb   : > { %3444 = vadd.xlane.f32.xlu1 %v3443_v63 }
 0x3bf   : > { %v3427_v2 = vpop.xlane.xlu1 %3426 }
 0x3c0   : > { %v3431_v4 = vsub.f32 %v3413_v46, %v3427_v2 }
 0x3c2   : > { %v3438_v5 = vmul.f32 1.442695, %v3431_v4 }
 0x3c5   : > { %v8760_v1 = vpop.eup %7997 }
 0x3c6   : > { %v3446_v51 = vsel %vm1609_vm2, %v8760_v1, 0.0 }
 0x3c7   : > { %3447 = vadd.xlane.f32.xlu0 %v3446_v51 }
 0x3cc   : > { %1601 = vrot.lane.b32.xlu1 %v8639_v53, %s8180_s30  ;;  %s9400_s30 = sld [smem:[#allocation24_spill]] }
 0x3d5   : > { %v3442_v3 = vpop.xlane.xlu0 %3441 }
 0x3d6   : > { %7999 = vrcp.f32 %v3442_v3 }
 0x3d7   : > { %8001 = vpow2.f32 %v3438_v5 }
 0x3dd   : > { %1598 = vrot.lane.b32.xlu0 %v8639_v53, %s8178_s14  ;;  %s8183_s14 = smov 24  }
 0x3e3   : > { %v8000_v6 = vpop.eup %7999 }
 0x3e4   : > { %v3453_v7 = vmul.f32 %v8000_v6, %v7994_v54  ;;  %v8773_v12 = vpop.eup %8001 }
 0x3e5   : > { %v3449_v14 = vsel %vm1609_vm2, %v8773_v12, 0.0 }
 0x3e6   : > { %v3461_v8 = vsel %vm1609_vm2, %v3453_v7, 0 }
 0x3e7   : > { %v3529_v9 = vand.u32 4294901760, %v3461_v8 }
 0x3e9   : > { %v3530_v10 = vsub.f32 %v3461_v8, %v3529_v9  ;;  %7562 = vmatmul.mubr.f32.vlgmr.msra.gmra.mxu1 %v3529_v9 }
 0x3ea   : > { %7570 = vmatpush3.msra.mxu1 %v8701_v28  ;;  %7571 = vmatprep.mubr.msk.f32.mxu1 %vm8176_vm0, %v8175_v0 }
 0x3eb   : > { %7579 = vmatprep.subr.mxu1 %v8175_v0  ;;  %v3531_v11 = vand.u32 4294901760, %v3530_v10 }
 0x3ed   : > { %7572 = vmatmul.mubr.f32.vlgmr.msra.gmra.mxu1 %v3531_v11  ;;  %v3532_v13 = vsub.f32 %v3530_v10, %v3531_v11 }
 0x3ee   : > { %7580 = vmatpush3.msra.mxu1 %v8701_v28  ;;  %7581 = vmatprep.mubr.msk.f32.mxu1 %vm8176_vm0, %v8175_v0 }
 0x3ef   : > { %v3533_v15 = vand.u32 4294901760, %v3532_v13  ;;  %7589 = vmatprep.subr.mxu1 %v8175_v0 }
 0x3f0   : > { %3450 = vadd.xlane.f32.xlu1 %v3449_v14 }
 0x3f1   : > { %7557 = vmatmul.mubr.f32.vlgmr.msra.gmra.mxu0 %v3533_v15  ;;  %7582 = vmatmul.mubr.f32.vlgmr.msra.gmra.mxu1 %v3529_v9 }
 0x3f2   : > { %7565 = vmatpush3.msra.mxu0 %v8712_v31  ;;  %7566 = vmatprep.mubr.msk.f32.mxu0 %vm8176_vm0, %v8175_v0 }
 0x3f3   : > { %7574 = vmatprep.subr.mxu0 %v8175_v0  ;;  %7591 = vmatprep.mubr.msk.f32.mxu1 %vm8176_vm0, %v8175_v0 }
 0x3f5   : > { %7567 = vmatmul.mubr.f32.vlgmr.msra.gmra.mxu0 %v3530_v10 }
 0x3f6   : > { %7575 = vmatpush3.msra.mxu0 %v3572_v33  ;;  %7576 = vmatprep.mubr.msk.f32.mxu0 %vm8176_vm0, %v8175_v0 }
 0x3f7   : > { %7584 = vmatprep.subr.mxu0 %v8175_v0 }
 0x3f9   : > { %7577 = vmatmul.mubr.f32.vlgmr.msra.gmra.mxu0 %v3529_v9 }
 0x3fa   : > { %7586 = vmatprep.mubr.msk.f32.mxu0 %vm8176_vm0, %v8175_v0 }
 0x401   : > { %1604 = vrot.lane.b32.xlu1 %v8639_v53, %s8177_s10  ;;  %s9399_s10 = sld [smem:[#allocation18_spill]] }
 0x407   : > { %p9403_p12 = scmp.ne.s32.totalorder %s9399_s10, 0 }
 0x444   : > { %v3445_v28 = vpop.xlane.xlu1 %3444 }
 0x445   : > { %8003 = vrcp.f32 %v3445_v28 }
 0x448   : > { %v1602_v33 = vpop.permute.xlu1 %1601 }
 0x449   : > { %v4392_v23 = vand.u32 4294901760, %v1602_v33 }
 0x44b   : > { %v4469_v27 = vsub.f32 %v1602_v33, %v4392_v23 }
 0x44d   : > { %v4470_v36 = vand.u32 4294901760, %v4469_v27 }
 0x44f   : > { %v4471_v39 = vsub.f32 %v4469_v27, %v4470_v36 }
 0x450   : > { %v3448_v16 = vpop.xlane.xlu0 %3447 }
 0x451   : > { %8005 = vrcp.f32 %v3448_v16  ;;  %v4472_v42 = vand.u32 4294901760, %v4471_v39 }
 0x452   : > { %v8004_v17 = vpop.eup %8003 }
 0x453   : > { %v3455_v18 = vmul.f32 %v8004_v17, %v7996_v62 }
 0x454   : > { %v1599_v31 = vpop.permute.xlu0 %1598 }
 0x455   : > { %v3943_v19 = vand.u32 4294901760, %v1599_v31  ;;  %v3910_v20 = vsel %vm1609_vm2, %v3455_v18, 0 }
 0x456   : > { %v3978_v21 = vand.u32 4294901760, %v3910_v20 }
 0x457   : > { %v4020_v22 = vsub.f32 %v1599_v31, %v3943_v19  ;;  %7585 = vmatpush3.msra.mxu0 %v3943_v19 }
 0x458   : > { %7594 = vmatprep.subr.mxu0 %v8175_v0  ;;  %v3979_v24 = vsub.f32 %v3910_v20, %v3978_v21 }
 0x459   : > { %v4021_v25 = vand.u32 4294901760, %v4020_v22 }
 0x45a   : > { %v3980_v53 = vand.u32 4294901760, %v3979_v24 }
 0x45b   : > { %v4022_v26 = vsub.f32 %v4020_v22, %v4021_v25 }
 0x45c   : > { %v3981_v29 = vsub.f32 %v3979_v24, %v3980_v53 }
 0x45d   : > { %v4023_v30 = vand.u32 4294901760, %v4022_v26 }
 0x45e   : > { %v8006_v32 = vpop.eup %8005  ;;  %v3982_v34 = vand.u32 4294901760, %v3981_v29 }
 0x45f   : > { %v3457_v35 = vmul.f32 %v8006_v32, %v8760_v1  ;;  %7590 = vmatpush3.msra.mxu1 %v4023_v30  ;;  %v5276_v30 = vld [vmem:[%s9343_s6 + $0x18] sm:$0xff]  ;;  %v5275_v32 = vld [vmem:[%s9343_s6 + $0x10] sm:$0xff] }
 0x460   : > { %7587 = vmatmul.mubr.f32.vlgmr.msra.gmra.mxu0 %v3982_v34  ;;  %7592 = vmatmul.mubr.f32.vlgmr.msra.gmra.mxu1 %v3978_v21 }
 0x461   : > { %7595 = vmatpush3.msra.mxu0 %v4020_v22  ;;  %7599 = vmatprep.subr.mxu1 %v8175_v0  ;;  %v4359_v37 = vsel %vm1609_vm2, %v3457_v35, 0  ;;  %v8863_v35 = vand.u32 4294901760, %v5276_v30 }
 0x462   : > { %7600 = vmatpush3.msra.mxu1 %v3943_v19  ;;  %7596 = vmatprep.mubr.msk.f32.mxu0 %vm8176_vm0, %v8175_v0  ;;  %v4427_v38 = vand.u32 4294901760, %v4359_v37 }
 0x463   : > { %7601 = vmatprep.mubr.msk.f32.mxu1 %vm8176_vm0, %v8175_v0  ;;  %7604 = vmatprep.subr.mxu0 %v8175_v0 }
 0x464   : > { %7609 = vmatprep.subr.mxu1 %v8175_v0  ;;  %7597 = vmatmul.mubr.f32.vlgmr.msra.gmra.mxu0 %v3979_v24  ;;  %v4428_v40 = vsub.f32 %v4359_v37, %v4427_v38 }
 0x465   : > { %7602 = vmatmul.mubr.f32.vlgmr.msra.gmra.mxu1 %v3980_v53  ;;  %7605 = vmatpush3.msra.mxu0 %v4021_v25 }
 0x466   : > { %7610 = vmatpush3.msra.mxu1 %v3943_v19  ;;  %7606 = vmatprep.mubr.msk.f32.mxu0 %vm8176_vm0, %v8175_v0  ;;  %v4429_v41 = vand.u32 4294901760, %v4428_v40 }
 0x467   : > { %7611 = vmatprep.mubr.msk.f32.mxu1 %vm8176_vm0, %v8175_v0  ;;  %7614 = vmatprep.subr.mxu0 %v8175_v0 }
 0x468   : > { %7619 = vmatprep.subr.mxu1 %v8175_v0  ;;  %7607 = vmatmul.mubr.f32.vlgmr.msra.gmra.mxu0 %v3978_v21  ;;  %v4430_v43 = vsub.f32 %v4428_v40, %v4429_v41 }
 0x469   : > { %7612 = vmatmul.mubr.f32.vlgmr.msra.gmra.mxu1 %v3978_v21  ;;  %7615 = vmatpush3.msra.mxu0 %v4392_v23 }
 0x46a   : > { %7620 = vmatpush3.msra.mxu1 %v4472_v42  ;;  %7616 = vmatprep.mubr.msk.f32.mxu0 %vm8176_vm0, %v8175_v0  ;;  %v4431_v44 = vand.u32 4294901760, %v4430_v43 }
 0x46b   : > { %7621 = vmatprep.mubr.msk.f32.mxu1 %vm8176_vm0, %v8175_v0  ;;  %7624 = vmatprep.subr.mxu0 %v8175_v0 }
 0x46c   : > { %7629 = vmatprep.subr.mxu1 %v8175_v0  ;;  %7617 = vmatmul.mubr.f32.vlgmr.msra.gmra.mxu0 %v4431_v44 }
 0x46d   : > { %7622 = vmatmul.mubr.f32.vlgmr.msra.gmra.mxu1 %v4427_v38  ;;  %7625 = vmatpush3.msra.mxu0 %v4469_v27 }
 0x46e   : > { %7630 = vmatpush3.msra.mxu1 %v4392_v23  ;;  %7626 = vmatprep.mubr.msk.f32.mxu0 %vm8176_vm0, %v8175_v0 }
 0x46f   : > { %7631 = vmatprep.mubr.msk.f32.mxu1 %vm8176_vm0, %v8175_v0  ;;  %7634 = vmatprep.subr.mxu0 %v8175_v0 }
 0x470   : > { %7639 = vmatprep.subr.mxu1 %v8175_v0  ;;  %7627 = vmatmul.mubr.f32.vlgmr.msra.gmra.mxu0 %v4428_v40  ;;  %v8868_v40 = vsub.f32 %v5276_v30, %v8863_v35 }
 0x471   : > { %7632 = vmatmul.mubr.f32.vlgmr.msra.gmra.mxu1 %v4429_v41  ;;  %7635 = vmatpush3.msra.mxu0 %v4470_v36  ;;  %v8865_v36 = vand.u32 4294901760, %v5275_v32 }
 0x472   : > { %7640 = vmatpush3.msra.mxu1 %v4392_v23  ;;  %7636 = vmatprep.mubr.msk.f32.mxu0 %vm8176_vm0, %v8175_v0 }
 0x473   : > { %7641 = vmatprep.mubr.msk.f32.mxu1 %vm8176_vm0, %v8175_v0  ;;  %7644 = vmatprep.subr.mxu0 %v8175_v0  ;;  %v8871_v41 = vsub.f32 %v5275_v32, %v8865_v36 }
 0x474   : > { %7637 = vmatmul.mubr.f32.vlgmr.msra.gmra.mxu0 %v4427_v38  ;;  %7649 = vmatprep.subr.mxu1 %v8175_v0 }
 0x475   : > { %7642 = vmatmul.mubr.f32.vlgmr.msra.gmra.mxu1 %v4427_v38  ;;  %7646 = vmatprep.mubr.msk.f32.mxu0 %vm8176_vm0, %v8175_v0 }
 0x476   : > { %7651 = vmatprep.mubr.msk.f32.mxu1 %vm8176_vm0, %v8175_v0 }
 0x479   : > { %v3451_v45 = vpop.xlane.xlu1 %3450 }
 0x47a   : > { %8007 = vrcp.f32 %v3451_v45  ;;  %v5393_v45 = vand.u32 4294901760, %v8868_v40 }
 0x47d   : > { %v1605_v46 = vpop.permute.xlu1 %1604 }
 0x47e   : > { %v4841_v47 = vand.u32 4294901760, %v1605_v46 }
 0x480   : > { %v4918_v48 = vsub.f32 %v1605_v46, %v4841_v47  ;;  %7645 = vmatpush3.msra.mxu0 %v4841_v47  ;;  %v5400_v46 = vand.u32 4294901760, %v8871_v41 }
 0x481   : > { %7654 = vmatprep.subr.mxu0 %v8175_v0 }
 0x482   : > { %v4919_v49 = vand.u32 4294901760, %v4918_v48 }
 0x484   : > { %v4920_v50 = vsub.f32 %v4918_v48, %v4919_v49 }
 0x486   : > { %v4921_v52 = vand.u32 4294901760, %v4920_v50  ;;  %v5394_v50 = vsub.f32 %v8868_v40, %v5393_v45 }
 0x487   : > { %v8008_v54 = vpop.eup %8007 }
 0x488   : > { %7650 = vmatpush3.msra.mxu1 %v4921_v52  ;;  %v3459_v55 = vmul.f32 %v8008_v54, %v8773_v12  ;;  %v5401_v52 = vsub.f32 %v8871_v41, %v5400_v46 }
 0x489   : > { %7659 = vmatprep.subr.mxu1 %v8175_v0 }
 0x48a   : > { %v4808_v56 = vsel %vm1609_vm2, %v3459_v55, 0 }
 0x48b   : > { %v4876_v57 = vand.u32 4294901760, %v4808_v56 }
 0x48d   : > { %v4877_v58 = vsub.f32 %v4808_v56, %v4876_v57  ;;  %7652 = vmatmul.mubr.f32.vlgmr.msra.gmra.mxu1 %v4876_v57 }
 0x48e   : > { %7660 = vmatpush3.msra.mxu1 %v4841_v47  ;;  %7661 = vmatprep.mubr.msk.f32.mxu1 %vm8176_vm0, %v8175_v0 }
 0x48f   : > { %7669 = vmatprep.subr.mxu1 %v8175_v0  ;;  %v4878_v59 = vand.u32 4294901760, %v4877_v58 }
 0x491   : > { %7662 = vmatmul.mubr.f32.vlgmr.msra.gmra.mxu1 %v4878_v59  ;;  %v4879_v60 = vsub.f32 %v4877_v58, %v4878_v59 }
 0x492   : > { %7670 = vmatpush3.msra.mxu1 %v4841_v47  ;;  %7671 = vmatprep.mubr.msk.f32.mxu1 %vm8176_vm0, %v8175_v0 }
 0x493   : > { %v4880_v61 = vand.u32 4294901760, %v4879_v60  ;;  %7685 = vmatprep.subr.mxu1 %v8175_v0 }
 0x495   : > { %7647 = vmatmul.mubr.f32.vlgmr.msra.gmra.mxu0 %v4880_v61  ;;  %7672 = vmatmul.mubr.f32.vlgmr.msra.gmra.mxu1 %v4876_v57 }
 0x496   : > { %7655 = vmatpush3.msra.mxu0 %v4918_v48  ;;  %7656 = vmatprep.mubr.msk.f32.mxu0 %vm8176_vm0, %v8175_v0 }
 0x497   : > { %7664 = vmatprep.subr.mxu0 %v8175_v0  ;;  %7693 = vmatprep.mubr.msk.f32.mxu1 %vm8176_vm0, %v8175_v0 }
 0x499   : > { %7657 = vmatmul.mubr.f32.vlgmr.msra.gmra.mxu0 %v4877_v58  ;;  %v5402_v58 = vand.u32 4294901760, %v5401_v52 }
 0x49a   : > { %7665 = vmatpush3.msra.mxu0 %v4919_v49  ;;  %7666 = vmatprep.mubr.msk.f32.mxu0 %vm8176_vm0, %v8175_v0 }
 0x49b   : > { %7674 = vmatprep.subr.mxu0 %v8175_v0 }
 0x49d   : > { %7667 = vmatmul.mubr.f32.vlgmr.msra.gmra.mxu0 %v4876_v57  ;;  %v5395_v57 = vand.u32 4294901760, %v5394_v50 }
 0x49e   : > { %7682 = vmatprep.mubr.msk.f32.mxu0 %vm8176_vm0, %v8175_v0  ;;  %7675 = vmatpush3.msra.mxu0 %v8863_v35 }
 0x49f   : > { %7676 = vmatprep.subr.mxu0 %v8175_v0  ;;  %7686 = vmatpush3.msra.mxu1 %v5395_v57 }
 0x4a0   : > { %7677 = vmatpush3.msra.mxu0 %v8865_v36  ;;  %7687 = vmatprep.subr.mxu1 %v8175_v0 }
 0x4a1   : > { %7678 = vmatprep.subr.mxu0 %v8175_v0  ;;  %7688 = vmatpush3.msra.mxu1 %v5402_v58 }
 0x4a2   : > { %7689 = vmatprep.subr.mxu1 %v8175_v0 }
 0x4a9   : > { %v3611_v62 = vpop.f32.mrf.mxu1 }
 0x4ab   : > { %v7563_v63 = vpop.f32.mrf.mxu1 }
 0x4ad   : > { %v3759_v1 = vpop.f32.mrf.mxu1 }
 0x4af   : > { %v7573_v51 = vpop.f32.mrf.mxu1 }
 0x4b0   : > { %v5273_v51 = vld [vmem:[%s9343_s6] sm:$0xff] }
 0x4b1   : > { %v3535_v2 = vpop.f32.mrf.mxu0  ;;  %v3905_v3 = vpop.f32.mrf.mxu1 }
 0x4b2   : > { %v3612_v4 = vadd.f32 %v3611_v62, %v3535_v2  ;;  %v5274_v62 = vld [vmem:[%s9343_s6 + $0x8] sm:$0xff] }
 0x4b3   : > { %v7558_v5 = vpop.f32.mrf.mxu0  ;;  %v7583_v6 = vpop.f32.mrf.mxu1 }
 0x4b5   : > { %v3685_v7 = vpop.f32.mrf.mxu0 }
 0x4b6   : > { %v3686_v8 = vadd.f32 %v3685_v7, %v3612_v4  ;;  %v8898_v4 = vand.u32 4294901760, %v5273_v51 }
 0x4b7   : > { %v7568_v9 = vpop.f32.mrf.mxu0 }
 0x4b8   : > { %v3760_v10 = vadd.f32 %v3759_v1, %v3686_v8  ;;  %v8890_v1 = vand.u32 4294901760, %v5274_v62  ;;  %v8904_v7 = vsub.f32 %v5273_v51, %v8898_v4 }
 0x4b9   : > { %v3833_v11 = vpop.f32.mrf.mxu0 }
 0x4ba   : > { %v3834_v12 = vadd.f32 %v3833_v11, %v3760_v10  ;;  %7679 = vmatpush3.msra.mxu0 %v8890_v1  ;;  %v5414_v10 = vand.u32 4294901760, %v8904_v7 }
 0x4bb   : > { %v7578_v13 = vpop.f32.mrf.mxu0  ;;  %7680 = vmatprep.subr.mxu0 %v8175_v0 }
 0x4bc   : > { %v8855_v14 = vadd.f32 %v3905_v3, %v3834_v12  ;;  %v8896_v3 = vsub.f32 %v5274_v62, %v8890_v1  ;;  %7681 = vmatpush3.msra.mxu0 %v8898_v4 }
 0x4bd   : > { %7696 = vmatprep.subr.mxu0 %v8175_v0 }
 0x4be   : > { %v5407_v6 = vand.u32 4294901760, %v8896_v3 }
 0x4c0   : > { %v5408_v9 = vsub.f32 %v8896_v3, %v5407_v6 }
 0x4c2   : > { %v5409_v13 = vand.u32 4294901760, %v5408_v9  ;;  %v5803_v9 = vld [vmem:[#allocation7] sm:$0xff] }
 0x4c4   : > { %7690 = vmatpush3.msra.mxu1 %v5409_v13 }
 0x4c5   : > { %7691 = vmatprep.subr.mxu1 %v8175_v0 }
 0x520   : > { %v3984_v15 = vpop.f32.mrf.mxu0  ;;  %v4060_v28 = vpop.f32.mrf.mxu1 }
 0x521   : > { %v4061_v18 = vadd.f32 %v4060_v28, %v3984_v15  ;;  %v5415_v15 = vsub.f32 %v8904_v7, %v5414_v10 }
 0x522   : > { %v7588_v16 = vpop.f32.mrf.mxu0  ;;  %v7593_v17 = vpop.f32.mrf.mxu1 }
 0x523   : > { %v5416_v17 = vand.u32 4294901760, %v5415_v15 }
 0x524   : > { %v4134_v31 = vpop.f32.mrf.mxu0 }
 0x525   : > { %v4135_v33 = vadd.f32 %v4134_v31, %v4061_v18  ;;  %v4208_v19 = vpop.f32.mrf.mxu1  ;;  %7692 = vmatpush3.msra.mxu1 %v5416_v17 }
 0x526   : > { %v7598_v20 = vpop.f32.mrf.mxu0  ;;  %7707 = vmatprep.subr.mxu1 %v8175_v0 }
 0x527   : > { %v4209_v21 = vadd.f32 %v4208_v19, %v4135_v33  ;;  %v7603_v22 = vpop.f32.mrf.mxu1 }
 0x528   : > { %v4282_v23 = vpop.f32.mrf.mxu0 }
 0x529   : > { %v4283_v24 = vadd.f32 %v4282_v23, %v4209_v21  ;;  %v4354_v25 = vpop.f32.mrf.mxu1 }
 0x52a   : > { %v7608_v53 = vpop.f32.mrf.mxu0 }
 0x52b   : > { %v4355_v26 = vadd.f32 %v4354_v25, %v4283_v24  ;;  %v7613_v27 = vpop.f32.mrf.mxu1 }
 0x52c   : > { %v4433_v29 = vpop.f32.mrf.mxu0 }
 0x52d   : > { %v4509_v34 = vpop.f32.mrf.mxu1  ;;  %5257 = vrot.lane.b32.xlu0 %v4355_v26, %s8181_s26 }
 0x52e   : > { %v7618_v37 = vpop.f32.mrf.mxu0  ;;  %v4510_v38 = vadd.f32 %v4509_v34, %v4433_v29 }
 0x52f   : > { %v7623_v39 = vpop.f32.mrf.mxu1 }
 0x530   : > { %v4583_v42 = vpop.f32.mrf.mxu0 }
 0x531   : > { %v4584_v43 = vadd.f32 %v4583_v42, %v4510_v38  ;;  %v4657_v44 = vpop.f32.mrf.mxu1 }
 0x532   : > { %v7628_v47 = vpop.f32.mrf.mxu0 }
 0x533   : > { %v4658_v48 = vadd.f32 %v4657_v44, %v4584_v43  ;;  %v7633_v49 = vpop.f32.mrf.mxu1  ;;  %v7021_v44 = vld [vmem:[%s9344_s7] ss:$0 sm:$0xff] }
 0x534   : > { %v4731_v54 = vpop.f32.mrf.mxu0 }
 0x535   : > { %v4732_v55 = vadd.f32 %v4731_v54, %v4658_v48  ;;  %v4803_v56 = vpop.f32.mrf.mxu1 }
 0x536   : > { %v7638_v59 = vpop.f32.mrf.mxu0 }
 0x537   : > { %v4804_v60 = vadd.f32 %v4803_v56, %v4732_v55  ;;  %v7643_v61 = vpop.f32.mrf.mxu1  ;;  %v8013_v59 = vld [vmem:[%s521_s18] sm:$0xff] }
 0x539   : > { %5261 = vrot.lane.b32.xlu1 %v4804_v60, %s8182_s20  ;;  %s9397_s20 = sld [smem:[#allocation21_spill]] }
 0x54d   : > { %v4958_v63 = vpop.f32.mrf.mxu1 }
 0x54f   : > { %v7653_v2 = vpop.f32.mrf.mxu1 }
 0x551   : > { %v5106_v5 = vpop.f32.mrf.mxu1 }
 0x553   : > { %v7663_v8 = vpop.f32.mrf.mxu1 }
 0x555   : > { %v4882_v11 = vpop.f32.mrf.mxu0  ;;  %v5252_v12 = vpop.f32.mrf.mxu1 }
 0x556   : > { %v4959_v18 = vadd.f32 %v4958_v63, %v4882_v11 }
 0x557   : > { %v7648_v28 = vpop.f32.mrf.mxu0  ;;  %v7673_v16 = vpop.f32.mrf.mxu1 }
 0x559   : > { %v5032_v31 = vpop.f32.mrf.mxu0 }
 0x55a   : > { %v5033_v33 = vadd.f32 %v5032_v31, %v4959_v18 }
 0x55b   : > { %v7658_v19 = vpop.f32.mrf.mxu0 }
 0x55c   : > { %v5107_v20 = vadd.f32 %v5106_v5, %v5033_v33  ;;  %v5804_v5 = vld [vmem:[#allocation7 + $0x8] sm:$0xff] }
 0x55d   : > { %v5180_v21 = vpop.f32.mrf.mxu0  ;;  %v8979_v8 = vand.u32 4294901760, %v5804_v5 }
 0x55e   : > { %v5181_v22 = vadd.f32 %v5180_v21, %v5107_v20 }
 0x55f   : > { %v7668_v23 = vpop.f32.mrf.mxu0  ;;  %v8990_v13 = vsub.f32 %v5804_v5, %v8979_v8  ;;  %v6304_v5 = vld [vmem:[%s9396_s29 + $0x8] sm:$0xff] }
 0x560   : > { %v5253_v24 = vadd.f32 %v5252_v12, %v5181_v22 }
 0x561   : > { %v5937_v17 = vand.u32 4294901760, %v8990_v13 }
 0x562   : > { %5265 = vrot.lane.b32.xlu0 %v5253_v24, %s8183_s14  ;;  %s8096_s14 = scalar_lea.vmem %s6905_s21, 128 }
 0x563   : > { %v5938_v19 = vsub.f32 %v8990_v13, %v5937_v17  ;;  %p8097_p3 = scmp.ne.s32.totalorder %s6905_s21, %s8096_s14 }
 0x565   : > { %v5939_v23 = vand.u32 4294901760, %v5938_v19  ;;  %p8098_p10 = pnand %p8097_p3, %p9403_p12 }
 0x567   : > { %p8099_p2 = pneg %p8098_p10 }
 0x59f   : > { %v5258_v25 = vpop.permute.xlu0 %5257 }
 0x5a0   : > { %v5268_v26 = vsel %vm1609_vm2, %v8855_v14, %v5258_v25 }
 0x5ab   : > { %v5262_v53 = vpop.permute.xlu1 %5261 }
 0x5ac   : > { %v5270_v27 = vsel %vm5269_vm3, %v5268_v26, %v5262_v53 }
 0x5d4   : > { %v5266_v29 = vpop.permute.xlu0 %5265 }
 0x5d5   : > { %v5272_v30 = vsel %vm5271_vm4, %v5270_v27, %v5266_v29  ;;  %v7022_v29 = vld [vmem:[%s9345_s8] ss:$0 sm:$0xff] }
 0x5d6   : > { %v5285_v32 = vsel %vm602_vm1, %v5272_v30, 0 }
 0x5d7   : > { %v5356_v34 = vand.u32 4294901760, %v5285_v32 }
 0x5d9   : > { %v5357_v37 = vsub.f32 %v5285_v32, %v5356_v34  ;;  %7694 = vmatmul.mubr.f32.vlgmr.msra.gmra.mxu1 %v5356_v34  ;;  %v7023_v32 = vld [vmem:[%s9346_s9] ss:$0 sm:$0xff] }
 0x5da   : > { %7708 = vmatpush3.msra.mxu1 %v8863_v35  ;;  %7715 = vmatprep.mubr.msk.f32.mxu1 %vm8176_vm0, %v8175_v0 }
 0x5db   : > { %7709 = vmatprep.subr.mxu1 %v8175_v0  ;;  %v5358_v38 = vand.u32 4294901760, %v5357_v37 }
 0x5dc   : > { %7710 = vmatpush3.msra.mxu1 %v8865_v36 }
 0x5dd   : > { %7711 = vmatprep.subr.mxu1 %v8175_v0  ;;  %v5359_v14 = vsub.f32 %v5357_v37, %v5358_v38 }
 0x5de   : > { %7712 = vmatpush3.msra.mxu1 %v8890_v1 }
 0x5df   : > { %7713 = vmatprep.subr.mxu1 %v8175_v0  ;;  %v5360_v39 = vand.u32 4294901760, %v5359_v14 }
 0x5e0   : > { %7714 = vmatpush3.msra.mxu1 %v8898_v4 }
 0x5e1   : > { %7716 = vmatmul.mubr.f32.vlgmr.msra.gmra.mxu1 %v5358_v38  ;;  %7729 = vmatprep.subr.mxu1 %v8175_v0 }
 0x5e2   : > { %7683 = vmatmul.mubr.f32.vlgmr.msra.gmra.mxu0 %v5360_v39  ;;  %7730 = vmatpush3.msra.mxu1 %v8863_v35 }
 0x5e3   : > { %7697 = vmatpush3.msra.mxu0 %v8868_v40  ;;  %7731 = vmatprep.subr.mxu1 %v8175_v0 }
 0x5e4   : > { %7698 = vmatprep.subr.mxu0 %v8175_v0  ;;  %7732 = vmatpush3.msra.mxu1 %v8865_v36 }
 0x5e5   : > { %7699 = vmatpush3.msra.mxu0 %v8871_v41  ;;  %7733 = vmatprep.subr.mxu1 %v8175_v0 }
 0x5e6   : > { %7700 = vmatprep.subr.mxu0 %v8175_v0  ;;  %7734 = vmatpush3.msra.mxu1 %v8890_v1 }
 0x5e7   : > { %7701 = vmatpush3.msra.mxu0 %v8896_v3  ;;  %7735 = vmatprep.subr.mxu1 %v8175_v0  ;;  %v5806_v3 = vld [vmem:[#allocation7 + $0x18] sm:$0xff] }
 0x5e8   : > { %7702 = vmatprep.subr.mxu0 %v8175_v0  ;;  %7704 = vmatprep.mubr.msk.f32.mxu0 %vm8176_vm0, %v8175_v0 }
 0x5e9   : > { %7703 = vmatpush3.msra.mxu0 %v8904_v7  ;;  %7736 = vmatpush3.msra.mxu1 %v8898_v4  ;;  %v5805_v4 = vld [vmem:[#allocation7 + $0x10] sm:$0xff] }
 0x5ea   : > { %7737 = vmatprep.mubr.msk.f32.mxu1 %vm8176_vm0, %v8175_v0  ;;  %7705 = vmatmul.mubr.f32.vlgmr.msra.gmra.mxu0 %v5357_v37  ;;  %v8977_v7 = vand.u32 4294901760, %v5805_v4 }
 0x5eb   : > { %7718 = vmatprep.subr.mxu0 %v8175_v0  ;;  %7738 = vmatmul.mubr.f32.vlgmr.msra.gmra.mxu1 %v5356_v34 }
 0x5ec   : > { %7719 = vmatpush3.msra.mxu0 %v5393_v45  ;;  %7726 = vmatprep.mubr.msk.f32.mxu0 %vm8176_vm0, %v8175_v0  ;;  %v8987_v12 = vsub.f32 %v5805_v4, %v8977_v7 }
 0x5ed   : > { %7720 = vmatprep.subr.mxu0 %v8175_v0  ;;  %7751 = vmatprep.subr.mxu1 %v8175_v0 }
 0x5ee   : > { %7721 = vmatpush3.msra.mxu0 %v5400_v46  ;;  %7759 = vmatprep.mubr.msk.f32.mxu1 %vm8176_vm0, %v8175_v0  ;;  %v5930_v16 = vand.u32 4294901760, %v8987_v12 }
 0x5ef   : > { %7722 = vmatprep.subr.mxu0 %v8175_v0 }
 0x5f0   : > { %7723 = vmatpush3.msra.mxu0 %v5407_v6  ;;  %v8975_v6 = vand.u32 4294901760, %v5806_v3  ;;  %v5931_v33 = vsub.f32 %v8987_v12, %v5930_v16 }
 0x5f1   : > { %7724 = vmatprep.subr.mxu0 %v8175_v0 }
 0x5f2   : > { %7725 = vmatpush3.msra.mxu0 %v5414_v10  ;;  %v8981_v10 = vand.u32 4294901760, %v5803_v9  ;;  %v8984_v11 = vsub.f32 %v5806_v3, %v8975_v6  ;;  %v5932_v21 = vand.u32 4294901760, %v5931_v33 }
 0x5f3   : > { %7727 = vmatmul.mubr.f32.vlgmr.msra.gmra.mxu0 %v5356_v34  ;;  %7740 = vmatprep.subr.mxu0 %v8175_v0 }
 0x5f4   : > { %7748 = vmatprep.mubr.msk.f32.mxu0 %vm8176_vm0, %v8175_v0  ;;  %7741 = vmatpush3.msra.mxu0 %v8975_v6  ;;  %v8994_v15 = vsub.f32 %v5803_v9, %v8981_v10  ;;  %v5923_v28 = vand.u32 4294901760, %v8984_v11  ;;  %v9158_v9 = vand.u32 4294901760, %v6304_v5 }
 0x5f5   : > { %7742 = vmatprep.subr.mxu0 %v8175_v0 }
 0x5f6   : > { %7743 = vmatpush3.msra.mxu0 %v8977_v7  ;;  %v5944_v18 = vand.u32 4294901760, %v8994_v15  ;;  %v5924_v31 = vsub.f32 %v8984_v11, %v5923_v28 }
 0x5f7   : > { %7744 = vmatprep.subr.mxu0 %v8175_v0 }
 0x5f8   : > { %7745 = vmatpush3.msra.mxu0 %v8979_v8  ;;  %v5925_v20 = vand.u32 4294901760, %v5924_v31  ;;  %v5945_v22 = vsub.f32 %v8994_v15, %v5944_v18 }
 0x5f9   : > { %7746 = vmatprep.subr.mxu0 %v8175_v0 }
 0x5fa   : > { %7747 = vmatpush3.msra.mxu0 %v8981_v10  ;;  %7752 = vmatpush3.msra.mxu1 %v5925_v20  ;;  %v5946_v24 = vand.u32 4294901760, %v5945_v22 }
 0x5fb   : > { %7762 = vmatprep.subr.mxu0 %v8175_v0  ;;  %7753 = vmatprep.subr.mxu1 %v8175_v0 }
 0x5fc   : > { %7754 = vmatpush3.msra.mxu1 %v5932_v21 }
 0x5fd   : > { %7755 = vmatprep.subr.mxu1 %v8175_v0 }
 0x5fe   : > { %7756 = vmatpush3.msra.mxu1 %v5939_v23 }
 0x5ff   : > { %7757 = vmatprep.subr.mxu1 %v8175_v0 }
 0x600   : > { %7758 = vmatpush3.msra.mxu1 %v5946_v24 }
 0x601   : > { %7773 = vmatprep.subr.mxu1 %v8175_v0 }
 0x699   : > { %v5453_v35 = vpop.f32.mrf.mxu1 }
 0x69b   : > { %v7695_v36 = vpop.f32.mrf.mxu1 }
 0x6a1   : > { %v5610_v40 = vpop.f32.mrf.mxu1 }
 0x6a2   : > { %v5362_v41 = vpop.f32.mrf.mxu0 }
 0x6a3   : > { %v7717_v42 = vpop.f32.mrf.mxu1  ;;  %v5363_v45 = vadd.f32 %v7021_v44, %v5362_v41  ;;  %v6310_v41 = vld [vmem:[%s9396_s29 + $0x38] sm:$0xff] }
 0x6a4   : > { %v7684_v43 = vpop.f32.mrf.mxu0  ;;  %v9084_v42 = vand.u32 4294901760, %v6310_v41 }
 0x6a5   : > { %v5454_v48 = vadd.f32 %v5453_v35, %v5363_v45  ;;  %v6309_v43 = vld [vmem:[%s9396_s29 + $0x30] sm:$0xff] }
 0x6a6   : > { %v9090_v44 = vsub.f32 %v6310_v41, %v9084_v42  ;;  %v9092_v45 = vand.u32 4294901760, %v6309_v43 }
 0x6aa   : > { %v5533_v46 = vpop.f32.mrf.mxu0 }
 0x6ab   : > { %v5768_v47 = vpop.f32.mrf.mxu1  ;;  %v5534_v52 = vadd.f32 %v5533_v46, %v5454_v48  ;;  %v6308_v46 = vld [vmem:[%s9396_s29 + $0x28] sm:$0xff]  ;;  %v9101_v48 = vsub.f32 %v6309_v43, %v9092_v45 }
 0x6ac   : > { %v7706_v49 = vpop.f32.mrf.mxu0 }
 0x6ad   : > { %v7739_v50 = vpop.f32.mrf.mxu1  ;;  %v5611_v54 = vadd.f32 %v5610_v40, %v5534_v52  ;;  %v9103_v49 = vand.u32 4294901760, %v6308_v46 }
 0x6ae   : > { %v6307_v50 = vld [vmem:[%s9396_s29 + $0x20] sm:$0xff] }
 0x6b3   : > { %v5693_v55 = vpop.f32.mrf.mxu0 }
 0x6b4   : > { %v5694_v56 = vadd.f32 %v5693_v55, %v5611_v54  ;;  %v6431_v54 = vand.u32 4294901760, %v9101_v48  ;;  %v9115_v55 = vsub.f32 %v6308_v46, %v9103_v49 }
 0x6b5   : > { %v7728_v57 = vpop.f32.mrf.mxu0 }
 0x6b6   : > { %v5769_v58 = vadd.f32 %v5768_v47, %v5694_v56  ;;  %v6424_v47 = vand.u32 4294901760, %v9090_v44  ;;  %v9117_v56 = vand.u32 4294901760, %v6307_v50  ;;  %v6306_v57 = vld [vmem:[%s9396_s29 + $0x18] sm:$0xff] }
 0x6b8   : > { %v5772_v60 = vadd.f32 %v8013_v59, %v5769_v58  ;;  %v6425_v52 = vsub.f32 %v9090_v44, %v6424_v47  ;;  %v6432_v59 = vsub.f32 %v9101_v48, %v6431_v54 }
 0x6ba   : > { %v5773_v61 = vsel %vm602_vm1, %v5772_v60, 0.0  ;;  %v6426_v58 = vand.u32 4294901760, %v6425_v52 }
 0x6bb   : > { %5774 = vadd.xlane.f32.xlu1 %v5773_v61  ;;  %v9129_v61 = vsub.f32 %v6307_v50, %v9117_v56 }
 0x744   : > { %v5775_v62 = vpop.xlane.xlu1 %5774 }
 0x745   : > { %v5777_v63 = vmul.f32 0.03125, %v5775_v62  ;;  %v9132_v62 = vand.u32 4294901760, %v6306_v57 }
 0x747   : > { %v5778_v1 = vsub.f32 %v5772_v60, %v5777_v63  ;;  %v6438_v60 = vand.u32 4294901760, %v9115_v55  ;;  %v6305_v63 = vld [vmem:[%s9396_s29 + $0x10] sm:$0xff]  ;;  %v9146_v4 = vsub.f32 %v6306_v57, %v9132_v62 }
 0x748   : > { %v9142_v3 = vand.u32 4294901760, %v6305_v63 }
 0x749   : > { %v5779_v51 = vmul.f32 %v5778_v1, %v5778_v1 }
 0x74b   : > { %v5780_v2 = vsel %vm602_vm1, %v5779_v51, 0.0  ;;  %v6439_v51 = vsub.f32 %v9115_v55, %v6438_v60 }
 0x74c   : > { %5781 = vadd.xlane.f32.xlu0 %v5780_v2  ;;  %v6445_v2 = vand.u32 4294901760, %v9129_v61 }
 0x7d5   : > { %v5782_v25 = vpop.xlane.xlu0 %5781 }
 0x7d6   : > { %v5783_v53 = vmul.f32 0.03125, %v5782_v25 }
 0x7d8   : > { %v5784_v26 = vadd.f32 1e-05, %v5783_v53 }
 0x7da   : > { %8009 = vrsqrt.f32 %v5784_v26 }
 0x7e7   : > { %v8010_v27 = vpop.eup %8009 }
 0x7e8   : > { %v5786_v30 = vmul.f32 %v8010_v27, %v5778_v1  ;;  %v6433_v1 = vand.u32 4294901760, %v6432_v59 }
 0x7ea   : > { %v5794_v34 = vmul.f32 %v7022_v29, %v5786_v30 }
 0x7ec   : > { %v9029_v37 = vadd.f32 %v7023_v32, %v5794_v34  ;;  %v7024_v32 = vld [vmem:[%s9397_s20] ss:$0 sm:$0xff] }
 0x7ee   : > { %v5815_v38 = vsel %vm602_vm1, %v9029_v37, 0 }
 0x7ef   : > { %v5886_v14 = vand.u32 4294901760, %v5815_v38 }
 0x7f1   : > { %v5887_v39 = vsub.f32 %v5815_v38, %v5886_v14  ;;  %7760 = vmatmul.mubr.f32.vlgmr.msra.gmra.mxu1 %v5886_v14 }
 0x7f2   : > { %7774 = vmatpush3.msra.mxu1 %v8975_v6  ;;  %7781 = vmatprep.mubr.msk.f32.mxu1 %vm8176_vm0, %v8175_v0 }
 0x7f3   : > { %7775 = vmatprep.subr.mxu1 %v8175_v0  ;;  %v5888_v35 = vand.u32 4294901760, %v5887_v39 }
 0x7f4   : > { %7776 = vmatpush3.msra.mxu1 %v8977_v7 }
 0x7f5   : > { %7777 = vmatprep.subr.mxu1 %v8175_v0  ;;  %v5889_v36 = vsub.f32 %v5887_v39, %v5888_v35 }
 0x7f6   : > { %7778 = vmatpush3.msra.mxu1 %v8979_v8 }
 0x7f7   : > { %7779 = vmatprep.subr.mxu1 %v8175_v0  ;;  %v5890_v40 = vand.u32 4294901760, %v5889_v36 }
 0x7f8   : > { %7780 = vmatpush3.msra.mxu1 %v8981_v10 }
 0x7f9   : > { %7782 = vmatmul.mubr.f32.vlgmr.msra.gmra.mxu1 %v5888_v35  ;;  %7795 = vmatprep.subr.mxu1 %v8175_v0 }
 0x7fa   : > { %7749 = vmatmul.mubr.f32.vlgmr.msra.gmra.mxu0 %v5890_v40  ;;  %7796 = vmatpush3.msra.mxu1 %v8975_v6  ;;  %v6440_v6 = vand.u32 4294901760, %v6439_v51 }
 0x7fb   : > { %7763 = vmatpush3.msra.mxu0 %v8984_v11  ;;  %7797 = vmatprep.subr.mxu1 %v8175_v0  ;;  %v6303_v11 = vld [vmem:[%s9396_s29] sm:$0xff] }
 0x7fc   : > { %7764 = vmatprep.subr.mxu0 %v8175_v0  ;;  %7798 = vmatpush3.msra.mxu1 %v8977_v7  ;;  %v6446_v7 = vsub.f32 %v9129_v61, %v6445_v2 }
 0x7fd   : > { %7765 = vmatpush3.msra.mxu0 %v8987_v12  ;;  %7799 = vmatprep.subr.mxu1 %v8175_v0 }
 0x7fe   : > { %7766 = vmatprep.subr.mxu0 %v8175_v0  ;;  %7800 = vmatpush3.msra.mxu1 %v8979_v8  ;;  %v9156_v8 = vsub.f32 %v6305_v63, %v9142_v3  ;;  %v6447_v12 = vand.u32 4294901760, %v6446_v7 }
 0x7ff   : > { %7767 = vmatpush3.msra.mxu0 %v8990_v13  ;;  %7801 = vmatprep.subr.mxu1 %v8175_v0 }
 0x800   : > { %7768 = vmatprep.subr.mxu0 %v8175_v0  ;;  %7770 = vmatprep.mubr.msk.f32.mxu0 %vm8176_vm0, %v8175_v0  ;;  %v6459_v13 = vand.u32 4294901760, %v9156_v8 }
 0x801   : > { %7769 = vmatpush3.msra.mxu0 %v8994_v15  ;;  %7802 = vmatpush3.msra.mxu1 %v8981_v10  ;;  %v6452_v10 = vand.u32 4294901760, %v9146_v4  ;;  %v9169_v15 = vsub.f32 %v6304_v5, %v9158_v9 }
 0x802   : > { %7803 = vmatprep.mubr.msk.f32.mxu1 %vm8176_vm0, %v8175_v0  ;;  %7771 = vmatmul.mubr.f32.vlgmr.msra.gmra.mxu0 %v5887_v39 }
 0x803   : > { %7784 = vmatprep.subr.mxu0 %v8175_v0  ;;  %7804 = vmatmul.mubr.f32.vlgmr.msra.gmra.mxu1 %v5886_v14 }
 0x804   : > { %7785 = vmatpush3.msra.mxu0 %v5923_v28  ;;  %7792 = vmatprep.mubr.msk.f32.mxu0 %vm8176_vm0, %v8175_v0  ;;  %v9171_v28 = vand.u32 4294901760, %v6303_v11 }
 0x805   : > { %7786 = vmatprep.subr.mxu0 %v8175_v0  ;;  %7825 = vmatprep.subr.mxu1 %v8175_v0 }
 0x806   : > { %7787 = vmatpush3.msra.mxu0 %v5930_v16  ;;  %7841 = vmatprep.mubr.msk.f32.mxu1 %vm8176_vm0, %v8175_v0  ;;  %v6453_v16 = vsub.f32 %v9146_v4, %v6452_v10  ;;  %v9184_v31 = vsub.f32 %v6303_v11, %v9171_v28 }
 0x807   : > { %7788 = vmatprep.subr.mxu0 %v8175_v0  ;;  %7826 = vmatpush3.msra.mxu1 %v6426_v58 }
 0x808   : > { %7789 = vmatpush3.msra.mxu0 %v5937_v17  ;;  %7827 = vmatprep.subr.mxu1 %v8175_v0  ;;  %v6460_v17 = vsub.f32 %v9156_v8, %v6459_v13  ;;  %v6454_v33 = vand.u32 4294901760, %v6453_v16  ;;  %v6473_v21 = vand.u32 4294901760, %v9184_v31 }
 0x809   : > { %7790 = vmatprep.subr.mxu0 %v8175_v0  ;;  %7828 = vmatpush3.msra.mxu1 %v6433_v1 }
 0x80a   : > { %7791 = vmatpush3.msra.mxu0 %v5944_v18  ;;  %7829 = vmatprep.subr.mxu1 %v8175_v0  ;;  %v6466_v18 = vand.u32 4294901760, %v9169_v15  ;;  %v6461_v19 = vand.u32 4294901760, %v6460_v17  ;;  %v6474_v23 = vsub.f32 %v9184_v31, %v6473_v21 }
 0x80b   : > { %7793 = vmatmul.mubr.f32.vlgmr.msra.gmra.mxu0 %v5886_v14  ;;  %7806 = vmatprep.subr.mxu0 %v8175_v0 }
 0x80c   : > { %7822 = vmatprep.mubr.msk.f32.mxu0 %vm8176_vm0, %v8175_v0  ;;  %7807 = vmatpush3.msra.mxu0 %v9084_v42  ;;  %v6467_v20 = vsub.f32 %v9169_v15, %v6466_v18  ;;  %v6475_v24 = vand.u32 4294901760, %v6474_v23 }
 0x80d   : > { %7808 = vmatprep.subr.mxu0 %v8175_v0  ;;  %7830 = vmatpush3.msra.mxu1 %v6440_v6 }
 0x80e   : > { %7809 = vmatpush3.msra.mxu0 %v9092_v45  ;;  %7831 = vmatprep.subr.mxu1 %v8175_v0  ;;  %v6468_v22 = vand.u32 4294901760, %v6467_v20 }
 0x80f   : > { %7810 = vmatprep.subr.mxu0 %v8175_v0  ;;  %7832 = vmatpush3.msra.mxu1 %v6447_v12 }
 0x810   : > { %7811 = vmatpush3.msra.mxu0 %v9103_v49  ;;  %7833 = vmatprep.subr.mxu1 %v8175_v0 }
 0x811   : > { %7812 = vmatprep.subr.mxu0 %v8175_v0  ;;  %7834 = vmatpush3.msra.mxu1 %v6454_v33 }
 0x812   : > { %7813 = vmatpush3.msra.mxu0 %v9117_v56  ;;  %7835 = vmatprep.subr.mxu1 %v8175_v0 }
 0x813   : > { %7814 = vmatprep.subr.mxu0 %v8175_v0  ;;  %7836 = vmatpush3.msra.mxu1 %v6461_v19  ;;  %v7027_v19 = vld [vmem:[%s9401_s0] ss:$0 sm:$0xff] }
 0x814   : > { %7815 = vmatpush3.msra.mxu0 %v9132_v62  ;;  %7837 = vmatprep.subr.mxu1 %v8175_v0 }
 0x815   : > { %7816 = vmatprep.subr.mxu0 %v8175_v0  ;;  %7838 = vmatpush3.msra.mxu1 %v6468_v22 }
 0x816   : > { %7817 = vmatpush3.msra.mxu0 %v9142_v3  ;;  %7839 = vmatprep.subr.mxu1 %v8175_v0 }
 0x817   : > { %7818 = vmatprep.subr.mxu0 %v8175_v0  ;;  %7840 = vmatpush3.msra.mxu1 %v6475_v24 }
 0x818   : > { %7819 = vmatpush3.msra.mxu0 %v9158_v9  ;;  %7863 = vmatprep.subr.mxu1 %v8175_v0 }
 0x819   : > { %7820 = vmatprep.subr.mxu0 %v8175_v0 }
 0x81a   : > { %7821 = vmatpush3.msra.mxu0 %v9171_v28 }
 0x81b   : > { %7844 = vmatprep.subr.mxu0 %v8175_v0 }
 0x8b1   : > { %v5983_v25 = vpop.f32.mrf.mxu1 }
 0x8b3   : > { %v7761_v53 = vpop.f32.mrf.mxu1 }
 0x8b9   : > { %v6140_v26 = vpop.f32.mrf.mxu1 }
 0x8ba   : > { %v5892_v27 = vpop.f32.mrf.mxu0 }
 0x8bb   : > { %v7783_v29 = vpop.f32.mrf.mxu1  ;;  %v5893_v34 = vadd.f32 %v7024_v32, %v5892_v27 }
 0x8bc   : > { %v7750_v30 = vpop.f32.mrf.mxu0 }
 0x8bd   : > { %v5984_v39 = vadd.f32 %v5983_v25, %v5893_v34 }
 0x8c2   : > { %v6063_v38 = vpop.f32.mrf.mxu0 }
 0x8c3   : > { %v6298_v14 = vpop.f32.mrf.mxu1  ;;  %v6064_v40 = vadd.f32 %v6063_v38, %v5984_v39 }
 0x8c4   : > { %v7772_v35 = vpop.f32.mrf.mxu0 }
 0x8c5   : > { %v7805_v36 = vpop.f32.mrf.mxu1  ;;  %v6141_v41 = vadd.f32 %v6140_v26, %v6064_v40 }
 0x8cb   : > { %v6223_v43 = vpop.f32.mrf.mxu0 }
 0x8cc   : > { %v6224_v46 = vadd.f32 %v6223_v43, %v6141_v41 }
 0x8cd   : > { %v7794_v50 = vpop.f32.mrf.mxu0 }
 0x8ce   : > { %v6299_v52 = vadd.f32 %v6298_v14, %v6224_v46 }
 0x8d0   : > { %v6302_v57 = vmax.f32 %v6299_v52, 0.0 }
 0x8d2   : > { %v6320_v58 = vsel %vm6318_vm5, %v6302_v57, 0 }
 0x8d3   : > { %v9204_v59 = vand.u32 4294901760, %v6320_v58 }
 0x8d5   : > { %v6396_v63 = vsub.f32 %v6320_v58, %v9204_v59  ;;  %7842 = vmatmul.mubr.f32.vlgmr.msra.gmra.mxu1 %v9204_v59 }
 0x8d6   : > { %7864 = vmatpush3.msra.mxu1 %v9084_v42  ;;  %7879 = vmatprep.mubr.msk.f32.mxu1 %vm8176_vm0, %v8175_v0 }
 0x8d7   : > { %7865 = vmatprep.subr.mxu1 %v8175_v0  ;;  %v6397_v1 = vand.u32 4294901760, %v6396_v63 }
 0x8d8   : > { %7866 = vmatpush3.msra.mxu1 %v9092_v45 }
 0x8d9   : > { %7867 = vmatprep.subr.mxu1 %v8175_v0  ;;  %v6398_v51 = vsub.f32 %v6396_v63, %v6397_v1 }
 0x8da   : > { %7868 = vmatpush3.msra.mxu1 %v9103_v49 }
 0x8db   : > { %7869 = vmatprep.subr.mxu1 %v8175_v0  ;;  %v6399_v5 = vand.u32 4294901760, %v6398_v51 }
 0x8dc   : > { %7870 = vmatpush3.msra.mxu1 %v9117_v56 }
 0x8dd   : > { %7871 = vmatprep.subr.mxu1 %v8175_v0  ;;  %7823 = vmatmul.mubr.f32.vlgmr.msra.gmra.mxu0 %v6399_v5 }
 0x8de   : > { %7845 = vmatpush3.msra.mxu0 %v9090_v44  ;;  %7872 = vmatpush3.msra.mxu1 %v9132_v62 }
 0x8df   : > { %7846 = vmatprep.subr.mxu0 %v8175_v0  ;;  %7873 = vmatprep.subr.mxu1 %v8175_v0 }
 0x8e0   : > { %7847 = vmatpush3.msra.mxu0 %v9101_v48  ;;  %7874 = vmatpush3.msra.mxu1 %v9142_v3 }
 0x8e1   : > { %7848 = vmatprep.subr.mxu0 %v8175_v0  ;;  %7875 = vmatprep.subr.mxu1 %v8175_v0 }
 0x8e2   : > { %7849 = vmatpush3.msra.mxu0 %v9115_v55  ;;  %7876 = vmatpush3.msra.mxu1 %v9158_v9 }
 0x8e3   : > { %7850 = vmatprep.subr.mxu0 %v8175_v0  ;;  %7877 = vmatprep.subr.mxu1 %v8175_v0 }
 0x8e4   : > { %7851 = vmatpush3.msra.mxu0 %v9129_v61  ;;  %7878 = vmatpush3.msra.mxu1 %v9171_v28 }
 0x8e5   : > { %7852 = vmatprep.subr.mxu0 %v8175_v0  ;;  %7880 = vmatmul.mubr.f32.vlgmr.msra.gmra.mxu1 %v6397_v1 }
 0x8e6   : > { %7901 = vmatprep.subr.mxu1 %v8175_v0  ;;  %7853 = vmatpush3.msra.mxu0 %v9146_v4 }
 0x8e7   : > { %7902 = vmatpush3.msra.mxu1 %v9084_v42  ;;  %7854 = vmatprep.subr.mxu0 %v8175_v0 }
 0x8e8   : > { %7903 = vmatprep.subr.mxu1 %v8175_v0  ;;  %7855 = vmatpush3.msra.mxu0 %v9156_v8 }
 0x8e9   : > { %7904 = vmatpush3.msra.mxu1 %v9092_v45  ;;  %7856 = vmatprep.subr.mxu0 %v8175_v0 }
 0x8ea   : > { %7905 = vmatprep.subr.mxu1 %v8175_v0  ;;  %7857 = vmatpush3.msra.mxu0 %v9169_v15 }
 0x8eb   : > { %7906 = vmatpush3.msra.mxu1 %v9103_v49  ;;  %7858 = vmatprep.subr.mxu0 %v8175_v0 }
 0x8ec   : > { %7907 = vmatprep.subr.mxu1 %v8175_v0  ;;  %7859 = vmatpush3.msra.mxu0 %v9184_v31 }
 0x8ed   : > { %7860 = vmatprep.mubr.msk.f32.mxu0 %vm8176_vm0, %v8175_v0  ;;  %7908 = vmatpush3.msra.mxu1 %v9117_v56  ;;  %v7025_v56 = vld [vmem:[%s9398_s17] ss:$0 sm:$0xff]  ;;  %s6891_s17 = scalar_lea.sflag [#allocation4], %s8411_s12 }
 0x8ee   : > { %7861 = vmatmul.mubr.f32.vlgmr.msra.gmra.mxu0 %v6396_v63  ;;  %7882 = vmatprep.subr.mxu0 %v8175_v0 }
 0x8ef   : > { %7909 = vmatprep.subr.mxu1 %v8175_v0  ;;  %7883 = vmatpush3.msra.mxu0 %v6424_v47 }
 0x8f0   : > { %7910 = vmatpush3.msra.mxu1 %v9132_v62  ;;  %7884 = vmatprep.subr.mxu0 %v8175_v0 }
 0x8f1   : > { %7911 = vmatprep.subr.mxu1 %v8175_v0  ;;  %7885 = vmatpush3.msra.mxu0 %v6431_v54 }
 0x8f2   : > { %7912 = vmatpush3.msra.mxu1 %v9142_v3  ;;  %7886 = vmatprep.subr.mxu0 %v8175_v0 }
 0x8f3   : > { %7913 = vmatprep.subr.mxu1 %v8175_v0  ;;  %7887 = vmatpush3.msra.mxu0 %v6438_v60 }
 0x8f4   : > { %7914 = vmatpush3.msra.mxu1 %v9158_v9  ;;  %7888 = vmatprep.subr.mxu0 %v8175_v0 }
 0x8f5   : > { %7915 = vmatprep.subr.mxu1 %v8175_v0  ;;  %7889 = vmatpush3.msra.mxu0 %v6445_v2 }
 0x8f6   : > { %7916 = vmatpush3.msra.mxu1 %v9171_v28  ;;  %7917 = vmatprep.mubr.msk.f32.mxu1 %vm8176_vm0, %v8175_v0 }
 0x8f7   : > { %7890 = vmatprep.subr.mxu0 %v8175_v0  ;;  %7918 = vmatmul.mubr.f32.vlgmr.msra.gmra.mxu1 %v9204_v59 }
 0x8f8   : > { %7891 = vmatpush3.msra.mxu0 %v6452_v10  ;;  %7898 = vmatprep.mubr.msk.f32.mxu0 %vm8176_vm0, %v8175_v0 }
 0x8f9   : > { %7892 = vmatprep.subr.mxu0 %v8175_v0 }
 0x8fa   : > { %7893 = vmatpush3.msra.mxu0 %v6459_v13 }
 0x8fb   : > { %7894 = vmatprep.subr.mxu0 %v8175_v0 }
 0x8fc   : > { %7895 = vmatpush3.msra.mxu0 %v6466_v18 }
 0x8fd   : > { %7896 = vmatprep.subr.mxu0 %v8175_v0 }
 0x8fe   : > { %7897 = vmatpush3.msra.mxu0 %v6473_v21 }
 0x8ff   : > { %7899 = vmatmul.mubr.f32.vlgmr.msra.gmra.mxu0 %v9204_v59 }
 0x995   : > { %v6512_v42 = vpop.f32.mrf.mxu1 }
 0x997   : > { %v7843_v44 = vpop.f32.mrf.mxu1 }
 0x99d   : > { %v6401_v45 = vpop.f32.mrf.mxu0 }
 0x99e   : > { %v6402_v60 = vadd.f32 %v7025_v56, %v6401_v45 }
 0x99f   : > { %v7824_v47 = vpop.f32.mrf.mxu0 }
 0x9a0   : > { %v6513_v0 = vadd.f32 %v6512_v42, %v6402_v60 }
 0x9a5   : > { %v6681_v48 = vpop.f32.mrf.mxu1 }
 0x9a7   : > { %v7881_v49 = vpop.f32.mrf.mxu1 }
 0x9ae   : > { %v6600_v54 = vpop.f32.mrf.mxu0 }
 0x9af   : > { %v6601_v2 = vadd.f32 %v6600_v54, %v6513_v0 }
 0x9b0   : > { %v7862_v55 = vpop.f32.mrf.mxu0 }
 0x9b1   : > { %v6682_v3 = vadd.f32 %v6681_v48, %v6601_v2 }
 0x9b7   : > { %v6855_v61 = vpop.f32.mrf.mxu1 }
 0x9b9   : > { %v7919_v62 = vpop.f32.mrf.mxu1 }
 0x9bf   : > { %v6776_v4 = vpop.f32.mrf.mxu0 }
 0x9c0   : > { %v6777_v6 = vadd.f32 %v6776_v4, %v6682_v3 }
 0x9c1   : > { %v7900_v7 = vpop.f32.mrf.mxu0 }
 0x9c2   : > { %v6856_v8 = vadd.f32 %v6855_v61, %v6777_v6 }
 0x9c4   : > { %v6859_v9 = vadd.f32 %v6856_v8, %v9029_v37  ;;  %v7026_v37 = vld [vmem:[%s9400_s30] ss:$0 sm:$0xff]  ;;  %s8100_s30 = sshll.u32 %s8184_s15, 4  ;;  %s8101_s30 = int_to_ptr.vmem [resolvable:$false] %s8100_s30 }
 0x9c5   : > { %s8102_s25 = scalar_lea.vmem %s8101_s30, 256  ;;  %p8103_p13 = scmp.lt.s32.totalorder %s6905_s21, %s8101_s30 }
 0x9c6   : > { %v6860_v10 = vsel %vm602_vm1, %v6859_v9, 0.0  ;;  %p8104_p0 = scmp.lt.s32.totalorder %s8102_s25, %s8096_s14 }
 0x9c7   : > { %6861 = vadd.xlane.f32.xlu0 %v6860_v10 }
 0x9c8   : > { %p8105_p5 = por %p8104_p0, %p8103_p13 }
 0x9ca   : > { %p8106_p9 = pnand %p8105_p5, %p8099_p2 }
 0xa50   : > { %v6862_v11 = vpop.xlane.xlu0 %6861 }
 0xa51   : > { %v6863_v12 = vmul.f32 0.03125, %v6862_v11 }
 0xa53   : > { %v6864_v13 = vsub.f32 %v6859_v9, %v6863_v12 }
 0xa55   : > { %v6865_v15 = vmul.f32 %v6864_v13, %v6864_v13 }
 0xa57   : > { %v6866_v28 = vsel %vm602_vm1, %v6865_v15, 0.0 }
 0xa58   : > { %6867 = vadd.xlane.f32.xlu1 %v6866_v28 }
 0xae1   : > { %v6868_v16 = vpop.xlane.xlu1 %6867 }
 0xae2   : > { %v6869_v17 = vmul.f32 0.03125, %v6868_v16 }
 0xae4   : > { %v6870_v18 = vadd.f32 1e-05, %v6869_v17 }
 0xae6   : > { %8011 = vrsqrt.f32 %v6870_v18 }
 0xaf3   : > { %v8012_v31 = vpop.eup %8011 }
 0xaf4   : > { %v6872_v33 = vmul.f32 %v8012_v31, %v6864_v13 }
 0xaf6   : > { %v6880_v20 = vmul.f32 %v7026_v37, %v6872_v33 }
 0xaf8   : > { %v6888_v21 = vadd.f32 %v7027_v19, %v6880_v20 }
 0xafa   : > { %6889 = vst.msk [vmem:[%s587_s11] sm:$0xff] %vm602_vm1, %v6888_v21 }
 0xafb   : > { %8109 = shalt.err (!%p8106_p9)
}
 0xafc   : > { %s8110_s16 = scalar_lea.hbm %s6902_s23, 128  ;;  %s8114_s13 = scalar_lea.hbm %s9402_s27, 256 }
 0xafd   : > { %p8111_p1 = scmp.ne.s32.totalorder %s6902_s23, %s8110_s16  ;;  %p8115_p7 = scmp.lt.s32.totalorder %s6902_s23, %s9402_s27 }
 0xafe   : > { %p8116_p11 = scmp.lt.s32.totalorder %s8114_s13, %s8110_s16 }
 0xaff   : > { %p8112_p4 = pnand %p8111_p1, %p9403_p12 }
 0xb00   : > { %p8117_p8 = por %p8116_p11, %p8115_p7 }
 0xb01   : > { %p8113_p6 = pneg %p8112_p4 }
 0xb03   : > { %p8118_p3 = pnand %p8117_p8, %p8113_p6 }
 0xb05   : > { %8121 = shalt.err (!%p8118_p3)
}
 0xb06   : > { %7928 = dma.vmem_to_hbm [thread:$0]  (%p9403_p12), %s6905_s21, 128, %s6902_s23, %s6891_s17  }
 0xb07 PF: > { %s9404_s11 = sld [smem:[#allocation13_spill]]  ;;  %p9407_p2 = scmp.ge.s32.totalorder %s8168_s24, 2 }
 0xb08   : > { %s9405_s26 = sld [smem:[#allocation15_spill]] }
 0xb0d   : > { %s6916_s20 = sand.u32 1, %s9404_s11  }
 0xb0e   : > { %p9406_p10 = scmp.ne.s32.totalorder %s9405_s26, 0  ;;  %s6917_s14 = scalar_lea.sflag [#allocation4], %s6916_s20 }
 0xb10   : > { %p7942_p13 = pnand %p9407_p2, %p9406_p10 }
 0xb12   : > { %p7943_p0 = pneg %p7942_p13 }
 0xb14   : > { %8151 = dma.done.wait (%p7943_p0), %s6917_s14, 128  }
 0xb15   : > { %8153 = vsyncadd (%p7943_p0), %s6917_s14, 4294967168  ;;  %s9408_s24 = sld [smem:[#allocation16_spill]]  ;;  %s9411_s21 = smov %s8160_s22 }
 0xb16   : > { %s9409_s15 = sld [smem:[#allocation14_spill]] }
 0xb17   : > { %s9410_s23 = sld [smem:[#allocation17_spill]] }
 0xb1b   : > { %p32_p5 = scmp.ge.s32.totalorder %s9408_s24, 4  }
 0xb1c   : > { %s9412_s22 = smov %s9409_s15 }
 0xb1d   :  { %34 = sbr.rel (!%p32_p5) target bundleno = 16 (0x10), region = 146 }
 0xb22   :  { %6922 = vsyncpa [#allocation3], 1 }
 0xb23   :  { %6924 = vsyncpa [#allocation3 + $0x1], 1 }
 0xb24   :  { %6925 = vsyncpa [#allocation6], 1 }
 0xb25   :  { %6927 = vsyncpa [#allocation6 + $0x1], 1 }
 0xb26   :  { %6928 = vsyncpa [#allocation4], 1 }
 0xb27   :  { %6930 = vsyncpa [#allocation4 + $0x1], 1 }

</bundles_post_ra>
